<compile_context>
chip_gen: v5e
topology: v5e:2x2
jax: 0.10.0
libtpu: 0.0.40
codegen_flags: <defaults>
</compile_context>

<pallas_src>
import functools

import numpy as np
import jax
import jax.numpy as jnp
from jax.experimental import pallas as pl
from jax.experimental.pallas import tpu as pltpu


# --------------------------------------------------------------------------------------
# Synthetic config (deterministic, in-script).  RPN_BATCHSIZE is chosen larger than the
# total number of anchors so the random fg/bg subsampling branches of the reference
# implementation never trigger (they use host-side np.random.permutation).
# --------------------------------------------------------------------------------------
class _C:
    pass


cfg = _C()
cfg.TRAIN = _C()
cfg.TRAIN.ANCHOR_POSITIVE_OVERLAP = 0.7
cfg.TRAIN.ANCHOR_NEGATIVE_OVERLAP = 0.3
cfg.TRAIN.RPN_FG_FRACTION = 0.25
cfg.TRAIN.RPN_BATCHSIZE = 8192
cfg.TRAIN.RPN_BBOX_INSIDE_WEIGHTS = (1.0, 1.0, 1.0, 1.0)
cfg.TRAIN.RPN_POSITIVE_WEIGHT = -1.0


# --------------------------------------------------------------------------------------
# generate_anchors (standard py-faster-rcnn, numpy glue, deterministic)
# --------------------------------------------------------------------------------------
def _whctrs(anchor):
    w = anchor[2] - anchor[0] + 1
    h = anchor[3] - anchor[1] + 1
    x_ctr = anchor[0] + 0.5 * (w - 1)
    y_ctr = anchor[1] + 0.5 * (h - 1)
    return w, h, x_ctr, y_ctr


def _mkanchors(ws, hs, x_ctr, y_ctr):
    ws = ws[:, None]
    hs = hs[:, None]
    return np.hstack(
        (x_ctr - 0.5 * (ws - 1), y_ctr - 0.5 * (hs - 1),
         x_ctr + 0.5 * (ws - 1), y_ctr + 0.5 * (hs - 1)))


def _ratio_enum(anchor, ratios):
    w, h, x_ctr, y_ctr = _whctrs(anchor)
    size = w * h
    size_ratios = size / ratios
    ws = np.round(np.sqrt(size_ratios))
    hs = np.round(ws * ratios)
    return _mkanchors(ws, hs, x_ctr, y_ctr)


def _scale_enum(anchor, scales):
    w, h, x_ctr, y_ctr = _whctrs(anchor)
    ws = w * scales
    hs = h * scales
    return _mkanchors(ws, hs, x_ctr, y_ctr)


def generate_anchors(base_size=16, ratios=np.array([0.5, 1, 2]),
                     scales=2 ** np.arange(3, 6)):
    base_anchor = np.array([1, 1, base_size, base_size], dtype=np.float64) - 1
    ratio_anchors = _ratio_enum(base_anchor, np.asarray(ratios, dtype=np.float64))
    anchors = np.vstack(
        [_scale_enum(ratio_anchors[i, :], np.asarray(scales, dtype=np.float64))
         for i in range(ratio_anchors.shape[0])])
    return anchors


# --------------------------------------------------------------------------------------
# Tiling helpers (generation-aware)
# --------------------------------------------------------------------------------------
def _round_up(x, m):
    return -(-x // m) * m


def _vmem_budgets():
    """Return (vmem_limit_bytes request, per-tile working-set budget) per generation."""
    phys = 64 * 1024 * 1024
    try:
        info = pltpu.get_tpu_info()
        phys = int(getattr(info, "vmem_capacity_bytes", phys))
    except Exception:
        pass
    if phys >= 100 * 1024 * 1024:
        # v5e / v6e class parts have 128 MiB physical VMEM: larger tiles stay on the
        # fused single-tile path and amortize the ~0.35 us per-grid-step overhead.
        return 64 * 1024 * 1024, 24 * 1024 * 1024
    # v7x class: 64 MiB per TensorCore -> stay at a 32 MiB-shaped request.
    return min(32 * 1024 * 1024, max(16 * 1024 * 1024, phys // 2)), 12 * 1024 * 1024


def _choose_tiling(n, g, batch, max_tile_n=None, min_total_steps=2):
    """Pick num_tiles first, then tile_n = round_up(ceil(n128/num_tiles), 128), so total
    lane padding is bounded by <128 per tile (review item 1)."""
    n128 = _round_up(max(int(n), 1), 128)
    vmem_limit, budget = _vmem_budgets()
    # live (G, Nt) f32 temporaries plus the double-buffered packed (16,Nt)/(8,Nt) I/O
    per_lane_bytes = 4 * (12 * max(int(g), 1) + 48)
    cap = max(128, (budget // per_lane_bytes) // 128 * 128)
    if max_tile_n is not None:
        cap = min(cap, max(128, (int(max_tile_n) // 128) * 128))
    cap = min(cap, n128)
    num_tiles = -(-n128 // cap)
    # v7x has 2 TensorCores: make sure the (num_tiles, B) grid has >= 2 steps when
    # possible (harmless on single-TC v5e/v6e).
    max_tiles = n128 // 128
    while batch * num_tiles < min_total_steps and num_tiles < max_tiles:
        num_tiles += 1
    tile_n = _round_up(-(-n128 // num_tiles), 128)
    num_tiles = -(-n128 // tile_n)
    n_pad = num_tiles * tile_n
    return tile_n, num_tiles, n_pad, vmem_limit


# --------------------------------------------------------------------------------------
# Kernels
# --------------------------------------------------------------------------------------
# Packed anchor slab rows (16, N_pad):
#   0-3: x1, y1, x2, y2        4: area            5: inside mask (padded tail -> 0)
#   6-7: ctr_x, ctr_y          8-9: 1/aw, 1/ah    10-11: log(aw), log(ah)
#   12-15: unused (sublane padding is free; the slab is 16 rows either way)
def _iou(anc, gts, approx_recip):
    """bbox_overlaps_batch: packed anchor slab (16, Nt) vs gt side info (G, 8)."""
    x1, y1, x2, y2 = anc[0:1, :], anc[1:2, :], anc[2:3, :], anc[3:4, :]
    a_area = anc[4:5, :]
    gx1, gy1 = gts[:, 0:1], gts[:, 1:2]
    gx2, gy2 = gts[:, 2:3], gts[:, 3:4]
    g_area, gt_zero = gts[:, 4:5], gts[:, 5:6]
    iw = jnp.maximum(jnp.minimum(x2, gx2) - jnp.maximum(x1, gx1) + 1.0, 0.0)   # (G, Nt)
    ih = jnp.maximum(jnp.minimum(y2, gy2) - jnp.maximum(y1, gy1) + 1.0, 0.0)   # (G, Nt)
    inter = iw * ih
    union = a_area + g_area - inter
    if approx_recip:
        ov = inter * pl.reciprocal(union, approx=True)   # opt-in: EUP instead of VALU
    else:
        ov = inter / union                               # exact (0.7/0.3 threshold parity)
    return jnp.where(gt_zero > 0.0, 0.0, ov)             # zero-padded gt rows -> 0


def _gt_max_kernel(anc_ref, gts_ref, gtmax_ref, acc_ref, *, approx_recip):
    """Pass 1 (only when N is tiled): per-gt max IoU over *inside* anchors, reduced
    across tiles.  grid = (num_tiles, B) so each anchor tile is DMA'd once total; the
    running max per image lives in a small (B, G, 1) VMEM scratch."""
    n = pl.program_id(0)
    b = pl.program_id(1)
    anc = anc_ref[...]
    inside = anc[5:6, :]
    ov = _iou(anc, gts_ref[...], approx_recip)
    tile_max = jnp.max(jnp.where(inside > 0.0, ov, -1e30), axis=1, keepdims=True)

    @pl.when(n == 0)
    def _():
        acc_ref[b] = tile_max

    @pl.when(n > 0)
    def _():
        acc_ref[b] = jnp.maximum(acc_ref[b], tile_max)

    # Write the running max every visit; the last (n == num_tiles-1) write wins in HBM.
    gtmax_ref[...] = acc_ref[b]


def _anchor_target_kernel(anc_ref, gts_ref, gtm_ref, *rest, pos_thr, neg_thr,
                          inside_w, fused_gt_max, approx_recip):
    if fused_gt_max:
        (out_ref,) = rest
    else:
        gtmax_ref, out_ref = rest

    anc = anc_ref[...]                 # (16, Nt) packed anchor slab
    gts = gts_ref[...]                 # (G, 8)   [x1 y1 x2 y2 area zero 0 0]
    inside = anc[5:6, :]               # (1, Nt)

    ov = _iou(anc, gts, approx_recip)  # (G, Nt)
    g_count = ov.shape[0]

    # per-anchor max / first-argmax over the gt axis
    max_ov = jnp.max(ov, axis=0, keepdims=True)                                # (1, Nt)
    gidx = jax.lax.broadcasted_iota(jnp.int32, ov.shape, 0)
    amax = jnp.min(jnp.where(ov == max_ov, gidx, g_count), axis=0, keepdims=True)
    onehot = (gidx == amax).astype(jnp.float32)                                # (G, Nt)

    # per-gt max over inside anchors (global across N tiles when tiled)
    if fused_gt_max:
        gt_max = jnp.max(jnp.where(inside > 0.0, ov, -1e30), axis=1, keepdims=True)
    else:
        gt_max = gtmax_ref[...]                                                # (G, 1)
    gt_max = jnp.where(gt_max == 0.0, 1e-5, gt_max)
    best = jnp.any(ov == gt_max, axis=0, keepdims=True)                        # (1, Nt)

    # label assignment (same clobber order as the reference)
    labels = jnp.full_like(max_ov, -1.0)
    labels = jnp.where(best, 1.0, labels)
    labels = jnp.where(max_ov >= pos_thr, 1.0, labels)
    labels = jnp.where(max_ov < neg_thr, 0.0, labels)
    labels = jnp.where(inside > 0.0, labels, -1.0)      # _unmap(fill=-1)
    # TODO(synk): random fg/bg subsampling and the OHEM hard-mining branches use
    # host-side np.random.permutation / torch.sort over dynamic nonzero index sets and
    # have no clean Pallas equivalent; with cfg.TRAIN.RPN_BATCHSIZE > #anchors they
    # never fire in the reference either.

    inw = jnp.where(labels == 1.0, inside_w, 0.0)
    valid = (labels >= 0.0).astype(jnp.float32)   # 1/num_examples applied in wrapper

    # matched-gt gather on the (otherwise idle) MXU, f32 kept for exactness:
    # gt_mm rows = [log(gw), log(gh), g_ctr_x, g_ctr_y, 0, 0, 0, 0]
    m = jnp.dot(gtm_ref[...], onehot, preferred_element_type=jnp.float32)      # (8, Nt)
    dxy = (m[2:4, :] - anc[6:8, :]) * anc[8:10, :]      # (ctr - ex_ctr) * (1/wh)
    dwh = m[0:2, :] - anc[10:12, :]                     # log(gwh) - log(awh)
    tgt = jnp.where(inside > 0.0, jnp.concatenate([dxy, dwh], axis=0), 0.0)    # unmap(0)

    out_ref[...] = jnp.concatenate(
        [labels, inw, valid, jnp.zeros_like(labels), tgt], axis=0)             # (8, Nt)


# --------------------------------------------------------------------------------------
# pallas_call wrapper
# --------------------------------------------------------------------------------------
def _anchor_target_pallas(anc_pack, gt_side, gt_mm, *, tile_n, num_tiles, vmem_limit,
                          pos_thr, neg_thr, inside_w, approx_recip=False):
    _, n_pad = anc_pack.shape
    B, G, _ = gt_side.shape
    fused = num_tiles == 1

    inputs = [anc_pack, gt_side, gt_mm]
    in_specs = [
        # shared anchor slab keyed on the (outer) tile axis only -> DMA'd once per tile
        pl.BlockSpec((16, tile_n), lambda n, b: (0, n)),
        pl.BlockSpec((pl.Squeezed(), G, 8), lambda n, b: (b, 0, 0)),
        pl.BlockSpec((pl.Squeezed(), 8, G), lambda n, b: (b, 0, 0)),
    ]

    if not fused:
        # Pass 1: global per-gt max IoU so the "best anchor per gt" rule stays correct
        # when N is split across tiles.  Anchor slab streamed once total.
        gt_max = pl.pallas_call(
            functools.partial(_gt_max_kernel, approx_recip=approx_recip),
            out_shape=jax.ShapeDtypeStruct((B, G, 1), jnp.float32),
            grid_spec=pltpu.PrefetchScalarGridSpec(
                num_scalar_prefetch=0,
                grid=(num_tiles, B),
                in_specs=[
                    pl.BlockSpec((16, tile_n), lambda n, b: (0, n)),
                    pl.BlockSpec((pl.Squeezed(), G, 8), lambda n, b: (b, 0, 0)),
                ],
                out_specs=pl.BlockSpec((pl.Squeezed(), G, 1), lambda n, b: (b, 0, 0)),
                scratch_shapes=[pltpu.VMEM((B, G, 1), jnp.float32)],
            ),
            compiler_params=pltpu.CompilerParams(
                dimension_semantics=("arbitrary", "arbitrary"),
                vmem_limit_bytes=vmem_limit),
        )(anc_pack, gt_side)
        inputs.append(gt_max)
        in_specs.append(pl.BlockSpec((pl.Squeezed(), G, 1), lambda n, b: (b, 0, 0)))

    kernel = functools.partial(
        _anchor_target_kernel, pos_thr=float(pos_thr), neg_thr=float(neg_thr),
        inside_w=float(inside_w), fused_gt_max=fused, approx_recip=approx_recip)

    return pl.pallas_call(
        kernel,
        out_shape=jax.ShapeDtypeStruct((B, 8, n_pad), jnp.float32),
        grid_spec=pltpu.PrefetchScalarGridSpec(
            num_scalar_prefetch=0,
            grid=(num_tiles, B),
            in_specs=in_specs,
            out_specs=pl.BlockSpec((pl.Squeezed(), 8, tile_n), lambda n, b: (b, 0, n)),
        ),
        compiler_params=pltpu.CompilerParams(
            dimension_semantics=("parallel", "parallel"),   # no cross-iteration state
            vmem_limit_bytes=vmem_limit),
    )(*inputs)


# --------------------------------------------------------------------------------------
# Wrapper mimicking _AnchorTargetLayer.forward (anchor/shift generation, inside mask and
# packing are host glue cached per feature-map/image size; final reshapes are plain XLA).
# --------------------------------------------------------------------------------------
class AnchorTargetLayerPallas:
    def __init__(self, feat_stride, scales, ratios, allowed_border, name,
                 max_tile_n=None, approx_iou=False):
        self._feat_stride = feat_stride
        self._scales = scales
        self._name = name
        self._anchors = generate_anchors(
            scales=np.array(scales), ratios=np.array(ratios)).astype(np.float32)
        self._num_anchors = self._anchors.shape[0]
        self._allowed_border = allowed_border
        self._max_tile_n = max_tile_n
        self._approx_iou = approx_iou
        self._pack_cache = {}

    def _build_pack(self, H, W, im_h, im_w, n_pad):
        A = self._num_anchors
        K = H * W
        shift_x = np.arange(0, W) * self._feat_stride
        shift_y = np.arange(0, H) * self._feat_stride
        sx, sy = np.meshgrid(shift_x, shift_y)
        shifts = np.vstack((sx.ravel(), sy.ravel(),
                            sx.ravel(), sy.ravel())).transpose().astype(np.float32)
        # A-major anchor ordering (a, h, w) -> final NCHW reshapes are transpose-free.
        all_anchors = (self._anchors.reshape(A, 1, 4) +
                       shifts.reshape(1, K, 4)).reshape(A * K, 4)
        N = A * K
        border = self._allowed_border
        inside = ((all_anchors[:, 0] >= -border) &
                  (all_anchors[:, 1] >= -border) &
                  (all_anchors[:, 2] < im_w + border) &
                  (all_anchors[:, 3] < im_h + border)).astype(np.float32)

        anc = np.zeros((n_pad, 4), dtype=np.float32)   # padded tail = degenerate 0-box
        anc[:N] = all_anchors
        aw = anc[:, 2] - anc[:, 0] + 1.0
        ah = anc[:, 3] - anc[:, 1] + 1.0
        pack = np.zeros((16, n_pad), dtype=np.float32)
        pack[0:4] = anc.T
        pack[4] = aw * ah
        pack[5, :N] = inside                           # padded tail -> outside
        pack[6] = anc[:, 0] + 0.5 * aw
        pack[7] = anc[:, 1] + 0.5 * ah
        pack[8] = 1.0 / aw                             # host-precomputed reciprocals /
        pack[9] = 1.0 / ah                             # logs: no per-anchor divides or
        pack[10] = np.log(aw)                          # logs inside the kernel
        pack[11] = np.log(ah)
        return jax.device_put(pack)

    def __call__(self, rpn_cls_score, gt_boxes, im_info, rpn_cls_score_OHEM=None):
        B, G = int(gt_boxes.shape[0]), int(gt_boxes.shape[1])
        H, W = int(rpn_cls_score.shape[2]), int(rpn_cls_score.shape[3])
        A = self._num_anchors
        N = H * W * A

        # Reference uses int(im_info[0][...]) (image 0 only) at host level; mirrored.
        # TODO(synk): traced / per-image im_info under jit is not supported (same
        # limitation as the reference, which also reads only image 0 on the host).
        im_h = int(float(im_info[0, 0]))
        im_w = int(float(im_info[0, 1]))

        tile_n, num_tiles, n_pad, vmem_limit = _choose_tiling(
            N, G, B, max_tile_n=self._max_tile_n)

        cache_key = (H, W, im_h, im_w, n_pad)
        pack_dev = self._pack_cache.get(cache_key)
        if pack_dev is None:
            pack_dev = self._build_pack(H, W, im_h, im_w, n_pad)
            self._pack_cache[cache_key] = pack_dev

        # --- per-gt derived quantities (tiny, plain XLA) ---
        gt = gt_boxes.astype(jnp.float32)
        gx1, gy1, gx2, gy2 = gt[..., 0], gt[..., 1], gt[..., 2], gt[..., 3]
        gw = gx2 - gx1 + 1.0
        gh = gy2 - gy1 + 1.0
        z = jnp.zeros_like(gw)
        gt_zero = jnp.logical_and(gw == 1.0, gh == 1.0).astype(jnp.float32)
        gt_side = jnp.stack([gx1, gy1, gx2, gy2, gw * gh, gt_zero, z, z], axis=-1)
        gt_mm = jnp.stack([jnp.log(gw), jnp.log(gh),
                           gx1 + 0.5 * gw, gy1 + 0.5 * gh, z, z, z, z], axis=1)

        out = _anchor_target_pallas(
            pack_dev, gt_side, gt_mm, tile_n=tile_n, num_tiles=num_tiles,
            vmem_limit=vmem_limit,
            pos_thr=cfg.TRAIN.ANCHOR_POSITIVE_OVERLAP,
            neg_thr=cfg.TRAIN.ANCHOR_NEGATIVE_OVERLAP,
            inside_w=cfg.TRAIN.RPN_BBOX_INSIDE_WEIGHTS[0],
            approx_recip=self._approx_iou)

        labels_f = out[:, 0, :N]                       # (B, N), A-major anchor order
        inw_f = out[:, 1, :N]
        valid_f = out[:, 2, :N]                        # (labels >= 0) indicator
        tgt = out[:, 4:8, :N]                          # (B, 4, N)

        # RPN_POSITIVE_WEIGHT < 0: pos/neg weight = 1 / num_examples of image 0
        num_examples = jnp.sum(valid_f[0])
        outw_f = valid_f * (1.0 / num_examples)

        # A-major packing makes these reshapes (nearly) transpose-free.
        labels = labels_f.reshape(B, A, H, W).reshape(B, 1, A * H, W)
        bbox_targets = (tgt.reshape(B, 4, A, H, W)
                        .transpose(0, 2, 1, 3, 4).reshape(B, 4 * A, H, W))
        bbox_inside_weights = jnp.broadcast_to(
            inw_f.reshape(B, A, 1, H, W), (B, A, 4, H, W)).reshape(B, 4 * A, H, W)
        bbox_outside_weights = jnp.broadcast_to(
            outw_f.reshape(B, A, 1, H, W), (B, A, 4, H, W)).reshape(B, 4 * A, H, W)
        return labels, bbox_targets, bbox_inside_weights, bbox_outside_weights


if __name__ == "__main__":
    B, H, W = 2, 16, 16
    feat_stride = 16
    scales = (2, 4, 8)
    ratios = (0.5, 1.0, 2.0)
    A = len(scales) * len(ratios)          # 9 anchors per location
    G = 8                                   # gt boxes per image (with zero padding rows)

    key = jax.random.PRNGKey(0)
    k1, k2, k3 = jax.random.split(key, 3)
    rpn_cls_score = jax.random.normal(k3, (B, 2 * A, H, W), dtype=jnp.float32)

    xy = jnp.floor(jax.random.uniform(k1, (B, G, 2), minval=0.0, maxval=170.0))
    wh = jnp.floor(jax.random.uniform(k2, (B, G, 2), minval=16.0, maxval=96.0))
    x2y2 = jnp.minimum(xy + wh, float(H * feat_stride - 1))
    gt = jnp.concatenate([xy, x2y2, jnp.ones((B, G, 1))], axis=-1).astype(jnp.float32)
    valid_rows = (jnp.arange(G) < G - 3).astype(jnp.float32)[None, :, None]
    gt_boxes = gt * valid_rows                             # last 3 rows are zero padding
    im_info = jnp.array([[H * feat_stride, W * feat_stride, 1.0]] * B, dtype=jnp.float32)

    layer = AnchorTargetLayerPallas(feat_stride, scales, ratios,
                                    allowed_border=0, name="rpn")
    outs = layer(rpn_cls_score, gt_boxes, im_info)
    for o in outs:
        jax.block_until_ready(o)
    labels, bbox_targets, bbox_inside_w, bbox_outside_w = outs

    assert labels.shape == (B, 1, A * H, W)
    assert bbox_targets.shape == (B, 4 * A, H, W)
    assert bbox_inside_w.shape == (B, 4 * A, H, W)
    assert bbox_outside_w.shape == (B, 4 * A, H, W)
    assert bool(jnp.all(jnp.isfinite(bbox_targets)))

    # Also exercise the tiled (multi N-tile, two-pass gt_max) path and check that it
    # matches the fused single-tile path.
    layer_tiled = AnchorTargetLayerPallas(feat_stride, scales, ratios,
                                          allowed_border=0, name="rpn",
                                          max_tile_n=9 * 128)
    outs_t = layer_tiled(rpn_cls_score, gt_boxes, im_info)
    for ref_o, tiled_o in zip(outs, outs_t):
        jax.block_until_ready(tiled_o)
        assert bool(jnp.allclose(ref_o, tiled_o, atol=1e-5, rtol=1e-5))

    print("KERNEL_OK")
</pallas_src>

<mosaic_0001>
module attributes {stable_mosaic.version = 11 : i64} {
  func.func @_anchor_target_kernel(%arg0: i32, %arg1: i32, %arg2: memref<16x2304xf32, #tpu.memory_space<vmem>>, %arg3: memref<1x8x8xf32, #tpu.memory_space<vmem>>, %arg4: memref<1x8x8xf32, #tpu.memory_space<vmem>>, %arg5: memref<1x8x2304xf32, #tpu.memory_space<vmem>>) attributes {dimension_semantics = [#tpu.dimension_semantics<parallel>, #tpu.dimension_semantics<parallel>], iteration_bounds = array<i64: 1, 2>, scalar_prefetch = 0 : i64, scratch_operands = 0 : i64, tpu.core_type = #tpu.core_type<tc>, window_params = [{transform_indices = @transform_0, window_bounds = array<i64: 16, 2304>}, {transform_indices = @transform_1, window_bounds = array<i64: 1, 8, 8>}, {transform_indices = @transform_2, window_bounds = array<i64: 1, 8, 8>}, {transform_indices = @transform_3, window_bounds = array<i64: 1, 8, 2304>}]} {
    %c0 = arith.constant 0 : index
    %c0_0 = arith.constant 0 : index
    %0 = vector.load %arg2[%c0, %c0_0] : memref<16x2304xf32, #tpu.memory_space<vmem>>, vector<16x2304xf32>
    %c0_1 = arith.constant 0 : index
    %c0_2 = arith.constant 0 : index
    %c0_3 = arith.constant 0 : index
    %1 = vector.load %arg3[%c0_1, %c0_2, %c0_3] : memref<1x8x8xf32, #tpu.memory_space<vmem>>, vector<1x8x8xf32>
    %2 = vector.shape_cast %1 : vector<1x8x8xf32> to vector<8x8xf32>
    %3 = vector.extract_strided_slice %0 {offsets = [5, 0], sizes = [1, 2304], strides = [1, 1]} : vector<16x2304xf32> to vector<1x2304xf32>
    %4 = vector.extract_strided_slice %0 {offsets = [0, 0], sizes = [1, 2304], strides = [1, 1]} : vector<16x2304xf32> to vector<1x2304xf32>
    %5 = vector.extract_strided_slice %0 {offsets = [1, 0], sizes = [1, 2304], strides = [1, 1]} : vector<16x2304xf32> to vector<1x2304xf32>
    %6 = vector.extract_strided_slice %0 {offsets = [2, 0], sizes = [1, 2304], strides = [1, 1]} : vector<16x2304xf32> to vector<1x2304xf32>
    %7 = vector.extract_strided_slice %0 {offsets = [3, 0], sizes = [1, 2304], strides = [1, 1]} : vector<16x2304xf32> to vector<1x2304xf32>
    %8 = vector.extract_strided_slice %0 {offsets = [4, 0], sizes = [1, 2304], strides = [1, 1]} : vector<16x2304xf32> to vector<1x2304xf32>
    %9 = vector.extract_strided_slice %2 {offsets = [0, 0], sizes = [8, 1], strides = [1, 1]} : vector<8x8xf32> to vector<8x1xf32>
    %10 = vector.extract_strided_slice %2 {offsets = [0, 1], sizes = [8, 1], strides = [1, 1]} : vector<8x8xf32> to vector<8x1xf32>
    %11 = vector.extract_strided_slice %2 {offsets = [0, 2], sizes = [8, 1], strides = [1, 1]} : vector<8x8xf32> to vector<8x1xf32>
    %12 = vector.extract_strided_slice %2 {offsets = [0, 3], sizes = [8, 1], strides = [1, 1]} : vector<8x8xf32> to vector<8x1xf32>
    %13 = vector.extract_strided_slice %2 {offsets = [0, 4], sizes = [8, 1], strides = [1, 1]} : vector<8x8xf32> to vector<8x1xf32>
    %14 = vector.extract_strided_slice %2 {offsets = [0, 5], sizes = [8, 1], strides = [1, 1]} : vector<8x8xf32> to vector<8x1xf32>
    %15 = vector.broadcast %6 : vector<1x2304xf32> to vector<8x2304xf32>
    %16 = vector.broadcast %11 : vector<8x1xf32> to vector<8x2304xf32>
    %17 = arith.minimumf %15, %16 : vector<8x2304xf32>
    %18 = vector.broadcast %4 : vector<1x2304xf32> to vector<8x2304xf32>
    %19 = vector.broadcast %9 : vector<8x1xf32> to vector<8x2304xf32>
    %20 = arith.maximumf %18, %19 : vector<8x2304xf32>
    %21 = arith.subf %17, %20 : vector<8x2304xf32>
    %cst = arith.constant 1.000000e+00 : f32
    %22 = vector.broadcast %cst : f32 to vector<8x2304xf32>
    %23 = arith.addf %21, %22 : vector<8x2304xf32>
    %cst_4 = arith.constant 0.000000e+00 : f32
    %24 = vector.broadcast %cst_4 : f32 to vector<8x2304xf32>
    %25 = arith.maximumf %23, %24 : vector<8x2304xf32>
    %26 = vector.broadcast %7 : vector<1x2304xf32> to vector<8x2304xf32>
    %27 = vector.broadcast %12 : vector<8x1xf32> to vector<8x2304xf32>
    %28 = arith.minimumf %26, %27 : vector<8x2304xf32>
    %29 = vector.broadcast %5 : vector<1x2304xf32> to vector<8x2304xf32>
    %30 = vector.broadcast %10 : vector<8x1xf32> to vector<8x2304xf32>
    %31 = arith.maximumf %29, %30 : vector<8x2304xf32>
    %32 = arith.subf %28, %31 : vector<8x2304xf32>
    %cst_5 = arith.constant 1.000000e+00 : f32
    %33 = vector.broadcast %cst_5 : f32 to vector<8x2304xf32>
    %34 = arith.addf %32, %33 : vector<8x2304xf32>
    %cst_6 = arith.constant 0.000000e+00 : f32
    %35 = vector.broadcast %cst_6 : f32 to vector<8x2304xf32>
    %36 = arith.maximumf %34, %35 : vector<8x2304xf32>
    %37 = arith.mulf %25, %36 : vector<8x2304xf32>
    %38 = vector.broadcast %8 : vector<1x2304xf32> to vector<8x2304xf32>
    %39 = vector.broadcast %13 : vector<8x1xf32> to vector<8x2304xf32>
    %40 = arith.addf %38, %39 : vector<8x2304xf32>
    %41 = arith.subf %40, %37 : vector<8x2304xf32>
    %42 = arith.divf %37, %41 : vector<8x2304xf32>
    %cst_7 = arith.constant 0.000000e+00 : f32
    %43 = vector.broadcast %cst_7 : f32 to vector<8x1xf32>
    %44 = arith.cmpf ogt, %14, %43 : vector<8x1xf32>
    %cst_8 = arith.constant 0.000000e+00 : f32
    %45 = vector.shape_cast %44 : vector<8x1xi1> to vector<8x1xi1>
    %46 = vector.broadcast %45 : vector<8x1xi1> to vector<8x2304xi1>
    %47 = vector.broadcast %cst_8 : f32 to vector<8x2304xf32>
    %48 = arith.select %46, %47, %42 : vector<8x2304xi1>, vector<8x2304xf32>
    %cst_9 = arith.constant dense<0xFF800000> : vector<2304xf32>
    %49 = vector.multi_reduction <maximumf>, %48, %cst_9 [0] : vector<8x2304xf32> to vector<2304xf32>
    %50 = vector.shape_cast %49 : vector<2304xf32> to vector<1x2304xf32>
    %51 = tpu.iota {dimensions = array<i32: 0>} : vector<8x2304xi32>
    %52 = vector.broadcast %50 : vector<1x2304xf32> to vector<8x2304xf32>
    %53 = arith.cmpf oeq, %48, %52 : vector<8x2304xf32>
    %c8_i32 = arith.constant 8 : i32
    %54 = vector.broadcast %c8_i32 : i32 to vector<8x2304xi32>
    %55 = arith.select %53, %51, %54 : vector<8x2304xi1>, vector<8x2304xi32>
    %cst_10 = arith.constant dense<2147483647> : vector<2304xi32>
    %56 = vector.multi_reduction <minsi>, %55, %cst_10 [0] : vector<8x2304xi32> to vector<2304xi32>
    %57 = vector.shape_cast %56 : vector<2304xi32> to vector<1x2304xi32>
    %58 = vector.broadcast %57 : vector<1x2304xi32> to vector<8x2304xi32>
    %59 = arith.cmpi eq, %51, %58 : vector<8x2304xi32>
    %60 = arith.extui %59 : vector<8x2304xi1> to vector<8x2304xi32>
    %61 = arith.sitofp %60 : vector<8x2304xi32> to vector<8x2304xf32>
    %cst_11 = arith.constant 0.000000e+00 : f32
    %62 = vector.broadcast %cst_11 : f32 to vector<1x2304xf32>
    %63 = arith.cmpf ogt, %3, %62 : vector<1x2304xf32>
    %cst_12 = arith.constant -1.000000e+30 : f32
    %64 = vector.shape_cast %63 : vector<1x2304xi1> to vector<1x2304xi1>
    %65 = vector.broadcast %64 : vector<1x2304xi1> to vector<8x2304xi1>
    %66 = vector.broadcast %cst_12 : f32 to vector<8x2304xf32>
    %67 = arith.select %65, %48, %66 : vector<8x2304xi1>, vector<8x2304xf32>
    %cst_13 = arith.constant dense<0xFF800000> : vector<8xf32>
    %68 = vector.multi_reduction <maximumf>, %67, %cst_13 [1] : vector<8x2304xf32> to vector<8xf32>
    %69 = vector.shape_cast %68 : vector<8xf32> to vector<8x1xf32>
    %cst_14 = arith.constant 0.000000e+00 : f32
    %70 = vector.broadcast %cst_14 : f32 to vector<8x1xf32>
    %71 = arith.cmpf oeq, %69, %70 : vector<8x1xf32>
    %cst_15 = arith.constant 9.99999974E-6 : f32
    %72 = vector.broadcast %cst_15 : f32 to vector<8x1xf32>
    %73 = arith.select %71, %72, %69 : vector<8x1xi1>, vector<8x1xf32>
    %74 = vector.broadcast %73 : vector<8x1xf32> to vector<8x2304xf32>
    %75 = arith.cmpf oeq, %48, %74 : vector<8x2304xf32>
    %cst_16 = arith.constant 1.000000e+00 : f32
    %cst_17 = arith.constant 0.000000e+00 : f32
    %76 = vector.broadcast %cst_16 : f32 to vector<8x2304xf32>
    %77 = vector.broadcast %cst_17 : f32 to vector<8x2304xf32>
    %78 = arith.select %75, %76, %77 : vector<8x2304xi1>, vector<8x2304xf32>
    %cst_18 = arith.constant dense<0xFF800000> : vector<2304xf32>
    %79 = vector.multi_reduction <maximumf>, %78, %cst_18 [0] : vector<8x2304xf32> to vector<2304xf32>
    %cst_19 = arith.constant 0.000000e+00 : f32
    %80 = vector.broadcast %cst_19 : f32 to vector<2304xf32>
    %81 = arith.cmpf ogt, %79, %80 : vector<2304xf32>
    %82 = vector.shape_cast %81 : vector<2304xi1> to vector<1x2304xi1>
    %cst_20 = arith.constant -1.000000e+00 : f32
    %83 = vector.broadcast %cst_20 : f32 to vector<1x2304xf32>
    %cst_21 = arith.constant 1.000000e+00 : f32
    %84 = vector.broadcast %cst_21 : f32 to vector<1x2304xf32>
    %85 = arith.select %82, %84, %83 : vector<1x2304xi1>, vector<1x2304xf32>
    %cst_22 = arith.constant 0.699999988 : f32
    %86 = vector.broadcast %cst_22 : f32 to vector<1x2304xf32>
    %87 = arith.cmpf oge, %50, %86 : vector<1x2304xf32>
    %cst_23 = arith.constant 1.000000e+00 : f32
    %88 = vector.broadcast %cst_23 : f32 to vector<1x2304xf32>
    %89 = arith.select %87, %88, %85 : vector<1x2304xi1>, vector<1x2304xf32>
    %cst_24 = arith.constant 3.000000e-01 : f32
    %90 = vector.broadcast %cst_24 : f32 to vector<1x2304xf32>
    %91 = arith.cmpf olt, %50, %90 : vector<1x2304xf32>
    %cst_25 = arith.constant 0.000000e+00 : f32
    %92 = vector.broadcast %cst_25 : f32 to vector<1x2304xf32>
    %93 = arith.select %91, %92, %89 : vector<1x2304xi1>, vector<1x2304xf32>
    %cst_26 = arith.constant 0.000000e+00 : f32
    %94 = vector.broadcast %cst_26 : f32 to vector<1x2304xf32>
    %95 = arith.cmpf ogt, %3, %94 : vector<1x2304xf32>
    %cst_27 = arith.constant -1.000000e+00 : f32
    %96 = vector.broadcast %cst_27 : f32 to vector<1x2304xf32>
    %97 = arith.select %95, %93, %96 : vector<1x2304xi1>, vector<1x2304xf32>
    %cst_28 = arith.constant 1.000000e+00 : f32
    %98 = vector.broadcast %cst_28 : f32 to vector<1x2304xf32>
    %99 = arith.cmpf oeq, %97, %98 : vector<1x2304xf32>
    %cst_29 = arith.constant 1.000000e+00 : f32
    %cst_30 = arith.constant 0.000000e+00 : f32
    %100 = vector.broadcast %cst_29 : f32 to vector<1x2304xf32>
    %101 = vector.broadcast %cst_30 : f32 to vector<1x2304xf32>
    %102 = arith.select %99, %100, %101 : vector<1x2304xi1>, vector<1x2304xf32>
    %cst_31 = arith.constant 0.000000e+00 : f32
    %103 = vector.broadcast %cst_31 : f32 to vector<1x2304xf32>
    %104 = arith.cmpf oge, %97, %103 : vector<1x2304xf32>
    %105 = arith.extui %104 : vector<1x2304xi1> to vector<1x2304xi32>
    %106 = arith.sitofp %105 : vector<1x2304xi32> to vector<1x2304xf32>
    %c0_32 = arith.constant 0 : index
    %c0_33 = arith.constant 0 : index
    %c0_34 = arith.constant 0 : index
    %107 = vector.load %arg4[%c0_32, %c0_33, %c0_34] : memref<1x8x8xf32, #tpu.memory_space<vmem>>, vector<1x8x8xf32>
    %108 = vector.shape_cast %107 : vector<1x8x8xf32> to vector<8x8xf32>
    %cst_35 = arith.constant dense<0.000000e+00> : vector<8x2304xf32>
    %109 = tpu.matmul %108, %61, %cst_35 {dimension_numbers = #tpu.dot_dimension_numbers<[1], [0], [0], [1], [0, 0, 1, 1], [], []>} : vector<8x8xf32>, vector<8x2304xf32>, vector<8x2304xf32> -> vector<8x2304xf32>
    %110 = vector.extract_strided_slice %109 {offsets = [2, 0], sizes = [2, 2304], strides = [1, 1]} : vector<8x2304xf32> to vector<2x2304xf32>
    %111 = vector.extract_strided_slice %0 {offsets = [6, 0], sizes = [2, 2304], strides = [1, 1]} : vector<16x2304xf32> to vector<2x2304xf32>
    %112 = arith.subf %110, %111 : vector<2x2304xf32>
    %113 = vector.extract_strided_slice %0 {offsets = [8, 0], sizes = [2, 2304], strides = [1, 1]} : vector<16x2304xf32> to vector<2x2304xf32>
    %114 = arith.mulf %112, %113 : vector<2x2304xf32>
    %115 = vector.extract_strided_slice %109 {offsets = [0, 0], sizes = [2, 2304], strides = [1, 1]} : vector<8x2304xf32> to vector<2x2304xf32>
    %116 = vector.extract_strided_slice %0 {offsets = [10, 0], sizes = [2, 2304], strides = [1, 1]} : vector<16x2304xf32> to vector<2x2304xf32>
    %117 = arith.subf %115, %116 : vector<2x2304xf32>
    %cst_36 = arith.constant 0.000000e+00 : f32
    %118 = vector.broadcast %cst_36 : f32 to vector<1x2304xf32>
    %119 = arith.cmpf ogt, %3, %118 : vector<1x2304xf32>
    %120 = tpu.concatenate %114, %117 in 0 : vector<2x2304xf32>, vector<2x2304xf32> -> vector<4x2304xf32>
    %cst_37 = arith.constant 0.000000e+00 : f32
    %121 = vector.shape_cast %119 : vector<1x2304xi1> to vector<1x2304xi1>
    %122 = vector.broadcast %121 : vector<1x2304xi1> to vector<4x2304xi1>
    %123 = vector.broadcast %cst_37 : f32 to vector<4x2304xf32>
    %124 = arith.select %122, %120, %123 : vector<4x2304xi1>, vector<4x2304xf32>
    %cst_38 = arith.constant 0.000000e+00 : f32
    %125 = vector.broadcast %cst_38 : f32 to vector<1x2304xf32>
    %126 = tpu.concatenate %97, %102, %106, %125, %124 in 0 : vector<1x2304xf32>, vector<1x2304xf32>, vector<1x2304xf32>, vector<1x2304xf32>, vector<4x2304xf32> -> vector<8x2304xf32>
    %c0_39 = arith.constant 0 : index
    %c0_40 = arith.constant 0 : index
    %c0_41 = arith.constant 0 : index
    %127 = vector.load %arg5[%c0_39, %c0_40, %c0_41] : memref<1x8x2304xf32, #tpu.memory_space<vmem>>, vector<1x8x2304xf32>
    %128 = vector.shape_cast %127 : vector<1x8x2304xf32> to vector<8x2304xf32>
    %129 = vector.shape_cast %126 : vector<8x2304xf32> to vector<1x8x2304xf32>
    tpu.vector_store %arg5[%c0_39, %c0_40, %c0_41], %129 {strides = array<i32>} : memref<1x8x2304xf32, #tpu.memory_space<vmem>>, vector<1x8x2304xf32>,
    return
  }
  func.func @transform_0(%arg0: i32, %arg1: i32) -> (i32, i32) {
    %c0_i32 = arith.constant 0 : i32
    %c0_i32_0 = arith.constant 0 : i32
    return %c0_i32, %arg0 : i32, i32
  }
  func.func @transform_1(%arg0: i32, %arg1: i32) -> (i32, i32, i32) {
    %c0_i32 = arith.constant 0 : i32
    %c0_i32_0 = arith.constant 0 : i32
    %c0_i32_1 = arith.constant 0 : i32
    return %arg1, %c0_i32, %c0_i32_0 : i32, i32, i32
  }
  func.func @transform_2(%arg0: i32, %arg1: i32) -> (i32, i32, i32) {
    %c0_i32 = arith.constant 0 : i32
    %c0_i32_0 = arith.constant 0 : i32
    %c0_i32_1 = arith.constant 0 : i32
    return %arg1, %c0_i32, %c0_i32_0 : i32, i32, i32
  }
  func.func @transform_3(%arg0: i32, %arg1: i32) -> (i32, i32, i32) {
    %c0_i32 = arith.constant 0 : i32
    %c0_i32_0 = arith.constant 0 : i32
    return %arg1, %c0_i32, %arg0 : i32, i32, i32
  }
}

</mosaic_0001>

<bundles_post_ra>
// kernel: tpu_custom_call.1
= control target key start
LH: loop header
LB: loop body
LE: loop exit
PB: predicated region body
PF: predicated region fallthrough
CT: control target
= control target key end

     0   :  { %8 = vsyncpa [#allocation3], 0  ;;  %s5610_s0 = inlined_call_operand.hbm [shape: f32[16,2304], index: 0, kind: input, shape index: {}]   ;;  %s5611_s1 = inlined_call_operand.hbm [shape: f32[2,8,8], index: 1, kind: input, shape index: {}]   ;;  %s5612_s2 = inlined_call_operand.hbm [shape: f32[2,8,8], index: 2, kind: input, shape index: {}]   ;;  %s5613_s3 = inlined_call_operand.hbm [shape: f32[2,8,2304], index: 3, kind: output, shape index: {}]  }
   0x1   :  { %9 = vsyncpa [#allocation6], 0 }
   0x2   :  { %11 = vsyncpa [#allocation6 + $0x1], 0 }
   0x3   :  { %12 = vsyncpa [#allocation4], 0 }
   0x4   :  { %14 = vsyncpa [#allocation4 + $0x1], 0  ;;  %s3391_s12 = smov 0   ;;  %s3393_s13 = smov 0  }
   0x5   :  { %s3395_s14 = smov 0   ;;  %s3397_s15 = smov 0  }
   0x6   :  { %s3399_s16 = smov 0   ;;  %s3401_s17 = smov 0  }
   0x7 LB: > { %s3422_s18 = sadd.s32 4294967295, %s3357_s17   ;;  %s2926_s19 = sadd.s32 4294967294, %s3357_s17   ;;  %s3357_s17 = sphi %s3401_s17, %s20_s17   ;;  %s3353_s16 = sphi %s3399_s16, %s6125_s16   ;;  %s3349_s15 = sphi %s3397_s15, %s6124_s15   ;;  %s3345_s14 = sphi %s3395_s14, %s6123_s14   ;;  %s3341_s13 = sphi %s3393_s13, %s6122_s13   ;;  %s3337_s12 = sphi %s3391_s12, %s6121_s12  }
   0x8   : > { %s29_s20 = sadd.s32 1, %s3353_s16  ;;  %s65_s21 = sadd.s32 1, %s3345_s14 }
   0x9   : > { %p30_p0 = scmp.ge.s32.totalorder %s29_s20, 2  ;;  %p72_p1 = scmp.ne.s32.totalorder %s3345_s14, %s3341_s13 }
   0xa   : > { %p73_p2 = scmp.eq.s32.totalorder %s3357_s17, 0  ;;  %p78_p3 = scmp.ne.s32.totalorder %s3341_s13, %s3337_s12 }
   0xb   : > { %s6127_s20 = smov (%p30_p0, %s29_s20), 0  ;;  %p130_p5 = scmp.eq.s32.totalorder %s3422_s18, 1 }
   0xc   : > { %p3434_p4 = por %p73_p2, %p72_p1  ;;  %s62_s23 = ssub.s32 %s3353_s16, %s6127_s20 }
   0xd   : > { %p136_p6 = scmp.eq.s32.totalorder %s2926_s19, 1  ;;  %p63_p7 = scmp.eq.s32.totalorder %s62_s23, 0 }
   0xe   : > { %p3441_p8 = por %p130_p5, %p72_p1  ;;  %p2929_p10 = scmp.ge.s32.totalorder %s3357_s17, 2 }
   0xf   : > { %p3448_p9 = por %p136_p6, %p78_p3  ;;  %p3041_p11 = scmp.lt.s32.totalorder %s3357_s17, 2 }
  0x10   : > { %s3453_s26 = scalar_select %p63_p7, %s3345_s14, %s65_s21  }
  0x11   : > { %s173_s27 = sand.u32 1, %s3357_s17   ;;  %s175_s28 = sand.u32 1, %s3345_s14  }
  0x12   : > { %s2930_s29 = sshll.u32 %s175_s28, 3  ;;  %s2931_s30 = sshll.u32 %s3353_s16, 3 }
  0x13   : > { %s181_s6 = scalar_lea.hbm %s5611_s1, %s2931_s30  ;;  %s177_s7 = scalar_lea.vmem [#allocation5], %s2930_s29 }
  0x14   : > { %s185_s8 = sshll.u32 %s177_s7, 4  ;;  %s183_s9 = sshll.u32 %s181_s6, 4  ;;  %s186_s8 = int_to_ptr.vmem [resolvable:$true] %s185_s8  ;;  %s184_s9 = int_to_ptr.hbm [resolvable:$true] %s183_s9 }
  0x15   : > { %p3465_p12 = pnand %p3041_p11, %p3434_p4  ;;  %s200_s21 = scalar_lea.hbm %s5612_s2, %s2931_s30 }
  0x16   : > { %s174_s23 = scalar_lea.sflag [#allocation6], %s173_s27  ;;  %p79_p13 = scmp.eq.s32.totalorder %s3422_s18, 0 }
  0x17   : > { %3032 = dma.hbm_to_vmem [thread:$0]  (!%p3465_p12), %s184_s9, 128, %s186_s8, %s174_s23  }
  0x18   : > { %p2927_p0 = scmp.ge.s32.totalorder %s3357_s17, 1  ;;  %p143_p1 = scmp.lt.s32.totalorder %s3357_s17, 3 }
  0x19   : > { %p3482_p2 = por %p79_p13, %p78_p3  ;;  %s157_s5 = sshll.u32 %s5610_s0, 4  ;;  %s158_s5 = int_to_ptr.hbm [resolvable:$true] %s157_s5 }
  0x1a   : > { %p3489_p4 = pnand %p2927_p0, %p143_p1  ;;  %s3359_s27 = smov [#allocation2]  }
  0x1b   : > { %s159_s30 = sshll.u32 %s3359_s27, 4  ;;  %s202_s7 = sshll.u32 %s200_s21, 4  ;;  %s160_s30 = int_to_ptr.vmem [resolvable:$true] %s159_s30  ;;  %s203_s7 = int_to_ptr.hbm [resolvable:$true] %s202_s7 }
  0x1c   : > { %p3025_p5 = pneg %p3489_p4  ;;  %s196_s8 = scalar_lea.vmem [#allocation7], %s2930_s29 }
  0x1d   : > { %s204_s9 = sshll.u32 %s196_s8, 4  ;;  %s3360_s11 = smov 2304   ;;  %s205_s9 = int_to_ptr.vmem [resolvable:$true] %s204_s9 }
  0x1e   : > { %p3026_p3 = pnand %p3025_p5, %p79_p13  ;;  %s3361_s19 = smov 144  }
  0x1f   : > { %3035 = dma.hbm_to_vmem [thread:$0]  (!%p3465_p12), %s203_s7, 128, %s205_s9, %s174_s23  }
  0x20   : > { %3028 = dma.hbm_to_vmem [thread:$0]  (!%p3026_p3), %s158_s5, 4608, %s160_s30, [#allocation3], %s3360_s11, %s3360_s11, %s3361_s19  }
  0x21   : > { %213 = sbr.rel (%p3489_p4) target bundleno = 658 (0x292), region = 32 }
  0x26   : > { %3324 = dma.done.wait (%p79_p13), [#allocation3], 4608  }
  0x27   : > { %3326 = vsyncadd (%p79_p13), [#allocation3], 4294962688  ;;  %s220_s29 = sand.u32 1, %s3422_s18   ;;  %s3507_s21 = sand.u32 1, %s3341_s13  }
  0x28   : > { %s2936_s28 = sshll.u32 %s3507_s21, 3  ;;  %s221_s10 = scalar_lea.sflag [#allocation6], %s220_s29 }
  0x29   : > { %s224_s23 = scalar_lea.vmem [#allocation5], %s2936_s28 }
  0x2a   : > { %3328 = dma.done.wait (%p3482_p2), %s221_s10, 256  }
  0x2b   : > { %3330 = vsyncadd (%p3482_p2), %s221_s10, 4294967040  ;;  %v3362_v0 = vmov 3   ;;  %v3363_v1 = vmov 2   ;;  %v3364_v2 = vmov 4   ;;  %v301_v3 = vld [vmem:[%s224_s23] sm:$0xff]  ;;  %v3365_v4 = vmov 1  }
  0x2c   : > { %3106 = vset.pattern.permute.xlu1 %v3362_v0  ;;  %3104 = vset.pattern.permute.xlu0 %v3363_v1  ;;  %vm917_vm0 = vcmp.gt.f32.partialorder %v301_v3, 0.0  ;;  %v5614_v5 = vmov 0   ;;  %v3367_v7 = vmov 5   ;;  %v3518_v8 = vld [vmem:[#allocation2] sm:$0xff]  ;;  %v3520_v9 = vld [vmem:[#allocation2 + $0x8] sm:$0xff]  ;;  %v3522_v10 = vld [vmem:[#allocation2 + $0x10] sm:$0xff] }
  0x2d   : > { %3108 = vset.pattern.permute.xlu2 %v3364_v2  ;;  %456 = vperm.xlu1 %3106, %v301_v3   ;;  %v918_v6 = vsel %vm917_vm0, 1, %v5614_v5  ;;  %v3524_v11 = vld [vmem:[#allocation2 + $0x18] sm:$0xff]  ;;  %v3526_v12 = vld [vmem:[#allocation2 + $0x20] sm:$0xff]  ;;  %v3528_v13 = vld [vmem:[#allocation2 + $0x28] sm:$0xff]  ;;  %v302_v22 = vperm.slane %v3518_v8, 2  ;;  %v303_v23 = vperm.slane %v3520_v9, 2 }
  0x2e   : > { %322 = vperm.xlu0 %3104, %v301_v3   ;;  %608 = vperm.xlu2 %3108, %v301_v3   ;;  %v3530_v14 = vld [vmem:[#allocation2 + $0x30] sm:$0xff]  ;;  %v3532_v15 = vld [vmem:[#allocation2 + $0x38] sm:$0xff]  ;;  %v3534_v16 = vld [vmem:[#allocation2 + $0x40] sm:$0xff]  ;;  %v304_v27 = vperm.slane %v3522_v10, 2  ;;  %v305_v28 = vperm.slane %v3524_v11, 2  ;;  %v306_v29 = vperm.slane %v3526_v12, 2 }
  0x2f   : > { %5705 = vst [vmem:[#allocation12_spill] sm:$0xff] %v3534_v16  ;;  %v3536_v17 = vld [vmem:[#allocation2 + $0x48] sm:$0xff]  ;;  %v3538_v18 = vld [vmem:[#allocation2 + $0x50] sm:$0xff]  ;;  %v3540_v19 = vld [vmem:[#allocation2 + $0x58] sm:$0xff]  ;;  %v307_v31 = vperm.slane %v3528_v13, 2  ;;  %v308_v32 = vperm.slane %v3530_v14, 2 }
  0x30   : > { %5706 = vst [vmem:[#allocation13_spill] sm:$0xff] %v3536_v17  ;;  %v3542_v20 = vld [vmem:[#allocation2 + $0x60] sm:$0xff]  ;;  %v3544_v21 = vld [vmem:[#allocation2 + $0x68] sm:$0xff]  ;;  %v3548_v24 = vld [vmem:[#allocation2 + $0x70] sm:$0xff]  ;;  %v309_v33 = vperm.slane %v3532_v15, 2  ;;  %v310_v34 = vperm.slane %v3534_v16, 2 }
  0x31   : > { %5707 = vst [vmem:[#allocation14_spill] sm:$0xff] %v3538_v18  ;;  %v3550_v25 = vld [vmem:[#allocation2 + $0x78] sm:$0xff]  ;;  %v3552_v26 = vld [vmem:[#allocation2 + $0x80] sm:$0xff]  ;;  %v3557_v30 = vld [vmem:[#allocation2 + $0x88] sm:$0xff]  ;;  %v311_v35 = vperm.slane %v3536_v17, 2  ;;  %v312_v36 = vperm.slane %v3538_v18, 2 }
  0x32   : > { %5708 = vst [vmem:[#allocation15_spill] sm:$0xff] %v3540_v19  ;;  %v313_v37 = vperm.slane %v3540_v19, 2  ;;  %v314_v38 = vperm.slane %v3542_v20, 2  ;;  %v315_v39 = vperm.slane %v3544_v21, 2  ;;  %v316_v40 = vperm.slane %v3548_v24, 2  ;;  %s234_s18 = scalar_lea.vmem [#allocation7], %s2936_s28 }
  0x33   : > { %5709 = vst [vmem:[#allocation16_spill] sm:$0xff] %v3542_v20  ;;  %v317_v41 = vperm.slane %v3550_v25, 2  ;;  %v318_v42 = vperm.slane %v3552_v26, 2  ;;  %v437_v62 = vperm.slane %v3518_v8, 3  ;;  %v438_v63 = vperm.slane %v3520_v9, 3  ;;  %s3013_s22 = smul.u32 144, %s3507_s21 }
  0x34   : > { %5710 = vst [vmem:[#allocation17_spill] sm:$0xff] %v3544_v21  ;;  %v439_v0 = vperm.slane %v3522_v10, 3  ;;  %v440_v1 = vperm.slane %v3524_v11, 3  ;;  %v441_v2 = vperm.slane %v3526_v12, 3  ;;  %v447_v61 = vperm.slane %v3538_v18, 3  ;;  %s3014_s5 = smul.u32 144, %s3349_s15 }
  0x35   : > { %3107 = vset.pattern.permute.xlu1 %v3365_v4  ;;  %5711 = vst [vmem:[#allocation18_spill] sm:$0xff] %v3548_v24  ;;  %v443_v4 = vperm.slane %v3530_v14, 3  ;;  %v448_v60 = vperm.slane %v3540_v19, 3  ;;  %v449_v59 = vperm.slane %v3542_v20, 3  ;;  %v450_v58 = vperm.slane %v3544_v21, 3  ;;  %s5213_s4 = scalar_lea.vmem [#allocation8], %s3013_s22 }
  0x36   : > { %3105 = vset.pattern.permute.xlu0 %v5614_v5  ;;  %496 = vperm.xlu1 %3107, %v301_v3   ;;  %5712 = vst [vmem:[#allocation19_spill] sm:$0xff] %v3550_v25  ;;  %v446_v5 = vperm.slane %v3536_v17, 3  ;;  %v451_v57 = vperm.slane %v3548_v24, 3  ;;  %v452_v56 = vperm.slane %v3550_v25, 3  ;;  %v453_v55 = vperm.slane %v3552_v26, 3  ;;  %s2805_s15 = scalar_lea.hbm %s5613_s3, %s3014_s5  ;;  %s2807_s30 = sshll.u32 %s5213_s4, 4  ;;  %s2808_s30 = int_to_ptr.vmem [resolvable:$true] %s2807_s30 }
  0x37   : > { %362 = vperm.xlu0 %3105, %v301_v3   ;;  %3109 = vset.pattern.permute.xlu2 %v3367_v7  ;;  %5713 = vst [vmem:[#allocation20_spill] sm:$0xff] %v3552_v26  ;;  %v442_v3 = vperm.slane %v3528_v13, 3  ;;  %v454_v53 = vperm.slane %v3557_v30, 3  ;;  %v5718_v44 = vperm.slane %v3557_v30, 2  ;;  %s2809_s7 = sshll.u32 %s2805_s15, 4  ;;  %s2792_s8 = scalar_lea.sflag [#allocation4], %s3507_s21  ;;  %s2810_s7 = int_to_ptr.hbm [resolvable:$true] %s2809_s7 }
  0x38   : > { %920 = vperm.xlu2 %3109, %v918_v6   ;;  %5714 = vst [vmem:[#allocation21_spill] sm:$0xff] %v3557_v30  ;;  %v444_v6 = vperm.slane %v3532_v15, 3  ;;  %s3285_s9 = sshra.s32 %s2810_s7, 4  ;;  %s3291_s28 = scalar_lea.hbm %s5613_s3, 288  ;;  %s3286_s9 = int_to_ptr.hbm [resolvable:$true] %s3285_s9 }
  0x39   : > { %s3287_s11 = scalar_lea.hbm %s3286_s9, 144  ;;  %p3292_p12 = scmp.lt.s32.totalorder %s3286_s9, %s5613_s3 }
  0x3a   : > { %p3288_p6 = scmp.ne.s32.totalorder %s3286_s9, %s3287_s11  ;;  %p3293_p13 = scmp.lt.s32.totalorder %s3291_s28, %s3287_s11 }
  0x3c   : > { %p3289_p7 = pnand %p3288_p6, %p3441_p8  ;;  %p3294_p0 = por %p3293_p13, %p3292_p12 }
  0x3e   : > { %p3290_p11 = pneg %p3289_p7 }
  0x3f   : > { %3110 = vset.pattern.permute.xlu0 %v3367_v7  ;;  %v445_v7 = vperm.slane %v3534_v16, 3 }
  0x40   : > { %p3295_p1 = pnand %p3294_p0, %p3290_p11 }
  0x9f   : > { %v457_v45 = vpop.permute.xlu1 %456 }
  0xa0   : > { %v323_v54 = vpop.permute.xlu0 %322  ;;  %v3698_v49 = vmin.f32 %v437_v62, %v457_v45  ;;  %v3702_v51 = vmin.f32 %v439_v0, %v457_v45  ;;  %v3704_v46 = vmin.f32 %v440_v1, %v457_v45  ;;  %v3720_v62 = vmin.f32 %v448_v60, %v457_v45 }
  0xa1   : > { %v3625_v47 = vmin.f32 %v302_v22, %v323_v54  ;;  %v3632_v52 = vmin.f32 %v303_v23, %v323_v54  ;;  %v3636_v50 = vmin.f32 %v304_v27, %v323_v54  ;;  %v3640_v48 = vmin.f32 %v305_v28, %v323_v54 }
  0xa2   : > { %v3644_v22 = vmin.f32 %v306_v29, %v323_v54  ;;  %v3648_v43 = vmin.f32 %v307_v31, %v323_v54  ;;  %v3652_v23 = vmin.f32 %v308_v32, %v323_v54  ;;  %v3656_v27 = vmin.f32 %v309_v33, %v323_v54  ;;  %5719 = vst [vmem:[#allocation25_spill] sm:$0xff] %v3702_v51 }
  0xa3   : > { %v3660_v28 = vmin.f32 %v310_v34, %v323_v54  ;;  %v3664_v29 = vmin.f32 %v311_v35, %v323_v54  ;;  %v3668_v31 = vmin.f32 %v312_v36, %v323_v54  ;;  %v3672_v32 = vmin.f32 %v313_v37, %v323_v54  ;;  %5720 = vst [vmem:[#allocation26_spill] sm:$0xff] %v3704_v46 }
  0xa4   : > { %v3676_v33 = vmin.f32 %v314_v38, %v323_v54  ;;  %v3680_v34 = vmin.f32 %v315_v39, %v323_v54  ;;  %v3684_v35 = vmin.f32 %v316_v40, %v323_v54  ;;  %v3688_v36 = vmin.f32 %v317_v41, %v323_v54  ;;  %5728 = vst [vmem:[#allocation34_spill] sm:$0xff] %v3720_v62 }
  0xa5   : > { %v3692_v37 = vmin.f32 %v318_v42, %v323_v54  ;;  %v3696_v38 = vmin.f32 %v5718_v44, %v323_v54  ;;  %v3700_v39 = vmin.f32 %v438_v63, %v457_v45  ;;  %v3708_v41 = vmin.f32 %v442_v3, %v457_v45 }
  0xa6   : > { %5715 = vst [vmem:[#allocation22_spill] sm:$0xff] %v3684_v35  ;;  %v3706_v35 = vmin.f32 %v441_v2, %v457_v45  ;;  %v3712_v42 = vmin.f32 %v444_v6, %v457_v45  ;;  %v3716_v44 = vmin.f32 %v446_v5, %v457_v45  ;;  %v3718_v54 = vmin.f32 %v447_v61, %v457_v45 }
  0xa7   : > { %5716 = vst [vmem:[#allocation23_spill] sm:$0xff] %v3688_v36  ;;  %v3710_v36 = vmin.f32 %v443_v4, %v457_v45  ;;  %v3722_v63 = vmin.f32 %v449_v59, %v457_v45  ;;  %v3724_v0 = vmin.f32 %v450_v58, %v457_v45  ;;  %v3726_v1 = vmin.f32 %v451_v57, %v457_v45 }
  0xa8   : > { %5717 = vst [vmem:[#allocation24_spill] sm:$0xff] %v3692_v37  ;;  %v3714_v37 = vmin.f32 %v445_v7, %v457_v45  ;;  %v5732_v2 = vperm.slane %v3518_v8, 0  ;;  %v3730_v4 = vmin.f32 %v452_v56, %v457_v45  ;;  %v3732_v6 = vmin.f32 %v453_v55, %v457_v45 }
  0xa9   : > { %v363_v40 = vpop.permute.xlu0 %362  ;;  %5721 = vst [vmem:[#allocation27_spill] sm:$0xff] %v3706_v35  ;;  %v3734_v7 = vmin.f32 %v454_v53, %v457_v45  ;;  %v5736_v5 = vperm.slane %v3520_v9, 0  ;;  %v5737_v60 = vperm.slane %v3522_v10, 0  ;;  %v5738_v58 = vperm.slane %v3524_v11, 0 }
  0xaa   : > { %5722 = vst [vmem:[#allocation28_spill] sm:$0xff] %v3708_v41  ;;  %v365_v3 = vmax.f32 %v5732_v2, %v363_v40  ;;  %v5739_v57 = vperm.slane %v3526_v12, 0  ;;  %v5740_v2 = vperm.slane %v3528_v13, 0  ;;  %v5741_v55 = vperm.slane %v3530_v14, 0 }
  0xab   : > { %5723 = vst [vmem:[#allocation29_spill] sm:$0xff] %v3710_v36  ;;  %v366_v61 = vmax.f32 %v5736_v5, %v363_v40  ;;  %v367_v59 = vmax.f32 %v5737_v60, %v363_v40  ;;  %v5742_v45 = vperm.slane %v3532_v15, 0  ;;  %v5743_v5 = vperm.slane %v3534_v16, 0 }
  0xac   : > { %5724 = vst [vmem:[#allocation30_spill] sm:$0xff] %v3712_v42  ;;  %v370_v56 = vmax.f32 %v5740_v2, %v363_v40  ;;  %v5744_v60 = vperm.slane %v3536_v17, 0  ;;  %v5747_v2 = vperm.slane %v3542_v20, 0 }
  0xad   : > { %5725 = vst [vmem:[#allocation31_spill] sm:$0xff] %v3714_v37  ;;  %v372_v53 = vmax.f32 %v5742_v45, %v363_v40  ;;  %v5749_v45 = vperm.slane %v3548_v24, 0  ;;  %v384_v35 = vsub.f32 %v3632_v52, %v366_v61  ;;  %v497_v61 = vpop.permute.xlu1 %496 }
  0xae   : > { %5726 = vst [vmem:[#allocation32_spill] sm:$0xff] %v3716_v44 }
  0xaf   : > { %5727 = vst [vmem:[#allocation33_spill] sm:$0xff] %v3718_v54  ;;  %v377_v54 = vmax.f32 %v5747_v2, %v363_v40  ;;  %v379_v37 = vmax.f32 %v5749_v45, %v363_v40  ;;  %v385_v2 = vsub.f32 %v3636_v50, %v367_v59  ;;  %v388_v45 = vsub.f32 %v3648_v43, %v370_v56 }
  0xb0   : > { %5729 = vst [vmem:[#allocation35_spill] sm:$0xff] %v3722_v63  ;;  %v390_v51 = vsub.f32 %v3656_v27, %v372_v53 }
  0xb1   : > { %5730 = vst [vmem:[#allocation36_spill] sm:$0xff] %v3724_v0  ;;  %v368_v0 = vmax.f32 %v5738_v58, %v363_v40  ;;  %v5745_v58 = vperm.slane %v3538_v18, 0  ;;  %v395_v50 = vsub.f32 %v3676_v33, %v377_v54  ;;  %v3798_v33 = vadd.f32 1.0, %v388_v45 }
  0xb2   : > { %5731 = vst [vmem:[#allocation37_spill] sm:$0xff] %v3726_v1  ;;  %v369_v1 = vmax.f32 %v5739_v57, %v363_v40  ;;  %v5746_v57 = vperm.slane %v3540_v19, 0 }
  0xb3   : > { %5733 = vst [vmem:[#allocation38_spill] sm:$0xff] %v3730_v4  ;;  %v374_v4 = vmax.f32 %v5744_v60, %v363_v40  ;;  %v375_v63 = vmax.f32 %v5745_v58, %v363_v40  ;;  %v5751_v60 = vperm.slane %v3552_v26, 0  ;;  %v5752_v58 = vperm.slane %v3557_v30, 0 }
  0xb4   : > { %5734 = vst [vmem:[#allocation39_spill] sm:$0xff] %v3732_v6  ;;  %v371_v6 = vmax.f32 %v5741_v55, %v363_v40  ;;  %v376_v62 = vmax.f32 %v5746_v57, %v363_v40  ;;  %v5748_v55 = vperm.slane %v3544_v21, 0  ;;  %v383_v57 = vsub.f32 %v3625_v47, %v365_v3  ;;  %v5755_v3 = vld [vmem:[#allocation24_spill] sm:$0xff] }
  0xb5   : > { %5735 = vst [vmem:[#allocation40_spill] sm:$0xff] %v3734_v7  ;;  %v373_v7 = vmax.f32 %v5743_v5, %v363_v40  ;;  %v5750_v5 = vperm.slane %v3550_v25, 0  ;;  %v381_v36 = vmax.f32 %v5751_v60, %v363_v40  ;;  %v382_v41 = vmax.f32 %v5752_v58, %v363_v40 }
  0xb6   : > { %v378_v44 = vmax.f32 %v5748_v55, %v363_v40  ;;  %v386_v55 = vsub.f32 %v3640_v48, %v368_v0  ;;  %v387_v46 = vsub.f32 %v3644_v22, %v369_v1  ;;  %v393_v47 = vsub.f32 %v3668_v31, %v375_v63  ;;  %v5753_v0 = vld [vmem:[#allocation22_spill] sm:$0xff]  ;;  %v5754_v1 = vld [vmem:[#allocation23_spill] sm:$0xff] }
  0xb7   : > { %v380_v42 = vmax.f32 %v5750_v5, %v363_v40  ;;  %v389_v5 = vsub.f32 %v3652_v23, %v371_v6  ;;  %v391_v60 = vsub.f32 %v3660_v28, %v373_v7  ;;  %v392_v40 = vsub.f32 %v3664_v29, %v374_v4 }
  0xb8   : > { %v394_v52 = vsub.f32 %v3672_v32, %v376_v62  ;;  %v396_v48 = vsub.f32 %v3680_v34, %v378_v44  ;;  %v397_v22 = vsub.f32 %v5753_v0, %v379_v37  ;;  %v399_v23 = vsub.f32 %v5755_v3, %v381_v36 }
  0xb9   : > { %v398_v43 = vsub.f32 %v5754_v1, %v380_v42  ;;  %v400_v27 = vsub.f32 %v3696_v38, %v382_v41  ;;  %v3788_v6 = vadd.f32 1.0, %v383_v57  ;;  %v3790_v28 = vadd.f32 1.0, %v384_v35 }
  0xba   : > { %v3792_v29 = vadd.f32 1.0, %v385_v2  ;;  %v3794_v31 = vadd.f32 1.0, %v386_v55  ;;  %v3796_v32 = vadd.f32 1.0, %v387_v46  ;;  %v3800_v34 = vadd.f32 1.0, %v389_v5 }
  0xbb   : > { %v3802_v37 = vadd.f32 1.0, %v390_v51  ;;  %v3804_v42 = vadd.f32 1.0, %v391_v60  ;;  %v3806_v36 = vadd.f32 1.0, %v392_v40  ;;  %v3808_v38 = vadd.f32 1.0, %v393_v47 }
  0xbc   : > { %v3810_v35 = vadd.f32 1.0, %v394_v52  ;;  %v3812_v41 = vadd.f32 1.0, %v395_v50  ;;  %v3814_v44 = vadd.f32 1.0, %v396_v48  ;;  %v3816_v46 = vadd.f32 1.0, %v397_v22 }
  0xbd   : > { %v3818_v54 = vadd.f32 1.0, %v398_v43  ;;  %v3820_v62 = vadd.f32 1.0, %v399_v23  ;;  %v3822_v51 = vadd.f32 1.0, %v400_v27  ;;  %v5757_v0 = vperm.slane %v3518_v8, 1 }
  0xbe   : > { %v5758_v1 = vperm.slane %v3520_v9, 1  ;;  %v5759_v3 = vperm.slane %v3522_v10, 1  ;;  %v5760_v27 = vperm.slane %v3524_v11, 1  ;;  %v5761_v47 = vperm.slane %v3526_v12, 1 }
  0xbf   : > { %5756 = vst [vmem:[#allocation22_spill] sm:$0xff] %v3822_v51  ;;  %v499_v22 = vmax.f32 %v5757_v0, %v497_v61  ;;  %v5762_v52 = vperm.slane %v3528_v13, 1  ;;  %v5763_v48 = vperm.slane %v3530_v14, 1  ;;  %v5764_v0 = vperm.slane %v3532_v15, 1 }
  0xc0   : > { %v500_v43 = vmax.f32 %v5758_v1, %v497_v61  ;;  %v501_v23 = vmax.f32 %v5759_v3, %v497_v61  ;;  %v502_v40 = vmax.f32 %v5760_v27, %v497_v61  ;;  %v503_v60 = vmax.f32 %v5761_v47, %v497_v61 }
  0xc1   : > { %v504_v50 = vmax.f32 %v5762_v52, %v497_v61  ;;  %v505_v5 = vmax.f32 %v5763_v48, %v497_v61  ;;  %v506_v45 = vmax.f32 %v5764_v0, %v497_v61  ;;  %v5765_v1 = vperm.slane %v3534_v16, 1 }
  0xc2   : > { %v5766_v3 = vperm.slane %v3536_v17, 1  ;;  %v5767_v27 = vperm.slane %v3538_v18, 1  ;;  %v5768_v47 = vperm.slane %v3540_v19, 1  ;;  %v5769_v52 = vperm.slane %v3542_v20, 1  ;;  %v5777_v19 = vld [vmem:[#allocation27_spill] sm:$0xff]  ;;  %v5780_v17 = vld [vmem:[#allocation30_spill] sm:$0xff] }
  0xc3   : > { %v507_v55 = vmax.f32 %v5765_v1, %v497_v61  ;;  %v5770_v48 = vperm.slane %v3544_v21, 1  ;;  %v5771_v0 = vperm.slane %v3548_v24, 1  ;;  %v5772_v1 = vperm.slane %v3550_v25, 1  ;;  %v5776_v21 = vld [vmem:[#allocation26_spill] sm:$0xff]  ;;  %v5779_v25 = vld [vmem:[#allocation29_spill] sm:$0xff] }
  0xc4   : > { %v508_v2 = vmax.f32 %v5766_v3, %v497_v61  ;;  %v509_v57 = vmax.f32 %v5767_v27, %v497_v61  ;;  %v510_v58 = vmax.f32 %v5768_v47, %v497_v61  ;;  %v511_v53 = vmax.f32 %v5769_v52, %v497_v61  ;;  %v5775_v52 = vld [vmem:[#allocation25_spill] sm:$0xff] }
  0xc5   : > { %v512_v56 = vmax.f32 %v5770_v48, %v497_v61  ;;  %v513_v59 = vmax.f32 %v5771_v0, %v497_v61  ;;  %v514_v7 = vmax.f32 %v5772_v1, %v497_v61  ;;  %v5773_v3 = vperm.slane %v3552_v26, 1  ;;  %v5778_v0 = vld [vmem:[#allocation28_spill] sm:$0xff] }
  0xc6   : > { %v5774_v27 = vperm.slane %v3557_v30, 1  ;;  %v517_v47 = vsub.f32 %v3698_v49, %v499_v22  ;;  %v518_v51 = vsub.f32 %v3700_v39, %v500_v43  ;;  %v519_v20 = vsub.f32 %v5775_v52, %v501_v23  ;;  %v5782_v30 = vld [vmem:[#allocation32_spill] sm:$0xff]  ;;  %v5784_v22 = vld [vmem:[#allocation34_spill] sm:$0xff]  ;;  %v5785_v43 = vld [vmem:[#allocation35_spill] sm:$0xff] }
  0xc7   : > { %v515_v4 = vmax.f32 %v5773_v3, %v497_v61  ;;  %v520_v48 = vsub.f32 %v5776_v21, %v502_v40  ;;  %v521_v24 = vsub.f32 %v5777_v19, %v503_v60  ;;  %v522_v18 = vsub.f32 %v5778_v0, %v504_v50  ;;  %v5781_v3 = vld [vmem:[#allocation31_spill] sm:$0xff]  ;;  %v5786_v52 = vld [vmem:[#allocation36_spill] sm:$0xff]  ;;  %v5787_v40 = vld [vmem:[#allocation37_spill] sm:$0xff] }
  0xc8   : > { %v516_v63 = vmax.f32 %v5774_v27, %v497_v61  ;;  %v523_v1 = vsub.f32 %v5779_v25, %v505_v5  ;;  %v524_v26 = vsub.f32 %v5780_v17, %v506_v45  ;;  %v525_v16 = vsub.f32 %v5781_v3, %v507_v55  ;;  %v5783_v27 = vld [vmem:[#allocation33_spill] sm:$0xff]  ;;  %v5788_v60 = vld [vmem:[#allocation38_spill] sm:$0xff]  ;;  %v5789_v0 = vld [vmem:[#allocation39_spill] sm:$0xff] }
  0xc9   : > { %v526_v61 = vsub.f32 %v5782_v30, %v508_v2  ;;  %v527_v49 = vsub.f32 %v5783_v27, %v509_v57  ;;  %v528_v39 = vsub.f32 %v5784_v22, %v510_v58  ;;  %v529_v23 = vsub.f32 %v5785_v43, %v511_v53  ;;  %v5790_v5 = vld [vmem:[#allocation40_spill] sm:$0xff] }
  0xca   : > { %v530_v21 = vsub.f32 %v5786_v52, %v512_v56  ;;  %v531_v19 = vsub.f32 %v5787_v40, %v513_v59  ;;  %v532_v50 = vsub.f32 %v5788_v60, %v514_v7  ;;  %v533_v25 = vsub.f32 %v5789_v0, %v515_v4 }
  0xcb   : > { %v534_v17 = vsub.f32 %v5790_v5, %v516_v63  ;;  %v535_v45 = vadd.f32 1.0, %v517_v47  ;;  %v536_v55 = vadd.f32 1.0, %v518_v51  ;;  %v537_v3 = vadd.f32 1.0, %v519_v20 }
  0xcc   : > { %v538_v30 = vadd.f32 1.0, %v520_v48  ;;  %v539_v2 = vadd.f32 1.0, %v521_v24  ;;  %v540_v57 = vadd.f32 1.0, %v522_v18  ;;  %v541_v27 = vadd.f32 1.0, %v523_v1 }
  0xcd   : > { %v542_v58 = vadd.f32 1.0, %v524_v26  ;;  %v543_v22 = vadd.f32 1.0, %v525_v16  ;;  %v544_v53 = vadd.f32 1.0, %v526_v61  ;;  %v545_v43 = vadd.f32 1.0, %v527_v49  ;;  %v3899_v49 = vpop.permute.xlu2 %608 }
  0xce   : > { %v546_v56 = vadd.f32 1.0, %v528_v39  ;;  %v547_v52 = vadd.f32 1.0, %v529_v23  ;;  %v548_v59 = vadd.f32 1.0, %v530_v21  ;;  %v549_v40 = vadd.f32 1.0, %v531_v19 }
  0xcf   : > { %v550_v7 = vadd.f32 1.0, %v532_v50  ;;  %v551_v60 = vadd.f32 1.0, %v533_v25  ;;  %v3896_v4 = vadd.f32 1.0, %v534_v17  ;;  %v553_v63 = vmax.f32 %v535_v45, 0.0 }
  0xd0   : > { %v554_v47 = vmax.f32 %v536_v55, 0.0  ;;  %v555_v51 = vmax.f32 %v537_v3, 0.0  ;;  %v556_v20 = vmax.f32 %v538_v30, 0.0  ;;  %v557_v48 = vmax.f32 %v539_v2, 0.0 }
  0xd1   : > { %v558_v24 = vmax.f32 %v540_v57, 0.0  ;;  %v559_v18 = vmax.f32 %v541_v27, 0.0  ;;  %v560_v1 = vmax.f32 %v542_v58, 0.0  ;;  %v561_v26 = vmax.f32 %v543_v22, 0.0 }
  0xd2   : > { %v562_v16 = vmax.f32 %v544_v53, 0.0  ;;  %v589_v61 = vperm.slane %v3518_v8, 4  ;;  %v563_v39 = vmax.f32 %v545_v43, 0.0  ;;  %v564_v23 = vmax.f32 %v546_v56, 0.0 }
  0xd3   : > { %v565_v21 = vmax.f32 %v547_v52, 0.0  ;;  %v590_v19 = vperm.slane %v3520_v9, 4  ;;  %v566_v50 = vmax.f32 %v548_v59, 0.0  ;;  %v567_v0 = vmax.f32 %v549_v40, 0.0 }
  0xd4   : > { %v568_v25 = vmax.f32 %v550_v7, 0.0  ;;  %v591_v5 = vperm.slane %v3522_v10, 4  ;;  %v569_v17 = vmax.f32 %v551_v60, 0.0  ;;  %v570_v45 = vmax.f32 %v3896_v4, 0.0 }
  0xd5   : > { %v5791_v55 = vmax.f32 %v3788_v6, 0.0  ;;  %v5792_v8 = vmax.f32 %v3790_v28, 0.0  ;;  %v5793_v2 = vmax.f32 %v3792_v29, 0.0  ;;  %v5794_v9 = vmax.f32 %v3794_v31, 0.0 }
  0xd6   : > { %v592_v10 = vperm.slane %v3524_v11, 4  ;;  %v611_v58 = vadd.f32 %v3899_v49, %v589_v61  ;;  %v5795_v6 = vmax.f32 %v3796_v32, 0.0  ;;  %v5796_v28 = vmax.f32 %v3798_v33, 0.0  ;;  %v5810_v61 = vld [vmem:[#allocation13_spill] sm:$0xff] }
  0xd7   : > { %v3906_v3 = vmul.f32 %v553_v63, %v5791_v55  ;;  %v3910_v30 = vmul.f32 %v554_v47, %v5792_v8  ;;  %v3914_v57 = vmul.f32 %v555_v51, %v5793_v2  ;;  %v3918_v27 = vmul.f32 %v556_v20, %v5794_v9  ;;  %v5816_v2 = vld [vmem:[#allocation19_spill] sm:$0xff] }
  0xd8   : > { %v3924_v22 = vmul.f32 %v557_v48, %v5795_v6  ;;  %v3928_v53 = vmul.f32 %v558_v24, %v5796_v28  ;;  %v593_v29 = vperm.slane %v3526_v12, 4  ;;  %v612_v43 = vadd.f32 %v3899_v49, %v590_v19  ;;  %v5818_v28 = vld [vmem:[#allocation21_spill] sm:$0xff] }
  0xd9   : > { %v5797_v31 = vmax.f32 %v3800_v34, 0.0  ;;  %v5798_v11 = vmax.f32 %v3802_v37, 0.0  ;;  %v5799_v32 = vmax.f32 %v3804_v42, 0.0  ;;  %v613_v33 = vadd.f32 %v3899_v49, %v591_v5 }
  0xda   : > { %v5800_v40 = vmax.f32 %v3806_v36, 0.0  ;;  %v5801_v12 = vmax.f32 %v3808_v38, 0.0  ;;  %v5802_v34 = vmax.f32 %v3810_v35, 0.0  ;;  %v594_v37 = vperm.slane %v3528_v13, 4 }
  0xdb   : > { %v3934_v56 = vmul.f32 %v559_v18, %v5797_v31  ;;  %v3938_v52 = vmul.f32 %v560_v1, %v5798_v11  ;;  %v3942_v59 = vmul.f32 %v561_v26, %v5799_v32  ;;  %v5803_v42 = vmax.f32 %v3812_v41, 0.0  ;;  %v5819_v32 = vld [vmem:[#allocation22_spill] sm:$0xff] }
  0xdc   : > { %v3947_v7 = vmul.f32 %v562_v16, %v5800_v40  ;;  %v3951_v60 = vmul.f32 %v563_v39, %v5801_v12  ;;  %v3955_v4 = vmul.f32 %v564_v23, %v5802_v34  ;;  %v5804_v47 = vmax.f32 %v3814_v44, 0.0  ;;  %v5809_v16 = vld [vmem:[#allocation12_spill] sm:$0xff]  ;;  %v5811_v23 = vld [vmem:[#allocation14_spill] sm:$0xff] }
  0xdd   : > { %v3960_v63 = vmul.f32 %v565_v21, %v5803_v42  ;;  %v614_v36 = vadd.f32 %v3899_v49, %v592_v10  ;;  %v3968_v38 = vsub.f32 %v611_v58, %v3906_v3  ;;  %v5805_v20 = vmax.f32 %v3816_v46, 0.0  ;;  %v5817_v10 = vld [vmem:[#allocation20_spill] sm:$0xff] }
  0xde   : > { %v3964_v51 = vmul.f32 %v566_v50, %v5804_v47  ;;  %v5806_v48 = vmax.f32 %v3818_v54, 0.0  ;;  %v615_v41 = vadd.f32 %v3899_v49, %v593_v29  ;;  %v3980_v24 = vsub.f32 %v612_v43, %v3910_v30  ;;  %v5812_v50 = vld [vmem:[#allocation15_spill] sm:$0xff] }
  0xdf   : > { %v3972_v35 = vmul.f32 %v567_v0, %v5805_v20  ;;  %v5807_v44 = vmax.f32 %v3820_v62, 0.0  ;;  %v595_v1 = vperm.slane %v3530_v14, 4  ;;  %v596_v26 = vperm.slane %v3532_v15, 4  ;;  %v5813_v62 = vld [vmem:[#allocation16_spill] sm:$0xff]  ;;  %v5814_v14 = vld [vmem:[#allocation17_spill] sm:$0xff] }
  0xe0   : > { %v3976_v13 = vmul.f32 %v568_v25, %v5806_v48  ;;  %v3989_v46 = vsub.f32 %v613_v33, %v3914_v57  ;;  %v597_v54 = vperm.slane %v5809_v16, 4  ;;  %v598_v39 = vperm.slane %v5810_v61, 4 }
  0xe1   : > { %v3984_v18 = vmul.f32 %v569_v17, %v5807_v44  ;;  %v599_v21 = vperm.slane %v5811_v23, 4  ;;  %v616_v19 = vadd.f32 %v3899_v49, %v594_v37  ;;  %v600_v0 = vperm.slane %v5812_v50, 4  ;;  %v5815_v17 = vld [vmem:[#allocation18_spill] sm:$0xff] }
  0xe2   : > { %v601_v25 = vperm.slane %v5813_v62, 4  ;;  %v3998_v5 = vsub.f32 %v614_v36, %v3918_v27  ;;  %3111 = vrcp.f32 %v3968_v38  ;;  %v602_v15 = vperm.slane %v5814_v14, 4 }
  0xe3   : > { %5808 = vst [vmem:[#allocation23_spill] sm:$0xff] %v3984_v18  ;;  %v603_v55 = vperm.slane %v5815_v17, 4  ;;  %v4004_v8 = vsub.f32 %v615_v41, %v3924_v22  ;;  %3113 = vrcp.f32 %v3980_v24  ;;  %v604_v9 = vperm.slane %v5816_v2, 4 }
  0xe4   : > { %v605_v58 = vperm.slane %v5817_v10, 4  ;;  %v617_v6 = vadd.f32 %v3899_v49, %v595_v1  ;;  %3115 = vrcp.f32 %v3989_v46  ;;  %v606_v29 = vperm.slane %v5818_v28, 4 }
  0xe5   : > { %v618_v43 = vadd.f32 %v3899_v49, %v596_v26  ;;  %v619_v31 = vadd.f32 %v3899_v49, %v597_v54  ;;  %v4015_v11 = vsub.f32 %v616_v19, %v3928_v53  ;;  %v5820_v33 = vmax.f32 %v5819_v32, 0.0 }
  0xe6   : > { %v620_v12 = vadd.f32 %v3899_v49, %v598_v39  ;;  %v621_v34 = vadd.f32 %v3899_v49, %v599_v21  ;;  %3117 = vrcp.f32 %v3998_v5  ;;  %v622_v37 = vadd.f32 %v3899_v49, %v600_v0 }
  0xe7   : > { %v4019_v40 = vmul.f32 %v570_v45, %v5820_v33  ;;  %v623_v42 = vadd.f32 %v3899_v49, %v601_v25  ;;  %v624_v47 = vadd.f32 %v3899_v49, %v602_v15  ;;  %3119 = vrcp.f32 %v4004_v8 }
  0xe8   : > { %v4028_v36 = vpop.eup %3111  ;;  %v625_v20 = vadd.f32 %v3899_v49, %v603_v55  ;;  %v626_v45 = vadd.f32 %v3899_v49, %v604_v9  ;;  %v627_v48 = vadd.f32 %v3899_v49, %v605_v58  ;;  %v4034_v41 = vsub.f32 %v617_v6, %v3934_v56 }
  0xe9   : > { %5821 = vst [vmem:[#allocation24_spill] sm:$0xff] %v4019_v40  ;;  %v4036_v44 = vpop.eup %3113  ;;  %v628_v1 = vadd.f32 %v3899_v49, %v606_v29  ;;  %v4040_v26 = vsub.f32 %v618_v43, %v3938_v52  ;;  %v4043_v16 = vsub.f32 %v619_v31, %v3942_v59  ;;  %3121 = vrcp.f32 %v4015_v11 }
  0xea   : > { %v4046_v54 = vpop.eup %3115  ;;  %v4049_v61 = vsub.f32 %v620_v12, %v3947_v7  ;;  %v4052_v39 = vsub.f32 %v621_v34, %v3951_v60  ;;  %v648_v23 = vmul.f32 %v4028_v36, %v3968_v38  ;;  %v663_v49 = vmul.f32 %v4036_v44, %v3980_v24 }
  0xeb   : > { %v4059_v21 = vsub.f32 %v622_v37, %v3955_v4  ;;  %v4062_v19 = vsub.f32 %v623_v42, %v3960_v63  ;;  %v4065_v50 = vsub.f32 %v624_v47, %v3964_v51  ;;  %v678_v0 = vmul.f32 %v4046_v54, %v3989_v46 }
  0xec   : > { %v4069_v62 = vpop.eup %3117  ;;  %v4072_v25 = vsub.f32 %v625_v20, %v3972_v35  ;;  %v4075_v14 = vsub.f32 %v626_v45, %v3976_v13  ;;  %v4078_v15 = vsub.f32 %v627_v48, %v3984_v18  ;;  %3123 = vrcp.f32 %v4034_v41 }
  0xed   : > { %v4081_v17 = vpop.eup %3119  ;;  %v4084_v55 = vsub.f32 %v628_v1, %v4019_v40  ;;  %v658_v2 = vand.u32 2147483648, %v3968_v38  ;;  %v673_v9 = vand.u32 2147483648, %v3980_v24  ;;  %v693_v10 = vmul.f32 %v4069_v62, %v3998_v5 }
  0xee   : > { %v649_v58 = vsub.f32 1.0, %v648_v23  ;;  %vm652_vm1 = vweird.f32 %v3968_v38  ;;  %v656_v6 = vand.u32 2147483647, %v3968_v38  ;;  %v664_v28 = vsub.f32 1.0, %v663_v49 }
  0xef   : > { %v708_v29 = vmul.f32 %v4081_v17, %v4004_v8  ;;  %v4094_v43 = vpop.eup %3121  ;;  %vm667_vm2 = vweird.f32 %v3980_v24  ;;  %v671_v31 = vand.u32 2147483647, %v3980_v24  ;;  %v679_v32 = vsub.f32 1.0, %v678_v0 }
  0xf0   : > { %v688_v33 = vand.u32 2147483648, %v3989_v46  ;;  %v694_v12 = vsub.f32 1.0, %v693_v10  ;;  %v703_v34 = vand.u32 2147483648, %v3998_v5  ;;  %v723_v42 = vmul.f32 %v4094_v43, %v4015_v11 }
  0xf1   : > { %v709_v37 = vsub.f32 1.0, %v708_v29  ;;  %v659_v47 = vor.u32 1.1754944e-38, %v658_v2  ;;  %v674_v20 = vor.u32 1.1754944e-38, %v673_v9  ;;  %vm682_vm3 = vweird.f32 %v3989_v46 }
  0xf2   : > { %v686_v45 = vand.u32 2147483647, %v3989_v46  ;;  %v4104_v48 = vpop.eup %3123  ;;  %v650_v1 = vmul.f32 %v4028_v36, %v649_v58  ;;  %v665_v23 = vmul.f32 %v4036_v44, %v664_v28  ;;  %v701_v49 = vand.u32 2147483647, %v3998_v5 }
  0xf3   : > { %v724_v0 = vsub.f32 1.0, %v723_v42  ;;  %v680_v10 = vmul.f32 %v4046_v54, %v679_v32  ;;  %v689_v29 = vor.u32 1.1754944e-38, %v688_v33  ;;  %vm697_vm4 = vweird.f32 %v3998_v5 }
  0xf4   : > { %vm712_vm5 = vweird.f32 %v4004_v8  ;;  %vm653_vm6 = vweird.f32 %v4028_v36  ;;  %vm4113_vm7 = vcmp.eq.f32.partialorder %v656_v6, 8.507059e+37  ;;  %vm4117_vm8 = vcmp.eq.f32.partialorder %v671_v31, 8.507059e+37 }
  0xf5   : > { %v695_v58 = vmul.f32 %v4069_v62, %v694_v12  ;;  %v704_v28 = vor.u32 1.1754944e-38, %v703_v34  ;;  %v710_v32 = vmul.f32 %v4081_v17, %v709_v37  ;;  %vm668_vm9 = vweird.f32 %v4036_v44  ;;  %vm4144_vm13 = vmor %vm652_vm1, %vm653_vm6 }
  0xf6   : > { %vm4124_vm10 = vcmp.eq.f32.partialorder %v686_v45, 8.507059e+37  ;;  %v716_v6 = vand.u32 2147483647, %v4004_v8  ;;  %v718_v42 = vand.u32 2147483648, %v4004_v8  ;;  %v738_v31 = vmul.f32 %v4104_v48, %v4034_v41  ;;  %vm4155_vm15 = vmor %vm667_vm2, %vm668_vm9 }
  0xf7   : > { %v651_v40 = vadd.f32 %v4028_v36, %v650_v1  ;;  %v666_v12 = vadd.f32 %v4036_v44, %v665_v23  ;;  %vm683_vm11 = vweird.f32 %v4046_v54  ;;  %vm4135_vm12 = vcmp.eq.f32.partialorder %v701_v49, 8.507059e+37 }
  0xf8   : > { %v725_v37 = vmul.f32 %v4094_v43, %v724_v0  ;;  %v681_v1 = vadd.f32 %v4046_v54, %v680_v10  ;;  %vm698_vm14 = vweird.f32 %v4069_v62  ;;  %v731_v23 = vand.u32 2147483647, %v4015_v11  ;;  %vm4165_vm1 = vmor %vm682_vm3, %vm683_vm11 }
  0xf9   : > { %v739_v49 = vsub.f32 1.0, %v738_v31  ;;  %v696_v38 = vadd.f32 %v4069_v62, %v695_v58  ;;  %v711_v18 = vadd.f32 %v4081_v17, %v710_v32  ;;  %vm713_vm0 = vweird.f32 %v4081_v17  ;;  %vm4186_vm3 = vmor %vm697_vm4, %vm698_vm14 }
  0xfa   : > { %3125 = vrcp.f32 %v4040_v26  ;;  %vm4169_vm6 = vcmp.eq.f32.partialorder %v716_v6, 8.507059e+37  ;;  %vm727_vm2 = vweird.f32 %v4015_v11  ;;  %vm728_vm9 = vweird.f32 %v4094_v43  ;;  %vm4197_vm11 = vmor %vm712_vm5, %vm713_vm0 }
  0xfb   : > { %v733_v58 = vand.u32 2147483648, %v4015_v11  ;;  %v655_v32 = vsel %vm4144_vm13, %v4028_v36, %v651_v40  ;;  %v670_v46 = vsel %vm4155_vm15, %v4036_v44, %v666_v12  ;;  %v726_v31 = vadd.f32 %v4094_v43, %v725_v37  ;;  %vm4222_vm5 = vmor %vm727_vm2, %vm728_vm9 }
  0xfc   : > { %3127 = vrcp.f32 %v4043_v16  ;;  %v685_v40 = vsel %vm4165_vm1, %v4046_v54, %v681_v1  ;;  %v719_v44 = vor.u32 1.1754944e-38, %v718_v42  ;;  %v740_v5 = vmul.f32 %v4104_v48, %v739_v49 }
  0xfd   : > { %vm742_vm4 = vweird.f32 %v4034_v41  ;;  %v700_v12 = vsel %vm4186_vm3, %v4069_v62, %v696_v38  ;;  %v715_v37 = vsel %vm4197_vm11, %v4081_v17, %v711_v18  ;;  %vm4209_vm13 = vcmp.eq.f32.partialorder %v731_v23, 8.507059e+37 }
  0xfe   : > { %3129 = vrcp.f32 %v4049_v61  ;;  %v660_v8 = vsel %vm4113_vm7, %v659_v47, %v655_v32  ;;  %v675_v42 = vsel %vm4117_vm8, %v674_v20, %v670_v46  ;;  %v734_v18 = vor.u32 1.1754944e-38, %v733_v58 }
  0xff   : > { %v746_v17 = vand.u32 2147483647, %v4034_v41  ;;  %v690_v2 = vsel %vm4124_vm10, %v689_v29, %v685_v40  ;;  %v730_v47 = vsel %vm4222_vm5, %v4094_v43, %v726_v31  ;;  %vm743_vm7 = vweird.f32 %v4104_v48 }
 0x100   : > { %v4227_v45 = vpop.eup %3125  ;;  %3131 = vrcp.f32 %v4052_v39  ;;  %v705_v11 = vsel %vm4135_vm12, %v704_v28, %v700_v12  ;;  %v720_v20 = vsel %vm4169_vm6, %v719_v44, %v715_v37  ;;  %v741_v9 = vadd.f32 %v4104_v48, %v740_v5  ;;  %vm4276_vm10 = vmor %vm742_vm4, %vm743_vm7 }
 0x101   : > { %v753_v33 = vmul.f32 %v4227_v45, %v4040_v26  ;;  %v4246_v1 = vmul.f32 %v660_v8, %v3906_v3  ;;  %v4249_v43 = vmul.f32 %v675_v42, %v3910_v30  ;;  %v748_v23 = vand.u32 2147483648, %v4034_v41 }
 0x102   : > { %v4243_v29 = vpop.eup %3127  ;;  %3133 = vrcp.f32 %v4059_v21  ;;  %v4254_v28 = vmul.f32 %v690_v2, %v3914_v57  ;;  %v735_v34 = vsel %vm4209_vm13, %v734_v18, %v730_v47  ;;  %vm4258_vm8 = vcmp.eq.f32.partialorder %v746_v17, 8.507059e+37 }
 0x103   : > { %v768_v3 = vmul.f32 %v4243_v29, %v4043_v16  ;;  %v4267_v30 = vmul.f32 %v705_v11, %v3918_v27  ;;  %v4270_v38 = vmul.f32 %v720_v20, %v3924_v22  ;;  %v763_v10 = vand.u32 2147483648, %v4040_v26 }
 0x104   : > { %v4264_v0 = vpop.eup %3129  ;;  %3135 = vrcp.f32 %v4062_v19  ;;  %v745_v27 = vsel %vm4276_vm10, %v4104_v48, %v741_v9  ;;  %v754_v24 = vsub.f32 1.0, %v753_v33  ;;  %v4290_v41 = vmul.f32 %v735_v34, %v3928_v53 }
 0x105   : > { %v769_v58 = vsub.f32 1.0, %v768_v3  ;;  %v783_v22 = vmul.f32 %v4264_v0, %v4049_v61  ;;  %v749_v46 = vor.u32 1.1754944e-38, %v748_v23  ;;  %vm757_vm12 = vweird.f32 %v4040_v26 }
 0x106   : > { %v4287_v32 = vpop.eup %3131  ;;  %v761_v6 = vand.u32 2147483647, %v4040_v26  ;;  %v778_v31 = vand.u32 2147483648, %v4043_v16  ;;  %v776_v40 = vand.u32 2147483647, %v4043_v16  ;;  %v793_v36 = vand.u32 2147483648, %v4049_v61 }
 0x107   : > { %v784_v48 = vsub.f32 1.0, %v783_v22  ;;  %v798_v44 = vmul.f32 %v4287_v32, %v4052_v39  ;;  %v750_v53 = vsel %vm4258_vm8, %v749_v46, %v745_v27  ;;  %vm772_vm14 = vweird.f32 %v4043_v16 }
 0x108   : > { %v4299_v5 = vpop.eup %3133  ;;  %v791_v12 = vand.u32 2147483647, %v4049_v61  ;;  %3137 = vrcp.f32 %v4065_v50  ;;  %v755_v37 = vmul.f32 %v4227_v45, %v754_v24  ;;  %v764_v54 = vor.u32 1.1754944e-38, %v763_v10 }
 0x109   : > { %v770_v8 = vmul.f32 %v4243_v29, %v769_v58  ;;  %v799_v42 = vsub.f32 1.0, %v798_v44  ;;  %v779_v18 = vor.u32 1.1754944e-38, %v778_v31  ;;  %v785_v17 = vmul.f32 %v4264_v0, %v784_v48 }
 0x10a   : > { %v4308_v62 = vpop.eup %3135  ;;  %vm787_vm15 = vweird.f32 %v4049_v61  ;;  %v813_v2 = vmul.f32 %v4299_v5, %v4059_v21  ;;  %v4315_v47 = vmul.f32 %v750_v53, %v3934_v56  ;;  %vm758_vm0 = vweird.f32 %v4227_v45 }
 0x10b   : > { %vm4318_vm1 = vcmp.eq.f32.partialorder %v761_v6, 8.507059e+37  ;;  %vm4322_vm6 = vcmp.eq.f32.partialorder %v776_v40, 8.507059e+37  ;;  %v794_v9 = vor.u32 1.1754944e-38, %v793_v36  ;;  %vm802_vm2 = vweird.f32 %v4052_v39  ;;  %vm4349_vm13 = vmor %vm757_vm12, %vm758_vm0 }
 0x10c   : > { %v806_v33 = vand.u32 2147483647, %v4052_v39  ;;  %vm4328_vm9 = vcmp.eq.f32.partialorder %v791_v12, 8.507059e+37  ;;  %v808_v56 = vand.u32 2147483648, %v4052_v39  ;;  %v814_v34 = vsub.f32 1.0, %v813_v2 }
 0x10d   : > { %vm817_vm3 = vweird.f32 %v4059_v21  ;;  %v828_v49 = vmul.f32 %v4308_v62, %v4062_v19  ;;  %v756_v3 = vadd.f32 %v4227_v45, %v755_v37  ;;  %v771_v57 = vadd.f32 %v4243_v29, %v770_v8 }
 0x10e   : > { %vm773_vm11 = vweird.f32 %v4243_v29  ;;  %v800_v10 = vmul.f32 %v4287_v32, %v799_v42  ;;  %v4340_v27 = vpop.eup %3137  ;;  %v786_v24 = vadd.f32 %v4264_v0, %v785_v17  ;;  %vm788_vm4 = vweird.f32 %v4264_v0 }
 0x10f   : > { %v815_v58 = vmul.f32 %v4299_v5, %v814_v34  ;;  %v829_v22 = vsub.f32 1.0, %v828_v49  ;;  %vm4353_vm5 = vcmp.eq.f32.partialorder %v806_v33, 8.507059e+37  ;;  %v821_v31 = vand.u32 2147483647, %v4059_v21  ;;  %vm4363_vm7 = vmor %vm772_vm14, %vm773_vm11  ;;  %v4676_v34 = vld [vmem:[#allocation2 + $0x78] sm:$0xff] }
 0x110   : > { %v823_v40 = vand.u32 2147483648, %v4059_v21  ;;  %v843_v48 = vmul.f32 %v4340_v27, %v4065_v50  ;;  %vm803_vm8 = vweird.f32 %v4287_v32  ;;  %v809_v26 = vor.u32 1.1754944e-38, %v808_v56  ;;  %vm4380_vm10 = vmor %vm787_vm15, %vm788_vm4  ;;  %5901 = vst [vmem:[#allocation38_spill] sm:$0xff] %v4676_v34 }
 0x111   : > { %v836_v44 = vand.u32 2147483647, %v4062_v19  ;;  %v838_v53 = vand.u32 2147483648, %v4062_v19  ;;  %v760_v12 = vsel %vm4349_vm13, %v4227_v45, %v756_v3  ;;  %v775_v37 = vsel %vm4363_vm7, %v4243_v29, %v771_v57  ;;  %vm4405_vm0 = vmor %vm802_vm2, %vm803_vm8 }
 0x112   : > { %v801_v8 = vadd.f32 %v4287_v32, %v800_v10  ;;  %3139 = vrcp.f32 %v4072_v25  ;;  %v790_v45 = vsel %vm4380_vm10, %v4264_v0, %v786_v24  ;;  %v816_v42 = vadd.f32 %v4299_v5, %v815_v58  ;;  %v4448_v58 = vpop.permute.xlu2 %920 }
 0x113   : > { %vm818_vm12 = vweird.f32 %v4299_v5  ;;  %v830_v29 = vmul.f32 %v4308_v62, %v829_v22  ;;  %vm4392_vm14 = vcmp.eq.f32.partialorder %v821_v31, 8.507059e+37  ;;  %v824_v17 = vor.u32 1.1754944e-38, %v823_v40 }
 0x114   : > { %vm832_vm15 = vweird.f32 %v4062_v19  ;;  %v844_v2 = vsub.f32 1.0, %v843_v48  ;;  %v765_v33 = vsel %vm4318_vm1, %v764_v54, %v760_v12  ;;  %v780_v0 = vsel %vm4322_vm6, %v779_v18, %v775_v37  ;;  %vm4421_vm1 = vmor %vm817_vm3, %vm818_vm12 }
 0x115   : > { %vm4409_vm11 = vcmp.eq.f32.partialorder %v836_v44, 8.507059e+37  ;;  %3141 = vrcp.f32 %v4075_v14  ;;  %v795_v54 = vsel %vm4328_vm9, %v794_v9, %v790_v45  ;;  %v805_v18 = vsel %vm4405_vm0, %v4287_v32, %v801_v8 }
 0x116   : > { %vm833_vm6 = vweird.f32 %v4308_v62  ;;  %v839_v11 = vor.u32 1.1754944e-38, %v838_v53  ;;  %v820_v20 = vsel %vm4421_vm1, %v4299_v5, %v816_v42  ;;  %v831_v23 = vadd.f32 %v4308_v62, %v830_v29 }
 0x117   : > { %v851_v9 = vand.u32 2147483647, %v4065_v50  ;;  %3143 = vrcp.f32 %v4078_v15  ;;  %v4435_v21 = vmul.f32 %v765_v33, %v3938_v52  ;;  %v4438_v49 = vmul.f32 %v780_v0, %v3942_v59  ;;  %vm4459_vm9 = vmor %vm832_vm15, %vm833_vm6 }
 0x118   : > { %v4432_v32 = vpop.eup %3139  ;;  %v845_v3 = vmul.f32 %v4340_v27, %v844_v2  ;;  %vm847_vm2 = vweird.f32 %v4065_v50  ;;  %v810_v5 = vsel %vm4353_vm5, %v809_v26, %v805_v18  ;;  %v853_v57 = vand.u32 2147483648, %v4065_v50 }
 0x119   : > { %v858_v10 = vmul.f32 %v4432_v32, %v4072_v25  ;;  %v866_v24 = vand.u32 2147483647, %v4072_v25  ;;  %v4451_v52 = vmul.f32 %v795_v54, %v3947_v7  ;;  %v825_v59 = vsel %vm4392_vm14, %v824_v17, %v820_v20 }
 0x11a   : > { %vm848_vm3 = vweird.f32 %v4340_v27  ;;  %v868_v46 = vand.u32 2147483648, %v4072_v25  ;;  %v835_v7 = vsel %vm4459_vm9, %v4308_v62, %v831_v23  ;;  %vm4468_vm4 = vcmp.eq.f32.partialorder %v851_v9, 8.507059e+37 }
 0x11b   : > { %v3142_v6 = vpop.eup %3141  ;;  %v859_v40 = vsub.f32 1.0, %v858_v10  ;;  %3145 = vrcp.f32 %v4084_v55  ;;  %v4474_v19 = vmul.f32 %v810_v5, %v3951_v60  ;;  %v846_v48 = vadd.f32 %v4340_v27, %v845_v3  ;;  %vm4495_vm8 = vmor %vm847_vm2, %vm848_vm3 }
 0x11c   : > { %vm862_vm13 = vweird.f32 %v4072_v25  ;;  %v873_v36 = vmul.f32 %v3142_v6, %v4075_v14  ;;  %vm922_vm5 = vcmp.eq.s32.totalorder %v4448_v58, 1  ;;  %v4481_v62 = vmul.f32 %v825_v59, %v3955_v4  ;;  %v4639_v4 = vld [vmem:[#allocation2 + $0x20] sm:$0xff]  ;;  %v4664_v58 = vld [vmem:[#allocation2 + $0x58] sm:$0xff] }
 0x11d   : > { %v3144_v26 = vpop.eup %3143  ;;  %v854_v44 = vor.u32 1.1754944e-38, %v853_v57  ;;  %v860_v53 = vmul.f32 %v4432_v32, %v859_v40  ;;  %vm4484_vm7 = vcmp.eq.f32.partialorder %v866_v24, 8.507059e+37  ;;  %v840_v60 = vsel %vm4409_vm11, %v839_v11, %v835_v7  ;;  %5897 = vst [vmem:[#allocation34_spill] sm:$0xff] %v4664_v58 }
 0x11e   : > { %v869_v37 = vor.u32 1.1754944e-38, %v868_v46  ;;  %v874_v16 = vsub.f32 1.0, %v873_v36  ;;  %v888_v8 = vmul.f32 %v3144_v26, %v4078_v15  ;;  %vm863_vm10 = vweird.f32 %v4432_v32 }
 0x11f   : > { %v861_v45 = vadd.f32 %v4432_v32, %v860_v53  ;;  %vm877_vm12 = vweird.f32 %v4075_v14  ;;  %v881_v42 = vand.u32 2147483647, %v4075_v14  ;;  %v850_v29 = vsel %vm4495_vm8, %v4340_v27, %v846_v48  ;;  %vm4512_vm15 = vmor %vm862_vm13, %vm863_vm10  ;;  %v5886_v48 = vld [vmem:[#allocation23_spill] sm:$0xff] }
 0x120   : > { %v875_v61 = vmul.f32 %v3142_v6, %v874_v16  ;;  %vm878_vm14 = vweird.f32 %v3142_v6  ;;  %v889_v17 = vsub.f32 1.0, %v888_v8  ;;  %v841_v2 = vmul.f32 %v840_v60, %v3960_v63  ;;  %v4627_v60 = vld [vmem:[#allocation2] sm:$0xff]  ;;  %v4633_v16 = vld [vmem:[#allocation2 + $0x10] sm:$0xff]  ;;  %v4636_v8 = vld [vmem:[#allocation2 + $0x18] sm:$0xff] }
 0x121   : > { %v3146_v50 = vpop.eup %3145  ;;  %v883_v33 = vand.u32 2147483648, %v4075_v14  ;;  %v896_v0 = vand.u32 2147483647, %v4078_v15  ;;  %v898_v56 = vand.u32 2147483648, %v4078_v15  ;;  %vm893_vm0 = vweird.f32 %v3144_v26  ;;  %vm4524_vm11 = vmor %vm877_vm12, %vm878_vm14 }
 0x122   : > { %v876_v54 = vadd.f32 %v3142_v6, %v875_v61  ;;  %v890_v27 = vmul.f32 %v3144_v26, %v889_v17  ;;  %v903_v18 = vmul.f32 %v3146_v50, %v4084_v55  ;;  %v855_v63 = vsel %vm4468_vm4, %v854_v44, %v850_v29  ;;  %v5888_v44 = vld [vmem:[#allocation24_spill] sm:$0xff]  ;;  %v4649_v29 = vld [vmem:[#allocation2 + $0x30] sm:$0xff]  ;;  %v4652_v61 = vld [vmem:[#allocation2 + $0x38] sm:$0xff] }
 0x123   : > { %v865_v39 = vsel %vm4512_vm15, %v4432_v32, %v861_v45  ;;  %vm4528_vm1 = vcmp.eq.f32.partialorder %v881_v42, 8.507059e+37  ;;  %vm892_vm6 = vweird.f32 %v4078_v15  ;;  %v911_v3 = vand.u32 2147483647, %v4084_v55  ;;  %v4642_v45 = vld [vmem:[#allocation2 + $0x28] sm:$0xff]  ;;  %5892 = vst [vmem:[#allocation29_spill] sm:$0xff] %v4649_v29  ;;  %v4655_v17 = vld [vmem:[#allocation2 + $0x40] sm:$0xff] }
 0x124   : > { %v880_v20 = vsel %vm4524_vm11, %v3142_v6, %v876_v54  ;;  %v891_v23 = vadd.f32 %v3144_v26, %v890_v27  ;;  %v904_v9 = vsub.f32 1.0, %v903_v18  ;;  %v884_v32 = vor.u32 1.1754944e-38, %v883_v33  ;;  %vm894_vm2 = vmor %vm892_vm6, %vm893_vm0  ;;  %5891 = vst [vmem:[#allocation28_spill] sm:$0xff] %v4642_v45  ;;  %v4667_v33 = vld [vmem:[#allocation2 + $0x60] sm:$0xff]  ;;  %v4682_v27 = vld [vmem:[#allocation2 + $0x88] sm:$0xff] }
 0x125   : > { %vm897_vm9 = vcmp.eq.f32.partialorder %v896_v0, 8.507059e+37  ;;  %v899_v14 = vor.u32 1.1754944e-38, %v898_v56  ;;  %v913_v5 = vand.u32 2147483648, %v4084_v55  ;;  %v870_v57 = vsel %vm4484_vm7, %v869_v37, %v865_v39  ;;  %v4630_v37 = vld [vmem:[#allocation2 + $0x8] sm:$0xff]  ;;  %5893 = vst [vmem:[#allocation30_spill] sm:$0xff] %v4652_v61  ;;  %v4673_v56 = vld [vmem:[#allocation2 + $0x70] sm:$0xff] }
 0x126   : > { %v895_v10 = vsel %vm894_vm2, %v3144_v26, %v891_v23  ;;  %v905_v24 = vmul.f32 %v3146_v50, %v904_v9  ;;  %vm908_vm3 = vweird.f32 %v3146_v50  ;;  %v856_v15 = vmul.f32 %v855_v63, %v3964_v51  ;;  %5894 = vst [vmem:[#allocation31_spill] sm:$0xff] %v4655_v17  ;;  %v4670_v0 = vld [vmem:[#allocation2 + $0x68] sm:$0xff]  ;;  %v4679_v54 = vld [vmem:[#allocation2 + $0x80] sm:$0xff] }
 0x127   : > { %v885_v59 = vsel %vm4528_vm1, %v884_v32, %v880_v20  ;;  %v900_v22 = vsel %vm897_vm9, %v899_v14, %v895_v10  ;;  %vm907_vm4 = vweird.f32 %v4084_v55  ;;  %vm912_vm13 = vcmp.eq.f32.partialorder %v911_v3, 8.507059e+37  ;;  %5898 = vst [vmem:[#allocation35_spill] sm:$0xff] %v4667_v33 }
 0x128   : > { %v906_v46 = vadd.f32 %v3146_v50, %v905_v24  ;;  %v4546_v6 = vsel %vm922_vm5, 0.0, %v4246_v1  ;;  %v4551_v7 = vsel %vm922_vm5, 0.0, %v4249_v43  ;;  %v871_v51 = vmul.f32 %v870_v57, %v3972_v35  ;;  %vm909_vm7 = vmor %vm907_vm4, %vm908_vm3  ;;  %5899 = vst [vmem:[#allocation36_spill] sm:$0xff] %v4670_v0 }
 0x129   : > { %v914_v31 = vor.u32 1.1754944e-38, %v913_v5  ;;  %v4557_v55 = vsel %vm922_vm5, 0.0, %v4254_v28  ;;  %v4562_v40 = vsel %vm922_vm5, 0.0, %v4267_v30  ;;  %v886_v1 = vmul.f32 %v885_v59, %v3976_v13  ;;  %5900 = vst [vmem:[#allocation37_spill] sm:$0xff] %v4673_v56 }
 0x12a   : > { %v901_v36 = vmul.f32 %v900_v22, %v5886_v48  ;;  %v910_v43 = vsel %vm909_vm7, %v3146_v50, %v906_v46  ;;  %v4569_v35 = vsel %vm922_vm5, 0.0, %v4270_v38  ;;  %v4574_v28 = vsel %vm922_vm5, 0.0, %v4290_v41  ;;  %v4658_v50 = vld [vmem:[#allocation2 + $0x48] sm:$0xff]  ;;  %5902 = vst [vmem:[#allocation39_spill] sm:$0xff] %v4679_v54 }
 0x12b   : > { %v915_v26 = vsel %vm912_vm13, %v914_v31, %v910_v43  ;;  %v4579_v30 = vsel %vm922_vm5, 0.0, %v4315_v47  ;;  %v4584_v13 = vsel %vm922_vm5, 0.0, %v4435_v21  ;;  %v4590_v38 = vsel %vm922_vm5, 0.0, %v4438_v49  ;;  %5895 = vst [vmem:[#allocation32_spill] sm:$0xff] %v4658_v50 }
 0x12c   : > { %5887 = vst [vmem:[#allocation25_spill] sm:$0xff] %v4579_v30  ;;  %v916_v53 = vmul.f32 %v915_v26, %v5888_v44  ;;  %v4595_v41 = vsel %vm922_vm5, 0.0, %v4451_v52  ;;  %v4600_v47 = vsel %vm922_vm5, 0.0, %v4474_v19  ;;  %v4605_v21 = vsel %vm922_vm5, 0.0, %v4481_v62 }
 0x12d   : > { %5889 = vst [vmem:[#allocation26_spill] sm:$0xff] %v4595_v41  ;;  %v4609_v12 = vsel %vm922_vm5, 0.0, %v841_v2  ;;  %v4613_v49 = vsel %vm922_vm5, 0.0, %v856_v15  ;;  %v4617_v52 = vsel %vm922_vm5, 0.0, %v871_v51  ;;  %v4621_v19 = vsel %vm922_vm5, 0.0, %v886_v1  ;;  %v4661_v2 = vld [vmem:[#allocation2 + $0x50] sm:$0xff] }
 0x12e   : > { %5890 = vst [vmem:[#allocation27_spill] sm:$0xff] %v4600_v47  ;;  %v4625_v62 = vsel %vm922_vm5, 0.0, %v901_v36  ;;  %vm5653_vm8 = vcmp.gt.f32.partialorder %v4627_v60, 0.0  ;;  %vm5652_vm10 = vcmp.gt.f32.partialorder %v4630_v37, 0.0  ;;  %vm5651_vm12 = vcmp.gt.f32.partialorder %v4633_v16, 0.0 }
 0x12f   : > { %vm5650_vm14 = vcmp.gt.f32.partialorder %v4636_v8, 0.0  ;;  %vm5649_vm15 = vcmp.gt.f32.partialorder %v4639_v4, 0.0  ;;  %vm5629_vm0 = vcmp.gt.f32.partialorder %v4642_v45, 0.0  ;;  %v4647_v42 = vsel %vm922_vm5, 0.0, %v916_v53  ;;  %5896 = vst [vmem:[#allocation33_spill] sm:$0xff] %v4661_v2 }
 0x130   : > { %vm5630_vm11 = vcmp.gt.f32.partialorder %v4649_v29, 0.0  ;;  %vm5648_vm1 = vcmp.gt.f32.partialorder %v4652_v61, 0.0  ;;  %vm5647_vm6 = vcmp.gt.f32.partialorder %v4655_v17, 0.0  ;;  %vm5646_vm2 = vcmp.gt.f32.partialorder %v4658_v50, 0.0  ;;  %5903 = vst [vmem:[#allocation40_spill] sm:$0xff] %v4682_v27 }
 0x131   : > { %vm5645_vm5 = vcmp.gt.f32.partialorder %v4661_v2, 0.0  ;;  %vm5644_vm4 = vcmp.gt.f32.partialorder %v4670_v0, 0.0  ;;  %vm5643_vm13 = vcmp.gt.f32.partialorder %v4673_v56, 0.0  ;;  %vm5642_vm7 = vcmp.gt.f32.partialorder %v4676_v34, 0.0 }
 0x132   : > { %vm5641_vm9 = vcmp.gt.f32.partialorder %v4679_v54, 0.0  ;;  %vm5640_vm3 = vcmp.gt.f32.partialorder %v4682_v27, 0.0  ;;  %v5904_v18 = vmov 0   ;;  %v941_v27 = vrot.slane %v4546_v6, 4 }
 0x133   : > { %v1321_v63 = vsel %vm5653_vm8, 1, %v5904_v18  ;;  %v1322_v39 = vsel %vm5652_vm10, 1, %v5904_v18  ;;  %v1323_v25 = vsel %vm5651_vm12, 1, %v5904_v18  ;;  %v1324_v11 = vsel %vm5650_vm14, 1, %v5904_v18 }
 0x134   : > { %v1325_v20 = vsel %vm5649_vm15, 1, %v5904_v18  ;;  %v1326_v23 = vsel %vm5629_vm0, 1, %v5904_v18  ;;  %v1327_v9 = vsel %vm5630_vm11, 1, %v5904_v18  ;;  %v1328_v3 = vsel %vm5648_vm1, 1, %v5904_v18 }
 0x135   : > { %v1329_v32 = vsel %vm5647_vm6, 1, %v5904_v18  ;;  %v1330_v14 = vsel %vm5646_vm2, 1, %v5904_v18  ;;  %v1331_v5 = vsel %vm5645_vm5, 1, %v5904_v18  ;;  %vm5905_vm0 = vcmp.gt.f32.partialorder %v4664_v58, 0.0 }
 0x136   : > { %v1332_v57 = vsel %vm5905_vm0, 1, %v5904_v18  ;;  %vm5906_vm11 = vcmp.gt.f32.partialorder %v4667_v33, 0.0  ;;  %v1334_v24 = vsel %vm5644_vm4, 1, %v5904_v18  ;;  %v1335_v15 = vsel %vm5643_vm13, 1, %v5904_v18 }
 0x137   : > { %v1333_v10 = vsel %vm5906_vm11, 1, %v5904_v18  ;;  %v1336_v59 = vsel %vm5642_vm7, 1, %v5904_v18  ;;  %v1337_v22 = vsel %vm5641_vm9, 1, %v5904_v18  ;;  %v1338_v46 = vsel %vm5640_vm3, 1, %v5904_v18 }
 0x138   : > { %v1339_v51 = vperm.slane %v1321_v63, 5  ;;  %v1340_v31 = vperm.slane %v1322_v39, 5  ;;  %v1341_v1 = vperm.slane %v1323_v25, 5  ;;  %v1342_v48 = vperm.slane %v1324_v11, 5  ;;  %v289_v11 = vld [vmem:[#allocation2 + $0xc0] sm:$0xff] }
 0x139   : > { %v1343_v36 = vperm.slane %v1325_v20, 5  ;;  %v1344_v43 = vperm.slane %v1326_v23, 5  ;;  %v1345_v26 = vperm.slane %v1327_v9, 5  ;;  %v1346_v44 = vperm.slane %v1328_v3, 5 }
 0x13a   : > { %v1347_v53 = vperm.slane %v1329_v32, 5  ;;  %v1348_v56 = vperm.slane %v1330_v14, 5  ;;  %v1349_v34 = vperm.slane %v1331_v5, 5  ;;  %v1350_v0 = vperm.slane %v1332_v57, 5 }
 0x13b   : > { %v1351_v33 = vperm.slane %v1333_v10, 5  ;;  %v1352_v58 = vperm.slane %v1334_v24, 5  ;;  %v1353_v54 = vperm.slane %v1335_v15, 5  ;;  %v1354_v2 = vperm.slane %v1336_v59, 5 }
 0x13c   : > { %v1355_v50 = vperm.slane %v1337_v22, 5  ;;  %v1356_v17 = vperm.slane %v1338_v46, 5  ;;  %vm4739_vm0 = vcmp.eq.s32.totalorder %v1339_v51, 1  ;;  %vm4743_vm11 = vcmp.eq.s32.totalorder %v1340_v31, 1 }
 0x13d   : > { %vm4747_vm3 = vcmp.eq.s32.totalorder %v1341_v1, 1  ;;  %v5911_v39 = vmov 0  ;;  %vm4751_vm9 = vcmp.eq.s32.totalorder %v1342_v48, 1  ;;  %vm4755_vm7 = vcmp.eq.s32.totalorder %v1343_v36, 1 }
 0x13e   : > { %v5912_v39 = vsel %vm4747_vm3, 4294967295, %v5911_v39  ;;  %vm4759_vm13 = vcmp.eq.s32.totalorder %v1344_v43, 1  ;;  %v5917_v20 = vmov 0  ;;  %vm4763_vm4 = vcmp.eq.s32.totalorder %v1345_v26, 1 }
 0x13f   : > { %v5918_v20 = vsel %vm4759_vm13, 4294967295, %v5917_v20  ;;  %v5920_v23 = vmov 0  ;;  %vm4767_vm5 = vcmp.eq.s32.totalorder %v1346_v44, 1  ;;  %v5923_v9 = vmov 0 }
 0x140   : > { %5919 = vst [vmem:[#allocation12_spill] sm:$0xff] %v5918_v20  ;;  %v5921_v23 = vsel %vm4763_vm4, 4294967295, %v5920_v23  ;;  %v5924_v9 = vsel %vm4767_vm5, 4294967295, %v5923_v9  ;;  %vm4771_vm2 = vcmp.eq.s32.totalorder %v1347_v53, 1  ;;  %v5926_v3 = vmov 0 }
 0x141   : > { %5922 = vst [vmem:[#allocation13_spill] sm:$0xff] %v5921_v23  ;;  %v5927_v3 = vsel %vm4771_vm2, 4294967295, %v5926_v3  ;;  %vm4775_vm6 = vcmp.eq.s32.totalorder %v1348_v56, 1  ;;  %v5929_v32 = vmov 0  ;;  %vm4779_vm1 = vcmp.eq.s32.totalorder %v1349_v34, 1 }
 0x142   : > { %5925 = vst [vmem:[#allocation14_spill] sm:$0xff] %v5924_v9  ;;  %v5930_v32 = vsel %vm4775_vm6, 4294967295, %v5929_v32  ;;  %v5932_v14 = vmov 0  ;;  %vm4783_vm15 = vcmp.eq.s32.totalorder %v1350_v0, 1  ;;  %v5935_v5 = vmov 0 }
 0x143   : > { %5928 = vst [vmem:[#allocation15_spill] sm:$0xff] %v5927_v3  ;;  %v5933_v14 = vsel %vm4779_vm1, 4294967295, %v5932_v14  ;;  %v5936_v5 = vsel %vm4783_vm15, 4294967295, %v5935_v5  ;;  %vm4787_vm14 = vcmp.eq.s32.totalorder %v1351_v33, 1  ;;  %v5938_v57 = vmov 0 }
 0x144   : > { %5931 = vst [vmem:[#allocation16_spill] sm:$0xff] %v5930_v32  ;;  %v5939_v57 = vsel %vm4787_vm14, 4294967295, %v5938_v57  ;;  %vm4791_vm12 = vcmp.eq.s32.totalorder %v1352_v58, 1  ;;  %v5941_v10 = vmov 0  ;;  %vm4795_vm10 = vcmp.eq.s32.totalorder %v1353_v54, 1 }
 0x145   : > { %5934 = vst [vmem:[#allocation17_spill] sm:$0xff] %v5933_v14  ;;  %v5942_v10 = vsel %vm4791_vm12, 4294967295, %v5941_v10  ;;  %v5944_v56 = vmov 0  ;;  %vm4799_vm8 = vcmp.eq.s32.totalorder %v1354_v2, 1  ;;  %v5947_v34 = vmov 0 }
 0x146   : > { %5937 = vst [vmem:[#allocation18_spill] sm:$0xff] %v5936_v5  ;;  %v5945_v56 = vsel %vm4795_vm10, 4294967295, %v5944_v56  ;;  %v5948_v34 = vsel %vm4799_vm8, 4294967295, %v5947_v34  ;;  %vm4803_vm1 = vcmp.eq.s32.totalorder %v1355_v50, 1  ;;  %v5950_v0 = vmov 0 }
 0x147   : > { %5940 = vst [vmem:[#allocation19_spill] sm:$0xff] %v5939_v57  ;;  %v5951_v0 = vsel %vm4803_vm1, 4294967295, %v5950_v0  ;;  %v1375_v33 = vsel %vm4739_vm0, %v4546_v6, -1e+30  ;;  %v1376_v58 = vsel %vm4743_vm11, %v4551_v7, -1e+30 }
 0x148   : > { %5943 = vst [vmem:[#allocation20_spill] sm:$0xff] %v5942_v10  ;;  %v1377_v54 = vsel %vm4747_vm3, %v4557_v55, -1e+30  ;;  %v1379_v2 = vsel %vm4755_vm7, %v4569_v35, -1e+30  ;;  %vm4831_vm3 = vcmp.eq.s32.totalorder %v1356_v17, 1 }
 0x149   : > { %5946 = vst [vmem:[#allocation21_spill] sm:$0xff] %v5945_v56  ;;  %v1380_v50 = vsel %vm4759_vm13, %v4574_v28, -1e+30  ;;  %v1378_v24 = vsel %vm4751_vm9, %v4562_v40, -1e+30  ;;  %v1393_v22 = vmax.f32 %v1375_v33, %v1379_v2  ;;  %v5953_v46 = vmov 0 }
 0x14a   : > { %5949 = vst [vmem:[#allocation22_spill] sm:$0xff] %v5948_v34  ;;  %v1381_v15 = vsel %vm4763_vm4, %v4579_v30, -1e+30  ;;  %v1382_v59 = vsel %vm4767_vm5, %v4584_v13, -1e+30  ;;  %v5954_v46 = vsel %vm4831_vm3, 4294967295, %v5953_v46  ;;  %v1394_v1 = vmax.f32 %v1376_v58, %v1380_v50 }
 0x14b   : > { %5952 = vst [vmem:[#allocation23_spill] sm:$0xff] %v5951_v0  ;;  %v1383_v51 = vsel %vm4771_vm2, %v4590_v38, -1e+30  ;;  %v1384_v31 = vsel %vm4775_vm6, %v4595_v41, -1e+30  ;;  %vm5956_vm4 = vnez %v5933_v14  ;;  %v1395_v43 = vmax.f32 %v1377_v54, %v1381_v15 }
 0x14c   : > { %5955 = vst [vmem:[#allocation24_spill] sm:$0xff] %v5954_v46  ;;  %v1385_v48 = vsel %vm5956_vm4, %v4600_v47, -1e+30  ;;  %v1386_v17 = vsel %vm4783_vm15, %v4605_v21, -1e+30  ;;  %v1396_v33 = vmax.f32 %v1378_v24, %v1382_v59  ;;  %v1397_v58 = vmax.f32 %v1393_v22, %v1383_v51 }
 0x14d   : > { %v1387_v36 = vsel %vm4787_vm14, %v4609_v12, -1e+30  ;;  %v1388_v26 = vsel %vm4791_vm12, %v4613_v49, -1e+30  ;;  %v1389_v44 = vsel %vm4795_vm10, %v4617_v52, -1e+30  ;;  %v1398_v2 = vmax.f32 %v1394_v1, %v1384_v31 }
 0x14e   : > { %v1390_v53 = vsel %vm4799_vm8, %v4621_v19, -1e+30  ;;  %v1399_v50 = vmax.f32 %v1395_v43, %v1385_v48  ;;  %v1391_v54 = vsel %vm4803_vm1, %v4625_v62, -1e+30  ;;  %v1392_v15 = vsel %vm4831_vm3, %v4647_v42, -1e+30 }
 0x14f   : > { %v1400_v56 = vmax.f32 %v1396_v33, %v1386_v17  ;;  %v947_v10 = vrot.slane %v4551_v7, 4  ;;  %v1401_v57 = vmax.f32 %v1397_v58, %v1387_v36  ;;  %v1402_v34 = vmax.f32 %v1398_v2, %v1388_v26 }
 0x150   : > { %v1403_v5 = vmax.f32 %v1399_v50, %v1389_v44  ;;  %v942_v24 = vmax.f32 %v4546_v6, %v941_v27  ;;  %v953_v51 = vrot.slane %v4557_v55, 4  ;;  %v959_v31 = vrot.slane %v4562_v40, 4 }
 0x151   : > { %v1404_v59 = vmax.f32 %v1400_v56, %v1390_v53  ;;  %v948_v22 = vmax.f32 %v4551_v7, %v947_v10  ;;  %v1405_v1 = vmax.f32 %v1401_v57, %v1391_v54  ;;  %v1406_v48 = vmax.f32 %v1402_v34, %v1392_v15 }
 0x152   : > { %v943_v43 = vrot.slane %v942_v24, 2  ;;  %v1049_v46 = vlaneseq  ;;  %v954_v17 = vmax.f32 %v4557_v55, %v953_v51  ;;  %v960_v36 = vmax.f32 %v4562_v40, %v959_v31 }
 0x153   : > { %v949_v0 = vrot.slane %v948_v22, 2  ;;  %v1407_v26 = vmax.f32 %v1405_v1, %v1406_v48  ;;  %v1408_v44 = vmax.f32 %v1403_v5, %v1404_v59  ;;  %v965_v27 = vrot.slane %v4569_v35, 4 }
 0x154   : > { %v944_v33 = vmax.f32 %v942_v24, %v943_v43  ;;  %v955_v10 = vrot.slane %v954_v17, 2  ;;  %v961_v53 = vrot.slane %v960_v36, 2  ;;  %v971_v58 = vrot.slane %v4574_v28, 4 }
 0x155   : > { %v950_v56 = vmax.f32 %v948_v22, %v949_v0  ;;  %v1409_v2 = vmax.f32 %v1407_v26, %v1408_v44  ;;  %v966_v34 = vmax.f32 %v4569_v35, %v965_v27  ;;  %v4876_v50 = vshrl.u32 %v1049_v46, 7 }
 0x156   : > { %v945_v57 = vrot.slane %v944_v33, 1  ;;  %v956_v15 = vmax.f32 %v954_v17, %v955_v10  ;;  %v962_v51 = vmax.f32 %v960_v36, %v961_v53  ;;  %v1001_v5 = vrot.slane %v4600_v47, 4 }
 0x157   : > { %v951_v54 = vrot.slane %v950_v56, 1  ;;  %1410 = vmax.xlane.f32.xlu1 %v1409_v2  ;;  %v967_v0 = vrot.slane %v966_v34, 2  ;;  %v972_v48 = vmax.f32 %v4574_v28, %v971_v58  ;;  %v977_v17 = vrot.slane %v4579_v30, 4 }
 0x158   : > { %v4880_v24 = vmax.f32 %v944_v33, %v945_v57  ;;  %v957_v22 = vrot.slane %v956_v15, 1  ;;  %v963_v1 = vrot.slane %v962_v51, 1  ;;  %v4900_v53 = vmax.f32 %v4600_v47, %v1001_v5 }
 0x159   : > { %v4882_v59 = vmax.f32 %v950_v56, %v951_v54  ;;  %v968_v43 = vmax.f32 %v966_v34, %v967_v0  ;;  %v973_v2 = vrot.slane %v972_v48, 2  ;;  %v978_v34 = vmax.f32 %v4579_v30, %v977_v17 }
 0x15a   : > { %vm1051_vm3 = vcmp.eq.f32.partialorder %v4546_v6, %v4880_v24  ;;  %v4895_v56 = vmax.f32 %v956_v15, %v957_v22  ;;  %v4897_v10 = vmax.f32 %v962_v51, %v963_v1  ;;  %v983_v36 = vrot.slane %v4584_v13, 4 }
 0x15b   : > { %v1069_v44 = vsel %vm1051_vm3, %v4876_v50, 8  ;;  %vm1052_vm1 = vcmp.eq.f32.partialorder %v4551_v7, %v4882_v59  ;;  %v969_v57 = vrot.slane %v968_v43, 1  ;;  %v974_v46 = vmax.f32 %v972_v48, %v973_v2 }
 0x15c   : > { %v1087_v33 = vrot.slane %v1069_v44, 4  ;;  %v1070_v27 = vsel %vm1052_vm1, %v4876_v50, 8  ;;  %vm1053_vm10 = vcmp.eq.f32.partialorder %v4557_v55, %v4895_v56  ;;  %vm1054_vm1 = vcmp.eq.f32.partialorder %v4562_v40, %v4897_v10 }
 0x15d   : > { %v1096_v58 = vrot.slane %v1070_v27, 4  ;;  %v1071_v0 = vsel %vm1053_vm10, %v4876_v50, 8  ;;  %v1072_v22 = vsel %vm1054_vm1, %v4876_v50, 8  ;;  %v4910_v17 = vmax.f32 %v968_v43, %v969_v57 }
 0x15e   : > { %vm1088_vm8 = vcmp.lt.s32.totalorder %v1069_v44, %v1087_v33  ;;  %v1105_v5 = vrot.slane %v1071_v0, 4  ;;  %v1114_v26 = vrot.slane %v1072_v22, 4  ;;  %v975_v48 = vrot.slane %v974_v46, 1 }
 0x15f   : > { %v1089_v54 = vsel %vm1088_vm8, %v1069_v44, %v1087_v33  ;;  %vm1097_vm3 = vcmp.lt.s32.totalorder %v1070_v27, %v1096_v58  ;;  %v979_v44 = vrot.slane %v978_v34, 2 }
 0x160   : > { %v1090_v15 = vrot.slane %v1089_v54, 2  ;;  %v1098_v51 = vsel %vm1097_vm3, %v1070_v27, %v1096_v58  ;;  %vm1106_vm15 = vcmp.lt.s32.totalorder %v1071_v0, %v1105_v5  ;;  %vm1115_vm10 = vcmp.lt.s32.totalorder %v1072_v22, %v1114_v26 }
 0x161   : > { %v1099_v1 = vrot.slane %v1098_v51, 2  ;;  %v1107_v31 = vsel %vm1106_vm15, %v1071_v0, %v1105_v5  ;;  %v1116_v32 = vsel %vm1115_vm10, %v1072_v22, %v1114_v26  ;;  %vm1055_vm3 = vcmp.eq.f32.partialorder %v4569_v35, %v4910_v17  ;;  %v4917_v0 = vld [vmem:[%s234_s18] sm:$0xff] }
 0x162   : > { %vm1091_vm14 = vcmp.lt.s32.totalorder %v1089_v54, %v1090_v15  ;;  %v1108_v58 = vrot.slane %v1107_v31, 2  ;;  %v1117_v61 = vrot.slane %v1116_v32, 2  ;;  %v1073_v43 = vsel %vm1055_vm3, %v4876_v50, 8 }
 0x163   : > { %v1092_v33 = vsel %vm1091_vm14, %v1089_v54, %v1090_v15  ;;  %vm1100_vm8 = vcmp.lt.s32.totalorder %v1098_v51, %v1099_v1  ;;  %v980_v2 = vmax.f32 %v978_v34, %v979_v44  ;;  %v5676_v5 = vmov 1.0  }
 0x164   : > { %v1093_v14 = vrot.slane %v1092_v33, 1  ;;  %v1101_v27 = vsel %vm1100_vm8, %v1098_v51, %v1099_v1  ;;  %vm1109_vm12 = vcmp.lt.s32.totalorder %v1107_v31, %v1108_v58  ;;  %vm1118_vm15 = vcmp.lt.s32.totalorder %v1116_v32, %v1117_v61 }
 0x165   : > { %v1102_v3 = vrot.slane %v1101_v27, 1  ;;  %v1110_v54 = vsel %vm1109_vm12, %v1107_v31, %v1108_v58  ;;  %v1119_v51 = vsel %vm1118_vm15, %v1116_v32, %v1117_v61  ;;  %v1123_v34 = vrot.slane %v1073_v43, 4 }
 0x166   : > { %vm1094_vm1 = vcmp.lt.s32.totalorder %v1092_v33, %v1093_v14  ;;  %v1111_v15 = vrot.slane %v1110_v54, 1  ;;  %v1120_v22 = vrot.slane %v1119_v51, 1  ;;  %vm5957_vm3 = vcmask 64512  }
 0x167   : > { %v1095_v57 = vsel %vm1094_vm1, %v1092_v33, %v1093_v14  ;;  %vm1103_vm14 = vcmp.lt.s32.totalorder %v1101_v27, %v1102_v3  ;;  %v4922_v14 = vmax.f32 %v974_v46, %v975_v48  ;;  %v981_v31 = vrot.slane %v980_v2, 1 }
 0x168   : > { %vm1249_vm8 = vcmp.eq.s32.totalorder %v4876_v50, %v1095_v57  ;;  %v1104_v26 = vsel %vm1103_vm14, %v1101_v27, %v1102_v3  ;;  %vm1112_vm12 = vcmp.lt.s32.totalorder %v1110_v54, %v1111_v15  ;;  %v984_v3 = vmax.f32 %v4584_v13, %v983_v36  ;;  %vm5959_vm14 = vmmov %vm5957_vm3 }
 0x169   : > { %2974 = vmatpush.msk.msra.mxu0 %vm1249_vm8, %v5676_v5  ;;  %vm1250_vm10 = vcmp.eq.s32.totalorder %v4876_v50, %v1104_v26  ;;  %v5958_v61 = vrot.slane %v4590_v38, 4  ;;  %v1113_v1 = vsel %vm1112_vm12, %v1110_v54, %v1111_v15  ;;  %vm1121_vm1 = vcmp.lt.s32.totalorder %v1119_v51, %v1120_v22 }
 0x16a   : > { %2976 = vmatpush.msk.msra.mxu1 %vm1250_vm10, %v5676_v5  ;;  %2975 = vmatmul.msk.f32.vlgmr.msra.gmra.mxu0 %vm5957_vm3, %v4917_v0  ;;  %vm1124_vm15 = vcmp.lt.s32.totalorder %v1073_v43, %v1123_v34  ;;  %vm1056_vm8 = vcmp.eq.f32.partialorder %v4574_v28, %v4922_v14  ;;  %vm1251_vm10 = vcmp.eq.s32.totalorder %v4876_v50, %v1113_v1  ;;  %v1019_v36 = vrot.slane %v4613_v49, 4 }
 0x16b   : > { %v990_v32 = vmax.f32 %v4590_v38, %v5958_v61  ;;  %2977 = vmatmul.msk.f32.vlgmr.msra.gmra.mxu1 %vm5959_vm14, %v4917_v0  ;;  %v1122_v46 = vsel %vm1121_vm1, %v1119_v51, %v1120_v22  ;;  %v1125_v44 = vsel %vm1124_vm15, %v1073_v43, %v1123_v34  ;;  %v1074_v33 = vsel %vm1056_vm8, %v4876_v50, 8  ;;  %2978 = vmatpush.msk.msra.mxu2 %vm1251_vm10, %v5676_v5  ;;  %vm5962_vm1 = vmmov %vm5957_vm3 }
 0x16c   : > { %vm1252_vm12 = vcmp.eq.s32.totalorder %v4876_v50, %v1122_v46  ;;  %v1126_v27 = vrot.slane %v1125_v44, 2  ;;  %v1132_v58 = vrot.slane %v1074_v33, 4  ;;  %v5960_v48 = vrot.slane %v4605_v21, 4  ;;  %2979 = vmatmul.msk.f32.vlgmr.msra.gmra.mxu2 %vm5957_vm3, %v4917_v0 }
 0x16d   : > { %2980 = vmatpush.msk.msra.mxu3 %vm1252_vm12, %v5676_v5  ;;  %v4946_v43 = vmax.f32 %v980_v2, %v981_v31  ;;  %v985_v54 = vrot.slane %v984_v3, 2  ;;  %v991_v26 = vrot.slane %v990_v32, 2  ;;  %v5963_v15 = vrot.slane %v4595_v41, 4 }
 0x16e   : > { %v1008_v57 = vmax.f32 %v4605_v21, %v5960_v48  ;;  %2981 = vmatmul.msk.f32.vlgmr.msra.gmra.mxu3 %vm5962_vm1, %v4917_v0  ;;  %vm1127_vm14 = vcmp.lt.s32.totalorder %v1125_v44, %v1126_v27  ;;  %vm1133_vm15 = vcmp.lt.s32.totalorder %v1074_v33, %v1132_v58  ;;  %v1003_v22 = vrot.slane %v4900_v53, 2 }
 0x16f   : > { %5961 = vst [vmem:[#allocation41_spill] sm:$0xff] %v4946_v43  ;;  %v996_v51 = vmax.f32 %v4595_v41, %v5963_v15  ;;  %v5964_v34 = vrot.slane %v4609_v12, 4  ;;  %v1128_v2 = vsel %vm1127_vm14, %v1125_v44, %v1126_v27  ;;  %v1134_v31 = vsel %vm1133_vm15, %v1074_v33, %v1132_v58 }
 0x170   : > { %vm1057_vm8 = vcmp.eq.f32.partialorder %v4579_v30, %v4946_v43  ;;  %v1025_v1 = vrot.slane %v4617_v52, 4  ;;  %v1129_v46 = vrot.slane %v1128_v2, 1  ;;  %v1135_v48 = vrot.slane %v1134_v31, 2 }
 0x171   : > { %v4957_v61 = vmax.f32 %v4609_v12, %v5964_v34  ;;  %v1075_v5 = vsel %vm1057_vm8, %v4876_v50, 8  ;;  %v986_v15 = vmax.f32 %v984_v3, %v985_v54  ;;  %v992_v9 = vmax.f32 %v990_v32, %v991_v26 }
 0x172   : > { %v1141_v29 = vrot.slane %v1075_v5, 4  ;;  %v997_v45 = vrot.slane %v996_v51, 2  ;;  %vm1130_vm10 = vcmp.lt.s32.totalorder %v1128_v2, %v1129_v46  ;;  %vm1136_vm12 = vcmp.lt.s32.totalorder %v1134_v31, %v1135_v48 }
 0x173   : > { %v1004_v34 = vmax.f32 %v4900_v53, %v1003_v22  ;;  %v1009_v23 = vrot.slane %v1008_v57, 2  ;;  %v1131_v44 = vsel %vm1130_vm10, %v1128_v2, %v1129_v46  ;;  %v1137_v33 = vsel %vm1136_vm12, %v1134_v31, %v1135_v48 }
 0x174   : > { %vm1142_vm3 = vcmp.lt.s32.totalorder %v1075_v5, %v1141_v29  ;;  %v987_v27 = vrot.slane %v986_v15, 1  ;;  %vm1253_vm1 = vcmp.eq.s32.totalorder %v4876_v50, %v1131_v44  ;;  %v1138_v58 = vrot.slane %v1137_v33, 1 }
 0x175   : > { %v1143_v43 = vsel %vm1142_vm3, %v1075_v5, %v1141_v29  ;;  %v993_v20 = vrot.slane %v992_v9, 1  ;;  %v4966_v30 = vmax.f32 %v4613_v49, %v1019_v36  ;;  %v1031_v3 = vrot.slane %v4621_v19, 4 }
 0x176   : > { %v5965_v32 = vmov 1.0   ;;  %v1144_v54 = vrot.slane %v1143_v43, 2  ;;  %v4970_v26 = vmax.f32 %v986_v15, %v987_v27  ;;  %vm1139_vm14 = vcmp.lt.s32.totalorder %v1137_v33, %v1138_v58 }
 0x177   : > { %2982 = vmatpush.msk.msrb.mxu0 %vm1253_vm1, %v5965_v32  ;;  %v4972_v53 = vmax.f32 %v992_v9, %v993_v20  ;;  %v998_v22 = vmax.f32 %v996_v51, %v997_v45  ;;  %v1005_v2 = vrot.slane %v1004_v34, 1  ;;  %vm5967_vm15 = vcmask 64512  }
 0x178   : > { %2983 = vmatmul.msk.f32.vlgmr.msrb.gmra.mxu0 %vm5967_vm15, %v4917_v0  ;;  %v1140_v29 = vsel %vm1139_vm14, %v1137_v33, %v1138_v58  ;;  %vm1145_vm8 = vcmp.lt.s32.totalorder %v1143_v43, %v1144_v54  ;;  %vm1058_vm10 = vcmp.eq.f32.partialorder %v4584_v13, %v4970_v26  ;;  %v1010_v5 = vmax.f32 %v1008_v57, %v1009_v23  ;;  %vm5969_vm1 = vmmov %vm5967_vm15 }
 0x179   : > { %5966 = vst [vmem:[#allocation42_spill] sm:$0xff] %v4972_v53  ;;  %v4979_v36 = vmax.f32 %v4617_v52, %v1025_v1  ;;  %vm1254_vm12 = vcmp.eq.s32.totalorder %v4876_v50, %v1140_v29  ;;  %v1146_v31 = vsel %vm1145_vm8, %v1143_v43, %v1144_v54  ;;  %v1076_v20 = vsel %vm1058_vm10, %v4876_v50, 8 }
 0x17a   : > { %v1037_v45 = vrot.slane %v4625_v62, 4  ;;  %2984 = vmatpush.msk.msrb.mxu1 %vm1254_vm12, %v5965_v32  ;;  %v1147_v9 = vrot.slane %v1146_v31, 1  ;;  %v1150_v51 = vrot.slane %v1076_v20, 4  ;;  %vm1059_vm3 = vcmp.eq.f32.partialorder %v4590_v38, %v4972_v53 }
 0x17b   : > { %v4988_v46 = vmax.f32 %v4621_v19, %v1031_v3  ;;  %v1077_v23 = vsel %vm1059_vm3, %v4876_v50, 8  ;;  %v999_v57 = vrot.slane %v998_v22, 1  ;;  %v4991_v1 = vmax.f32 %v1004_v34, %v1005_v2  ;;  %2985 = vmatmul.msk.f32.vlgmr.msrb.gmra.mxu1 %vm5969_vm1, %v4917_v0 }
 0x17c   : > { %vm1148_vm14 = vcmp.lt.s32.totalorder %v1146_v31, %v1147_v9  ;;  %vm1151_vm15 = vcmp.lt.s32.totalorder %v1076_v20, %v1150_v51  ;;  %v1159_v43 = vrot.slane %v1077_v23, 4  ;;  %v1011_v48 = vrot.slane %v1010_v5, 1 }
 0x17d   : > { %5968 = vst [vmem:[#allocation43_spill] sm:$0xff] %v4991_v1  ;;  %v1149_v15 = vsel %vm1148_vm14, %v1146_v31, %v1147_v9  ;;  %v1152_v44 = vsel %vm1151_vm15, %v1076_v20, %v1150_v51  ;;  %v4995_v33 = vmax.f32 %v998_v22, %v999_v57  ;;  %vm1061_vm8 = vcmp.eq.f32.partialorder %v4600_v47, %v4991_v1 }
 0x17e   : > { %vm1255_vm10 = vcmp.eq.s32.totalorder %v4876_v50, %v1149_v15  ;;  %v1153_v27 = vrot.slane %v1152_v44, 2  ;;  %vm1160_vm12 = vcmp.lt.s32.totalorder %v1077_v23, %v1159_v43  ;;  %v1079_v34 = vsel %vm1061_vm8, %v4876_v50, 8 }
 0x17f   : > { %5970 = vst [vmem:[#allocation44_spill] sm:$0xff] %v4995_v33  ;;  %v1027_v58 = vrot.slane %v4979_v36, 2  ;;  %v5003_v3 = vmax.f32 %v4625_v62, %v1037_v45  ;;  %2986 = vmatpush.msk.msrb.mxu2 %vm1255_vm10, %v5965_v32  ;;  %v1161_v54 = vsel %vm1160_vm12, %v1077_v23, %v1159_v43  ;;  %vm1060_vm3 = vcmp.eq.f32.partialorder %v4595_v41, %v4995_v33 }
 0x180   : > { %vm1154_vm1 = vcmp.lt.s32.totalorder %v1152_v44, %v1153_v27  ;;  %v1162_v22 = vrot.slane %v1161_v54, 2  ;;  %v1078_v2 = vsel %vm1060_vm3, %v4876_v50, 8  ;;  %v1177_v29 = vrot.slane %v1079_v34, 4 }
 0x181   : > { %vm5971_vm14 = vcmask 64512   ;;  %v1033_v31 = vrot.slane %v4988_v46, 2  ;;  %v1155_v20 = vsel %vm1154_vm1, %v1152_v44, %v1153_v27  ;;  %v1168_v9 = vrot.slane %v1078_v2, 4 }
 0x182   : > { %2987 = vmatmul.msk.f32.vlgmr.msrb.gmra.mxu2 %vm5971_vm14, %v4917_v0  ;;  %v1015_v45 = vrot.slane %v4957_v61, 2  ;;  %v1156_v51 = vrot.slane %v1155_v20, 1  ;;  %vm1163_vm15 = vcmp.lt.s32.totalorder %v1161_v54, %v1162_v22  ;;  %vm1178_vm8 = vcmp.lt.s32.totalorder %v1079_v34, %v1177_v29 }
 0x183   : > { %v5013_v23 = vmax.f32 %v1010_v5, %v1011_v48  ;;  %v1043_v57 = vrot.slane %v4647_v42, 4  ;;  %v1164_v43 = vsel %vm1163_vm15, %v1161_v54, %v1162_v22  ;;  %vm1169_vm10 = vcmp.lt.s32.totalorder %v1078_v2, %v1168_v9 }
 0x184   : > { %v1179_v15 = vsel %vm1178_vm8, %v1079_v34, %v1177_v29  ;;  %vm1157_vm12 = vcmp.lt.s32.totalorder %v1155_v20, %v1156_v51  ;;  %v1165_v1 = vrot.slane %v1164_v43, 1  ;;  %v1170_v47 = vsel %vm1169_vm10, %v1078_v2, %v1168_v9 }
 0x185   : > { %v1180_v33 = vrot.slane %v1179_v15, 2  ;;  %v1158_v41 = vsel %vm1157_vm12, %v1155_v20, %v1156_v51  ;;  %v1171_v53 = vrot.slane %v1170_v47, 2  ;;  %vm1062_vm3 = vcmp.eq.f32.partialorder %v4605_v21, %v5013_v23 }
 0x186   : > { %v1016_v44 = vmax.f32 %v4957_v61, %v1015_v45  ;;  %vm1256_vm1 = vcmp.eq.s32.totalorder %v4876_v50, %v1158_v41  ;;  %vm1166_vm14 = vcmp.lt.s32.totalorder %v1164_v43, %v1165_v1  ;;  %v1080_v5 = vsel %vm1062_vm3, %v4876_v50, 8 }
 0x187   : > { %vm1181_vm4 = vcmp.lt.s32.totalorder %v1179_v15, %v1180_v33  ;;  %2988 = vmatpush.msk.msrb.mxu3 %vm1256_vm1, %v5965_v32  ;;  %v1167_v48 = vsel %vm1166_vm14, %v1164_v43, %v1165_v1  ;;  %vm1172_vm15 = vcmp.lt.s32.totalorder %v1170_v47, %v1171_v53  ;;  %v1186_v34 = vrot.slane %v1080_v5, 4 }
 0x188   : > { %v1182_v27 = vsel %vm1181_vm4, %v1179_v15, %v1180_v33  ;;  %v1044_v54 = vmax.f32 %v4647_v42, %v1043_v57  ;;  %vm1257_vm8 = vcmp.eq.s32.totalorder %v4876_v50, %v1167_v48  ;;  %v1173_v22 = vsel %vm1172_vm15, %v1170_v47, %v1171_v53 }
 0x189   : > { %v1183_v2 = vrot.slane %v1182_v27, 1  ;;  %vm5972_vm10 = vcmask 64512   ;;  %2990 = vmatpush.msk.msra.mxu0 %vm1257_vm8, %v5965_v32  ;;  %v1174_v41 = vrot.slane %v1173_v22, 1  ;;  %vm1187_vm12 = vcmp.lt.s32.totalorder %v1080_v5, %v1186_v34 }
 0x18a   : > { %2989 = vmatmul.msk.f32.vlgmr.msrb.gmra.mxu3 %vm5972_vm10, %v4917_v0  ;;  %v1017_v61 = vrot.slane %v1016_v44, 1  ;;  %v1021_v29 = vrot.slane %v4966_v30, 2  ;;  %v1188_v1 = vsel %vm1187_vm12, %v1080_v5, %v1186_v34  ;;  %v1028_v33 = vmax.f32 %v4979_v36, %v1027_v58  ;;  %vm5973_vm4 = vmmov %vm5972_vm10 }
 0x18b   : > { %vm1184_vm3 = vcmp.lt.s32.totalorder %v1182_v27, %v1183_v2  ;;  %v1034_v20 = vmax.f32 %v4988_v46, %v1033_v31  ;;  %2991 = vmatmul.msk.f32.vlgmr.msra.gmra.mxu0 %vm5973_vm4, %v4917_v0  ;;  %vm1175_vm1 = vcmp.lt.s32.totalorder %v1173_v22, %v1174_v41  ;;  %v1189_v53 = vrot.slane %v1188_v1, 2  ;;  %vm5974_vm12 = vmmov %vm5973_vm4 }
 0x18c   : > { %v1185_v47 = vsel %vm1184_vm3, %v1182_v27, %v1183_v2  ;;  %v5032_v9 = vmax.f32 %v1016_v44, %v1017_v61  ;;  %v1176_v45 = vsel %vm1175_vm1, %v1173_v22, %v1174_v41  ;;  %v1022_v51 = vmax.f32 %v4966_v30, %v1021_v29  ;;  %vm5975_vm3 = vmmov %vm5973_vm4 }
 0x18d   : > { %vm1259_vm14 = vcmp.eq.s32.totalorder %v4876_v50, %v1185_v47  ;;  %v1029_v57 = vrot.slane %v1028_v33, 1  ;;  %v1039_v43 = vrot.slane %v5003_v3, 2  ;;  %vm1258_vm15 = vcmp.eq.s32.totalorder %v4876_v50, %v1176_v45 }
 0x18e   : > { %2994 = vmatpush.msk.msra.mxu2 %vm1259_vm14, %v5965_v32  ;;  %vm1190_vm8 = vcmp.lt.s32.totalorder %v1188_v1, %v1189_v53  ;;  %vm1063_vm10 = vcmp.eq.f32.partialorder %v4609_v12, %v5032_v9  ;;  %v1045_v36 = vrot.slane %v1044_v54, 2  ;;  %2992 = vmatpush.msk.msra.mxu1 %vm1258_vm15, %v5965_v32  ;;  %v1023_v31 = vrot.slane %v1022_v51, 1 }
 0x18f   : > { %v1191_v46 = vsel %vm1190_vm8, %v1188_v1, %v1189_v53  ;;  %v1081_v58 = vsel %vm1063_vm10, %v4876_v50, 8  ;;  %2995 = vmatmul.msk.f32.vlgmr.msra.gmra.mxu2 %vm5974_vm12, %v4917_v0  ;;  %v5045_v44 = vmax.f32 %v1028_v33, %v1029_v57  ;;  %2993 = vmatmul.msk.f32.vlgmr.msra.gmra.mxu1 %vm5975_vm3, %v4917_v0  ;;  %v1035_v48 = vrot.slane %v1034_v20, 1  ;;  %vm5976_vm12 = vmmov %vm5975_vm3 }
 0x190   : > { %v1192_v30 = vrot.slane %v1191_v46, 1  ;;  %v1195_v15 = vrot.slane %v1081_v58, 4  ;;  %v5049_v5 = vmax.f32 %v1022_v51, %v1023_v31  ;;  %v1040_v27 = vmax.f32 %v5003_v3, %v1039_v43 }
 0x191   : > { %vm1065_vm14 = vcmp.eq.f32.partialorder %v4617_v52, %v5045_v44  ;;  %v1046_v2 = vmax.f32 %v1044_v54, %v1045_v36  ;;  %v5060_v33 = vmax.f32 %v1034_v20, %v1035_v48 }
 0x192   : > { %vm1193_vm4 = vcmp.lt.s32.totalorder %v1191_v46, %v1192_v30  ;;  %vm1196_vm1 = vcmp.lt.s32.totalorder %v1081_v58, %v1195_v15  ;;  %vm1064_vm15 = vcmp.eq.f32.partialorder %v4613_v49, %v5049_v5  ;;  %v1083_v1 = vsel %vm1065_vm14, %v4876_v50, 8 }
 0x193   : > { %v1194_v34 = vsel %vm1193_vm4, %v1191_v46, %v1192_v30  ;;  %v1197_v22 = vsel %vm1196_vm1, %v1081_v58, %v1195_v15  ;;  %v1082_v61 = vsel %vm1064_vm15, %v4876_v50, 8  ;;  %v1213_v3 = vrot.slane %v1083_v1, 4 }
 0x194   : > { %vm1260_vm8 = vcmp.eq.s32.totalorder %v4876_v50, %v1194_v34  ;;  %v1198_v41 = vrot.slane %v1197_v22, 2  ;;  %v1204_v29 = vrot.slane %v1082_v61, 4  ;;  %v1041_v47 = vrot.slane %v1040_v27, 1 }
 0x195   : > { %2996 = vmatpush.msk.msra.mxu3 %vm1260_vm8, %v5965_v32  ;;  %vm1066_vm4 = vcmp.eq.f32.partialorder %v4621_v19, %v5060_v33  ;;  %v1047_v54 = vrot.slane %v1046_v2, 1  ;;  %vm1214_vm1 = vcmp.lt.s32.totalorder %v1083_v1, %v1213_v3 }
 0x196   : > { %vm1199_vm10 = vcmp.lt.s32.totalorder %v1197_v22, %v1198_v41  ;;  %2997 = vmatmul.msk.f32.vlgmr.msra.gmra.mxu3 %vm5976_vm12, %v4917_v0  ;;  %vm1205_vm3 = vcmp.lt.s32.totalorder %v1082_v61, %v1204_v29  ;;  %v1084_v57 = vsel %vm1066_vm4, %v4876_v50, 8  ;;  %v1215_v20 = vsel %vm1214_vm1, %v1083_v1, %v1213_v3 }
 0x197   : > { %v1200_v53 = vsel %vm1199_vm10, %v1197_v22, %v1198_v41  ;;  %v1206_v51 = vsel %vm1205_vm3, %v1082_v61, %v1204_v29  ;;  %v1222_v36 = vrot.slane %v1084_v57, 4  ;;  %v1216_v46 = vrot.slane %v1215_v20, 2 }
 0x198   : > { %v1201_v45 = vrot.slane %v1200_v53, 1  ;;  %v1207_v43 = vrot.slane %v1206_v51, 2  ;;  %v5067_v58 = vmax.f32 %v1040_v27, %v1041_v47  ;;  %v5069_v30 = vmax.f32 %v1046_v2, %v1047_v54 }
 0x199   : > { %vm1223_vm8 = vcmp.lt.s32.totalorder %v1084_v57, %v1222_v36  ;;  %vm1217_vm12 = vcmp.lt.s32.totalorder %v1215_v20, %v1216_v46  ;;  %vm5977_vm4 = vcmask 64512  }
 0x19a   : > { %vm1202_vm14 = vcmp.lt.s32.totalorder %v1200_v53, %v1201_v45  ;;  %vm1208_vm15 = vcmp.lt.s32.totalorder %v1206_v51, %v1207_v43  ;;  %v1224_v48 = vsel %vm1223_vm8, %v1084_v57, %v1222_v36  ;;  %v1218_v22 = vsel %vm1217_vm12, %v1215_v20, %v1216_v46 }
 0x19b   : > { %v1203_v31 = vsel %vm1202_vm14, %v1200_v53, %v1201_v45  ;;  %v1209_v15 = vsel %vm1208_vm15, %v1206_v51, %v1207_v43  ;;  %v1225_v41 = vrot.slane %v1224_v48, 2  ;;  %vm1067_vm3 = vcmp.eq.f32.partialorder %v4625_v62, %v5067_v58 }
 0x19c   : > { %vm1261_vm10 = vcmp.eq.s32.totalorder %v4876_v50, %v1203_v31  ;;  %v1210_v34 = vrot.slane %v1209_v15, 1  ;;  %v1219_v27 = vrot.slane %v1218_v22, 1  ;;  %v1085_v61 = vsel %vm1067_vm3, %v4876_v50, 8 }
 0x19d   : > { %2998 = vmatpush.msk.msrb.mxu0 %vm1261_vm10, %v5965_v32  ;;  %vm1226_vm14 = vcmp.lt.s32.totalorder %v1224_v48, %v1225_v41  ;;  %v1231_v2 = vrot.slane %v1085_v61, 4  ;;  %vm1068_vm15 = vcmp.eq.f32.partialorder %v4647_v42, %v5069_v30 }
 0x19e   : > { %2999 = vmatmul.msk.f32.vlgmr.msrb.gmra.mxu0 %vm5977_vm4, %v4917_v0  ;;  %vm1211_vm1 = vcmp.lt.s32.totalorder %v1209_v15, %v1210_v34  ;;  %vm1220_vm8 = vcmp.lt.s32.totalorder %v1218_v22, %v1219_v27  ;;  %v1227_v1 = vsel %vm1226_vm14, %v1224_v48, %v1225_v41  ;;  %v1086_v3 = vsel %vm1068_vm15, %v4876_v50, 8 }
 0x19f   : > { %v1212_v29 = vsel %vm1211_vm1, %v1209_v15, %v1210_v34  ;;  %v1221_v47 = vsel %vm1220_vm8, %v1218_v22, %v1219_v27  ;;  %v1228_v53 = vrot.slane %v1227_v1, 1  ;;  %vm1232_vm12 = vcmp.lt.s32.totalorder %v1085_v61, %v1231_v2 }
 0x1a0   : > { %vm1262_vm10 = vcmp.eq.s32.totalorder %v4876_v50, %v1212_v29  ;;  %vm1263_vm3 = vcmp.eq.s32.totalorder %v4876_v50, %v1221_v47  ;;  %v1233_v54 = vsel %vm1232_vm12, %v1085_v61, %v1231_v2  ;;  %v1240_v45 = vrot.slane %v1086_v3, 4  ;;  %v5112_v47 = vld [vmem:[#allocation2 + $0x90] sm:$0xff] }
 0x1a1   : > { %3000 = vmatpush.msk.msrb.mxu1 %vm1262_vm10, %v5965_v32  ;;  %3002 = vmatpush.msk.msrb.mxu2 %vm1263_vm3, %v5965_v32  ;;  %vm1229_vm4 = vcmp.lt.s32.totalorder %v1227_v1, %v1228_v53  ;;  %v1234_v51 = vrot.slane %v1233_v54, 2  ;;  %vm5978_vm1 = vcmask 64512   ;;  %v5697_v27 = vmov 0.0  }
 0x1a2   : > { %3001 = vmatmul.msk.f32.vlgmr.msrb.gmra.mxu1 %vm5978_vm1, %v4917_v0  ;;  %v1230_v57 = vsel %vm1229_vm4, %v1227_v1, %v1228_v53  ;;  %vm1241_vm14 = vcmp.lt.s32.totalorder %v1086_v3, %v1240_v45  ;;  %vm5979_vm15 = vmmov %vm5978_vm1 }
 0x1a3   : > { %3003 = vmatmul.msk.f32.vlgmr.msrb.gmra.mxu2 %vm5979_vm15, %v4917_v0  ;;  %vm1264_vm8 = vcmp.eq.s32.totalorder %v4876_v50, %v1230_v57  ;;  %vm1235_vm6 = vcmp.lt.s32.totalorder %v1233_v54, %v1234_v51  ;;  %v1242_v43 = vsel %vm1241_vm14, %v1086_v3, %v1240_v45  ;;  %vm5980_vm10 = vmmov %vm5978_vm1  ;;  %v5117_v45 = vld [vmem:[#allocation2 + $0x98] sm:$0xff]  ;;  %v5119_v57 = vld [vmem:[#allocation2 + $0xa0] sm:$0xff] }
 0x1a4   : > { %3004 = vmatpush.msk.msrb.mxu3 %vm1264_vm8, %v5965_v32  ;;  %v1236_v20 = vsel %vm1235_vm6, %v1233_v54, %v1234_v51  ;;  %v1243_v36 = vrot.slane %v1242_v43, 2  ;;  %vm5981_vm14 = vmmov %vm5980_vm10 }
 0x1a5   : > { %v1237_v46 = vrot.slane %v1236_v20, 1  ;;  %3005 = vmatmul.msk.f32.vlgmr.msrb.gmra.mxu3 %vm5980_vm10, %v4917_v0  ;;  %vm5982_vm15 = vmmov %vm5980_vm10 }
 0x1a6   : > { %vm1244_vm12 = vcmp.lt.s32.totalorder %v1242_v43, %v1243_v36 }
 0x1a7   : > { %vm1238_vm3 = vcmp.lt.s32.totalorder %v1236_v20, %v1237_v46  ;;  %v1245_v31 = vsel %vm1244_vm12, %v1242_v43, %v1243_v36  ;;  %v2283_v36 = vrot.slane %v5112_v47, 2 }
 0x1a8   : > { %v1239_v15 = vsel %vm1238_vm3, %v1236_v20, %v1237_v46  ;;  %v1246_v48 = vrot.slane %v1245_v31, 1 }
 0x1a9   : > { %vm1265_vm4 = vcmp.eq.s32.totalorder %v4876_v50, %v1239_v15 }
 0x1aa   : > { %3006 = vmatpush.msk.msra.mxu0 %vm1265_vm4, %v5965_v32  ;;  %vm1247_vm1 = vcmp.lt.s32.totalorder %v1245_v31, %v1246_v48  ;;  %vm1594_vm4 = vcmp.ge.f32.partialorder %v4880_v24, 0.7 }
 0x1ab   : > { %v1248_v34 = vsel %vm1247_vm1, %v1245_v31, %v1246_v48  ;;  %3007 = vmatmul.msk.f32.vlgmr.msra.gmra.mxu0 %vm5981_vm14, %v4917_v0  ;;  %vm1630_vm1 = vcmp.lt.f32.partialorder %v4880_v24, 0.3  ;;  %vm1595_vm14 = vcmp.ge.f32.partialorder %v4882_v59, 0.7  ;;  %v2158_v31 = vrot.slane %v4630_v37, 4 }
 0x1ac   : > { %vm1266_vm6 = vcmp.eq.s32.totalorder %v4876_v50, %v1248_v34  ;;  %v2284_v34 = vrot.slane %v5117_v45, 2 }
 0x1ad   : > { %3008 = vmatpush.msk.msra.mxu1 %vm1266_vm6, %v5965_v32 }
 0x1ae   : > { %3009 = vmatmul.msk.f32.vlgmr.msra.gmra.mxu1 %vm5982_vm15, %v4917_v0  ;;  %vm1631_vm15 = vcmp.lt.f32.partialorder %v4882_v59, 0.3 }
 0x1ca   : > { %v1411_v22 = vpop.xlane.xlu1 %1410 }
 0x1cb   : > { %vm1412_vm8 = vcmp.eq.f32.partialorder %v1411_v22, 0.0 }
 0x1cc   : > { %v5101_v41 = vsel %vm1412_vm8, 1e-05, %v1411_v22  ;;  %v5128_v22 = vld [vmem:[#allocation2 + $0x10] sm:$0xff] }
 0x1cd   : > { %vm1414_vm10 = vcmp.eq.f32.partialorder %v4546_v6, %v5101_v41  ;;  %vm1415_vm12 = vcmp.eq.f32.partialorder %v4551_v7, %v5101_v41  ;;  %vm1416_vm3 = vcmp.eq.f32.partialorder %v4557_v55, %v5101_v41  ;;  %v2157_v7 = vrot.slane %v4627_v60, 4 }
 0x1ce   : > { %v1432_v61 = vsel %vm1414_vm10, 1.0, %v5697_v27  ;;  %v1433_v32 = vsel %vm1415_vm12, 1.0, %v5697_v27  ;;  %v1434_v3 = vsel %vm1416_vm3, 1.0, %v5697_v27  ;;  %vm1417_vm3 = vcmp.eq.f32.partialorder %v4562_v40, %v5101_v41 }
 0x1cf   : > { %v1450_v2 = vrot.slane %v1432_v61, 4  ;;  %v1456_v1 = vrot.slane %v1433_v32, 4  ;;  %v1462_v53 = vrot.slane %v1434_v3, 4  ;;  %vm5983_vm12 = vcmp.gt.f32.partialorder %v4627_v60, 0.0 }
 0x1d1   : > { %v1451_v29 = vmax.f32 %v1432_v61, %v1450_v2  ;;  %v1457_v6 = vmax.f32 %v1433_v32, %v1456_v1  ;;  %v1463_v55 = vmax.f32 %v1434_v3, %v1462_v53  ;;  %v1435_v53 = vsel %vm1417_vm3, 1.0, %v5697_v27 }
 0x1d2   : > { %v1468_v2 = vrot.slane %v1435_v53, 4 }
 0x1d3   : > { %v1452_v50 = vrot.slane %v1451_v29, 2  ;;  %v1458_v51 = vrot.slane %v1457_v6, 2  ;;  %v1464_v48 = vrot.slane %v1463_v55, 2 }
 0x1d5   : > { %v1453_v0 = vmax.f32 %v1451_v29, %v1452_v50  ;;  %v1459_v46 = vmax.f32 %v1457_v6, %v1458_v51  ;;  %v5695_v29 = vmov -1.0   ;;  %v1465_v1 = vmax.f32 %v1463_v55, %v1464_v48 }
 0x1d6   : > { %v1469_v6 = vmax.f32 %v1435_v53, %v1468_v2 }
 0x1d7   : > { %v1454_v54 = vrot.slane %v1453_v0, 1  ;;  %v1460_v32 = vrot.slane %v1459_v46, 1  ;;  %v1466_v48 = vrot.slane %v1465_v1, 1 }
 0x1d9   : > { %v1455_v43 = vmax.f32 %v1453_v0, %v1454_v54  ;;  %v5133_v0 = vld [vmem:[#allocation2 + $0xa8] sm:$0xff]  ;;  %v5142_v54 = vld [vmem:[#allocation2 + $0x18] sm:$0xff] }
 0x1db   : > { %vm1558_vm10 = vcmp.gt.f32.partialorder %v1455_v43, 0.0  ;;  %v1461_v43 = vmax.f32 %v1459_v46, %v1460_v32 }
 0x1dc   : > { %v1576_v50 = vsel %vm1558_vm10, 1.0, %v5695_v29  ;;  %vm1632_vm10 = vcmp.lt.f32.partialorder %v4895_v56, 0.3 }
 0x1dd   : > { %v1612_v3 = vsel %vm1594_vm4, 1.0, %v1576_v50  ;;  %vm1418_vm4 = vcmp.eq.f32.partialorder %v4569_v35, %v5101_v41  ;;  %vm1559_vm6 = vcmp.gt.f32.partialorder %v1461_v43, 0.0  ;;  %v5162_v43 = vld [vmem:[#allocation2 + $0x20] sm:$0xff] }
 0x1de   : > { %v1648_v55 = vsel %vm1630_vm1, 0.0, %v1612_v3  ;;  %v1577_v32 = vsel %vm1559_vm6, 1.0, %v5695_v29  ;;  %v1467_v3 = vmax.f32 %v1465_v1, %v1466_v48  ;;  %vm5985_vm6 = vcmp.gt.f32.partialorder %v4630_v37, 0.0 }
 0x1df   : > { %v1666_v40 = vsel %vm5983_vm12, %v1648_v55, -1.0  ;;  %v1613_v50 = vsel %vm1595_vm14, 1.0, %v1577_v32  ;;  %vm5986_vm14 = vcmask 1041408  }
 0x1e0   : > { %vm1684_vm3 = vcmp.eq.f32.partialorder %v1666_v40, 1.0  ;;  %vm1720_vm8 = vcmp.ge.f32.partialorder %v1666_v40, 0.0  ;;  %v2500_v51 = vrot.slane %v1666_v40, 5  ;;  %v1649_v35 = vsel %vm1631_vm15, 0.0, %v1613_v50 }
 0x1e1   : > { %v1702_v24 = vsel %vm1684_vm3, 1.0, %v5697_v27  ;;  %v2956_v46 = vsel %vm1720_vm8, 1.0, %v5697_v27  ;;  %vm1560_vm1 = vcmp.gt.f32.partialorder %v1467_v3, 0.0  ;;  %v1436_v40 = vsel %vm1418_vm4, 1.0, %v5697_v27 }
 0x1e2   : > { %v2554_v61 = vrot.slane %v1702_v24, 4  ;;  %v2608_v55 = vrot.slane %v2956_v46, 3  ;;  %vm5984_vm8 = vcmask 1040384   ;;  %v1667_v1 = vsel %vm5985_vm6, %v1649_v35, -1.0 }
 0x1e3   : > { %v1578_v48 = vsel %vm1560_vm1, 1.0, %v5695_v29  ;;  %v1470_v24 = vrot.slane %v1469_v6, 2  ;;  %vm1685_vm12 = vcmp.eq.f32.partialorder %v1667_v1, 1.0  ;;  %vm1721_vm3 = vcmp.ge.f32.partialorder %v1667_v1, 0.0 }
 0x1e4   : > { %v2699_v20 = vsel %vm5984_vm8, %v2500_v51, %v2554_v61  ;;  %v2501_v59 = vrot.slane %v1667_v1, 5  ;;  %vm5987_vm15 = vcmask 1042432   ;;  %vm2754_vm4 = vcmask 1043456  }
 0x1e5   : > { %v2717_v2 = vsel %vm5986_vm14, %v2699_v20, %v2608_v55  ;;  %v1703_v46 = vsel %vm1685_vm12, 1.0, %v5697_v27  ;;  %v2957_v32 = vsel %vm1721_vm3, 1.0, %v5697_v27  ;;  %vm5988_vm8 = vcmp.ge.f32.partialorder %v4895_v56, 0.7 }
 0x1e6   : > { %v2736_v50 = vsel %vm5987_vm15, %v2717_v2, 0.0  ;;  %v1614_v61 = vsel %vm5988_vm8, 1.0, %v1578_v48  ;;  %v2555_v55 = vrot.slane %v1703_v46, 4  ;;  %v2609_v35 = vrot.slane %v2957_v32, 3 }
 0x1e7   : > { %v1796_v53 = vpop.f32.mrf.mxu0  ;;  %v1650_v15 = vsel %vm1632_vm10, 0.0, %v1614_v61  ;;  %v1471_v29 = vmax.f32 %v1469_v6, %v1470_v24  ;;  %v5989_v48 = vrot.slane %v5112_v47, 6  ;;  %vm5990_vm1 = vcmask 1040384  }
 0x1e8   : > { %v2193_v51 = vsub.f32 %v1796_v53, %v2157_v7  ;;  %v2319_v20 = vsub.f32 %v1796_v53, %v2283_v36  ;;  %v1816_v3 = vpop.f32.mrf.mxu1  ;;  %v2700_v7 = vsel %vm5990_vm1, %v2501_v59, %v2555_v55  ;;  %vm5991_vm6 = vcmp.gt.f32.partialorder %v4633_v16, 0.0 }
 0x1e9   : > { %v2194_v1 = vsub.f32 %v1816_v3, %v2158_v31  ;;  %v2320_v2 = vsub.f32 %v1816_v3, %v2284_v34  ;;  %v1668_v36 = vsel %vm5991_vm6, %v1650_v15, -1.0  ;;  %vm1597_vm14 = vcmp.ge.f32.partialorder %v4897_v10, 0.7 }
 0x1ea   : > { %v2265_v27 = vmul.f32 %v5989_v48, %v2193_v51  ;;  %v2409_v60 = vrot.slane %v2319_v20, 6  ;;  %v5992_v53 = vrot.slane %v5117_v45, 6  ;;  %vm5993_vm12 = vcmask 1041408   ;;  %v287_v51 = vld [vmem:[#allocation2 + $0xb0] sm:$0xff] }
 0x1eb   : > { %v2410_v31 = vrot.slane %v2320_v2, 6  ;;  %v2718_v34 = vsel %vm5993_vm12, %v2700_v7, %v2609_v35  ;;  %vm1686_vm3 = vcmp.eq.f32.partialorder %v1668_v36, 1.0  ;;  %vm1633_vm10 = vcmp.lt.f32.partialorder %v4897_v10, 0.3  ;;  %vm5995_vm1 = vmmov %vm5993_vm12 }
 0x1ec   : > { %v2266_v37 = vmul.f32 %v5992_v53, %v2194_v1  ;;  %v2355_v56 = vrot.slane %v2265_v27, 2  ;;  %v2737_v47 = vsel %vm5987_vm15, %v2718_v34, 0.0  ;;  %v5994_v6 = vmov 0.0   ;;  %vm5996_vm6 = vmmov %vm5995_vm1 }
 0x1ed   : > { %v1704_v24 = vsel %vm1686_vm3, 1.0, %v5994_v6  ;;  %vm1722_vm8 = vcmp.ge.f32.partialorder %v1668_v36, 0.0  ;;  %v2502_v59 = vrot.slane %v1668_v36, 5  ;;  %v1472_v61 = vrot.slane %v1471_v29, 1  ;;  %vm5998_vm3 = vmmov %vm5995_vm1 }
 0x1ee   : > { %v2356_v16 = vrot.slane %v2266_v37, 2  ;;  %v2958_v15 = vsel %vm1722_vm8, 1.0, %v5994_v6  ;;  %v2556_v46 = vrot.slane %v1704_v24, 4  ;;  %v2446_v45 = vsel %vm5995_vm1, %v2355_v56, %v2409_v60 }
 0x1ef   : > { %v2610_v32 = vrot.slane %v2958_v15, 3  ;;  %v1474_v20 = vrot.slane %v1436_v40, 4  ;;  %v2464_v3 = vsel %vm4739_vm0, %v2446_v45, 0.0  ;;  %vm5997_vm12 = vcmask 1040384   ;;  %v1836_v36 = vpop.f32.mrf.mxu2 }
 0x1f0   : > { %v2447_v27 = vsel %vm5996_vm6, %v2356_v16, %v2410_v31  ;;  %v2701_v55 = vsel %vm5997_vm12, %v2502_v59, %v2556_v46  ;;  %v2233_v35 = vrot.slane %v287_v51, 6  ;;  %v2662_v1 = vrot.slane %v2464_v3, 4 }
 0x1f1   : > { %v2465_v2 = vsel %vm4743_vm11, %v2447_v27, 0.0  ;;  %v2719_v48 = vsel %vm5998_vm3, %v2701_v55, %v2610_v32  ;;  %v1473_v60 = vmax.f32 %v1471_v29, %v1472_v61  ;;  %v1475_v37 = vmax.f32 %v1436_v40, %v1474_v20  ;;  %v1856_v63 = vpop.f32.mrf.mxu3 }
 0x1f2   : > { %v2663_v7 = vrot.slane %v2465_v2, 4  ;;  %v2738_v53 = vsel %vm5987_vm15, %v2719_v48, 0.0  ;;  %v2287_v18 = vrot.slane %v287_v51, 2  ;;  %v2755_v34 = vsel %vm2754_vm4, %v2736_v50, %v2662_v1 }
 0x1f3   : > { %v5999_v31 = vrot.slane %v5128_v22, 4  ;;  %v6000_v24 = vrot.slane %v5119_v57, 2  ;;  %vm1561_vm0 = vcmp.gt.f32.partialorder %v1473_v60, 0.0  ;;  %2773 = vst [vmem:[%s5213_s4] sm:$0xff] %v2755_v34  ;;  %v6001_v40 = vmov -1.0  }
 0x1f4   : > { %v2756_v29 = vsel %vm2754_vm4, %v2737_v47, %v2663_v7  ;;  %v1579_v15 = vsel %vm1561_vm0, 1.0, %v6001_v40  ;;  %v6002_v50 = vrot.slane %v5142_v54, 4  ;;  %v6003_v22 = vrot.slane %v5133_v0, 2 }
 0x1f5   : > { %v2195_v56 = vsub.f32 %v1836_v36, %v5999_v31  ;;  %v2321_v16 = vsub.f32 %v1836_v36, %v6000_v24  ;;  %2774 = vst [vmem:[%s5213_s4 + $0x8] sm:$0xff] %v2756_v29  ;;  %v6004_v45 = vrot.slane %v5119_v57, 6  ;;  %v1615_v51 = vsel %vm1597_vm14, 1.0, %v1579_v15  ;;  %v1876_v3 = vpop.f32.mrf.mxu0 }
 0x1f6   : > { %v2196_v59 = vsub.f32 %v1856_v63, %v6002_v50  ;;  %v2322_v46 = vsub.f32 %v1856_v63, %v6003_v22  ;;  %v1476_v20 = vrot.slane %v1475_v37, 2  ;;  %vm1598_vm11 = vcmp.ge.f32.partialorder %v4910_v17, 0.7 }
 0x1f7   : > { %v2267_v32 = vmul.f32 %v6004_v45, %v2195_v56  ;;  %v2411_v61 = vrot.slane %v2321_v16, 6  ;;  %v1651_v47 = vsel %vm1633_vm10, 0.0, %v1615_v51  ;;  %v6005_v54 = vrot.slane %v5133_v0, 6  ;;  %vm6008_vm10 = vmmov %vm5998_vm3  ;;  %v3168_v51 = vld [vmem:[#allocation2 + $0x28] sm:$0xff] }
 0x1f8   : > { %v2412_v55 = vrot.slane %v2322_v46, 6  ;;  %v6006_v1 = vrot.slane %v5162_v43, 4  ;;  %vm1634_vm8 = vcmp.lt.f32.partialorder %v4910_v17, 0.3  ;;  %vm6007_vm1 = vcmp.gt.f32.partialorder %v4636_v8, 0.0  ;;  %v1896_v45 = vpop.f32.mrf.mxu1 }
 0x1f9   : > { %v2268_v27 = vmul.f32 %v6005_v54, %v2196_v59  ;;  %v2357_v57 = vrot.slane %v2267_v32, 2  ;;  %v1669_v48 = vsel %vm6007_vm1, %v1651_v47, -1.0  ;;  %v1477_v60 = vmax.f32 %v1475_v37, %v1476_v20  ;;  %vm6011_vm1 = vmmov %vm5998_vm3  ;;  %v288_v32 = vld [vmem:[#allocation2 + $0xb8] sm:$0xff] }
 0x1fa   : > { %v2197_v2 = vsub.f32 %v1876_v3, %v6006_v1  ;;  %v2323_v7 = vsub.f32 %v1876_v3, %v2287_v18  ;;  %vm1687_vm14 = vcmp.eq.f32.partialorder %v1669_v48, 1.0  ;;  %vm1723_vm6 = vcmp.ge.f32.partialorder %v1669_v48, 0.0 }
 0x1fb   : > { %v2358_v36 = vrot.slane %v2268_v27, 2  ;;  %v2503_v10 = vrot.slane %v1669_v48, 5  ;;  %v2448_v34 = vsel %vm6008_vm10, %v2357_v57, %v2411_v61  ;;  %v1705_v0 = vsel %vm1687_vm14, 1.0, %v5994_v6 }
 0x1fc   : > { %v2959_v31 = vsel %vm1723_vm6, 1.0, %v5994_v6  ;;  %v1478_v43 = vrot.slane %v1477_v60, 1  ;;  %vm6009_vm12 = vnez %v5912_v39  ;;  %v2557_v8 = vrot.slane %v1705_v0, 4 }
 0x1fd   : > { %v2466_v56 = vsel %vm6009_vm12, %v2448_v34, 0.0  ;;  %v2449_v24 = vsel %vm5998_vm3, %v2358_v36, %v2412_v55  ;;  %v2611_v37 = vrot.slane %v2959_v31, 3  ;;  %v2269_v29 = vmul.f32 %v2233_v35, %v2197_v2 }
 0x1fe   : > { %v2664_v18 = vrot.slane %v2466_v56, 4  ;;  %v2467_v16 = vsel %vm4751_vm9, %v2449_v24, 0.0  ;;  %v1479_v63 = vmax.f32 %v1477_v60, %v1478_v43  ;;  %vm6010_vm15 = vcmask 1040384   ;;  %vm6013_vm9 = vmmov %vm6011_vm1  ;;  %v6015_v56 = vld [vmem:[#allocation25_spill] sm:$0xff] }
 0x1ff   : > { %v2665_v15 = vrot.slane %v2467_v16, 4  ;;  %v2702_v50 = vsel %vm6010_vm15, %v2503_v10, %v2557_v8  ;;  %v2413_v59 = vrot.slane %v2323_v7, 6  ;;  %vm1419_vm0 = vcmp.eq.f32.partialorder %v4574_v28, %v5101_v41  ;;  %v3169_v16 = vld [vmem:[#allocation2 + $0x30] sm:$0xff] }
 0x200   : > { %v2757_v39 = vsel %vm2754_vm4, %v2738_v53, %v2664_v18  ;;  %v2720_v22 = vsel %vm6011_vm1, %v2702_v50, %v2611_v37  ;;  %vm1562_vm14 = vcmp.gt.f32.partialorder %v1479_v63, 0.0  ;;  %v2359_v46 = vrot.slane %v2269_v29, 2 }
 0x201   : > { %2775 = vst [vmem:[%s5213_s4 + $0x10] sm:$0xff] %v2757_v39  ;;  %vm6012_vm6 = vcmask 1042432   ;;  %v1580_v35 = vsel %vm1562_vm14, 1.0, %v6001_v40  ;;  %v1437_v61 = vsel %vm1419_vm0, 1.0, %v5994_v6  ;;  %v2162_v20 = vrot.slane %v3168_v51, 4  ;;  %vm6016_vm0 = vmmov %vm6011_vm1 }
 0x202   : > { %v2739_v25 = vsel %vm6012_vm6, %v2720_v22, 0.0  ;;  %v1616_v53 = vsel %vm1598_vm11, 1.0, %v1580_v35  ;;  %v2450_v3 = vsel %vm6013_vm9, %v2359_v46, %v2413_v59  ;;  %v1480_v47 = vrot.slane %v1437_v61, 4  ;;  %vm6017_vm1 = vmmov %vm6016_vm0 }
 0x203   : > { %v2758_v28 = vsel %vm2754_vm4, %v2739_v25, %v2665_v15  ;;  %v1652_v54 = vsel %vm1634_vm8, 0.0, %v1616_v53  ;;  %v2468_v27 = vsel %vm4755_vm7, %v2450_v3, 0.0  ;;  %v2198_v55 = vsub.f32 %v1896_v45, %v2162_v20  ;;  %vm6018_vm14 = vmmov %vm6012_vm6  ;;  %v290_v20 = vld [vmem:[#allocation2 + $0xc8] sm:$0xff] }
 0x204   : > { %2776 = vst [vmem:[%s5213_s4 + $0x18] sm:$0xff] %v2758_v28  ;;  %v2234_v1 = vrot.slane %v288_v32, 6  ;;  %vm6014_vm10 = vcmp.gt.f32.partialorder %v4639_v4, 0.0  ;;  %v2666_v57 = vrot.slane %v2468_v27, 4  ;;  %v1481_v48 = vmax.f32 %v1437_v61, %v1480_v47 }
 0x205   : > { %v1670_v2 = vsel %vm6014_vm10, %v1652_v54, -1.0  ;;  %v2288_v60 = vrot.slane %v288_v32, 2  ;;  %vm1599_vm7 = vcmp.ge.f32.partialorder %v4922_v14, 0.7  ;;  %vm1420_vm8 = vcmp.eq.f32.partialorder %v6015_v56, %v5101_v41  ;;  %v1916_v24 = vpop.f32.mrf.mxu2 }
 0x206   : > { %vm1688_vm12 = vcmp.eq.f32.partialorder %v1670_v2, 1.0  ;;  %vm1724_vm11 = vcmp.ge.f32.partialorder %v1670_v2, 0.0  ;;  %v2504_v7 = vrot.slane %v1670_v2, 5  ;;  %v2270_v36 = vmul.f32 %v2234_v1, %v2198_v55  ;;  %v3170_v55 = vld [vmem:[#allocation2 + $0x38] sm:$0xff]  ;;  %v6020_v2 = vld [vmem:[#allocation41_spill] sm:$0xff] }
 0x207   : > { %v1706_v10 = vsel %vm1688_vm12, 1.0, %v5994_v6  ;;  %v2960_v17 = vsel %vm1724_vm11, 1.0, %v5994_v6  ;;  %v1482_v34 = vrot.slane %v1481_v48, 2  ;;  %v2324_v0 = vsub.f32 %v1896_v45, %v2288_v60  ;;  %vm6021_vm12 = vmmov %vm6016_vm0 }
 0x208   : > { %v2558_v31 = vrot.slane %v1706_v10, 4  ;;  %v2612_v43 = vrot.slane %v2960_v17, 3  ;;  %v2360_v4 = vrot.slane %v2270_v36, 2  ;;  %vm1635_vm3 = vcmp.lt.f32.partialorder %v4922_v14, 0.3 }
 0x209   : > { %v1483_v8 = vmax.f32 %v1481_v48, %v1482_v34  ;;  %v2414_v37 = vrot.slane %v2324_v0, 6  ;;  %v1438_v18 = vsel %vm1420_vm8, 1.0, %v5994_v6  ;;  %v2163_v63 = vrot.slane %v3169_v16, 4 }
 0x20a   : > { %v2703_v29 = vsel %vm6010_vm15, %v2504_v7, %v2558_v31  ;;  %v1486_v15 = vrot.slane %v1438_v18, 4  ;;  %v2235_v50 = vrot.slane %v289_v11, 6  ;;  %v2289_v59 = vrot.slane %v289_v11, 2 }
 0x20b   : > { %v2721_v39 = vsel %vm6016_vm0, %v2703_v29, %v2612_v43  ;;  %v1484_v22 = vrot.slane %v1483_v8, 1  ;;  %v2451_v46 = vsel %vm6017_vm1, %v2360_v4, %v2414_v37  ;;  %v2199_v45 = vsub.f32 %v1916_v24, %v2163_v63  ;;  %v6022_v4 = vld [vmem:[#allocation13_spill] sm:$0xff] }
 0x20c   : > { %v2740_v25 = vsel %vm6018_vm14, %v2721_v39, 0.0  ;;  %v2469_v32 = vsel %vm4759_vm13, %v2451_v46, 0.0  ;;  %v1487_v61 = vmax.f32 %v1438_v18, %v1486_v15  ;;  %v2325_v51 = vsub.f32 %v1916_v24, %v2289_v59 }
 0x20d   : > { %v2759_v28 = vsel %vm2754_vm4, %v2740_v25, %v2666_v57  ;;  %v1485_v53 = vmax.f32 %v1483_v8, %v1484_v22  ;;  %v5279_v3 = vrot.slane %v2469_v32, 4  ;;  %v2271_v47 = vmul.f32 %v2235_v50, %v2199_v45  ;;  %v1936_v17 = vpop.f32.mrf.mxu3  ;;  %v6024_v8 = vld [vmem:[#allocation28_spill] sm:$0xff] }
 0x20e   : > { %2777 = vst [vmem:[%s5213_s4 + $0x20] sm:$0xff] %v2759_v28  ;;  %v1488_v54 = vrot.slane %v1487_v61, 2  ;;  %v2415_v27 = vrot.slane %v2325_v51, 6  ;;  %vm1421_vm6 = vcmp.eq.f32.partialorder %v4584_v13, %v5101_v41  ;;  %v2164_v1 = vrot.slane %v3170_v55, 4 }
 0x20f   : > { %vm1600_vm9 = vcmp.ge.f32.partialorder %v6020_v2, 0.7  ;;  %vm1563_vm13 = vcmp.gt.f32.partialorder %v1485_v53, 0.0  ;;  %v2361_v48 = vrot.slane %v2271_v47, 2  ;;  %v1439_v60 = vsel %vm1421_vm6, 1.0, %v5994_v6 }
 0x210   : > { %v2236_v7 = vrot.slane %v290_v20, 6  ;;  %vm1636_vm10 = vcmp.lt.f32.partialorder %v6020_v2, 0.3  ;;  %v1581_v57 = vsel %vm1563_vm13, 1.0, %v6001_v40  ;;  %v1489_v36 = vmax.f32 %v1487_v61, %v1488_v54  ;;  %v3171_v61 = vld [vmem:[#allocation2 + $0x40] sm:$0xff]  ;;  %vm6027_vm13 = vmmov %vm6021_vm12 }
 0x211   : > { %v1492_v10 = vrot.slane %v1439_v60, 4  ;;  %v2290_v34 = vrot.slane %v290_v20, 2  ;;  %v1617_v13 = vsel %vm1599_vm7, 1.0, %v1581_v57  ;;  %v2452_v0 = vsel %vm6021_vm12, %v2361_v48, %v2415_v27 }
 0x212   : > { %v2200_v11 = vsub.f32 %v1936_v17, %v2164_v1  ;;  %vm1422_vm11 = vcmp.eq.f32.partialorder %v4590_v38, %v5101_v41  ;;  %v1653_v31 = vsel %vm1635_vm3, 0.0, %v1617_v13  ;;  %v1490_v43 = vrot.slane %v1489_v36, 1 }
 0x213   : > { %vm6023_vm8 = vnez %v6022_v4  ;;  %v1493_v24 = vmax.f32 %v1439_v60, %v1492_v10  ;;  %vm6025_vm15 = vcmp.gt.f32.partialorder %v6024_v8, 0.0  ;;  %v2326_v63 = vsub.f32 %v1936_v17, %v2290_v34  ;;  %v6030_v60 = vld [vmem:[#allocation29_spill] sm:$0xff]  ;;  %v1956_v10 = vpop.f32.mrf.mxu0  ;;  %v291_v34 = vld [vmem:[#allocation2 + $0xd0] sm:$0xff] }
 0x214   : > { %v2470_v56 = vsel %vm6023_vm8, %v2452_v0, 0.0  ;;  %v1671_v37 = vsel %vm6025_vm15, %v1653_v31, -1.0  ;;  %v2272_v16 = vmul.f32 %v2236_v7, %v2200_v11  ;;  %v1491_v15 = vmax.f32 %v1489_v36, %v1490_v43  ;;  %v6032_v43 = vld [vmem:[#allocation42_spill] sm:$0xff] }
 0x215   : > { %v5299_v18 = vrot.slane %v2470_v56, 4  ;;  %vm1689_vm7 = vcmp.eq.f32.partialorder %v1671_v37, 1.0  ;;  %vm1725_vm0 = vcmp.ge.f32.partialorder %v1671_v37, 0.0  ;;  %v2505_v29 = vrot.slane %v1671_v37, 5 }
 0x216   : > { %v1707_v50 = vsel %vm1689_vm7, 1.0, %v5994_v6  ;;  %v2961_v14 = vsel %vm1725_vm0, 1.0, %v5994_v6  ;;  %v1494_v59 = vrot.slane %v1493_v24, 2  ;;  %v2362_v39 = vrot.slane %v2272_v16, 2  ;;  %v6033_v16 = vld [vmem:[#allocation26_spill] sm:$0xff] }
 0x217   : > { %v2559_v22 = vrot.slane %v1707_v50, 4  ;;  %v2613_v46 = vrot.slane %v2961_v14, 3  ;;  %vm1564_vm3 = vcmp.gt.f32.partialorder %v1491_v15, 0.0  ;;  %v2416_v45 = vrot.slane %v2326_v63, 6 }
 0x218   : > { %vm1601_vm1 = vcmp.ge.f32.partialorder %v4970_v26, 0.7  ;;  %v1582_v25 = vsel %vm1564_vm3, 1.0, %v6001_v40  ;;  %v1495_v35 = vmax.f32 %v1493_v24, %v1494_v59  ;;  %v1440_v32 = vsel %vm1422_vm11, 1.0, %v5994_v6 }
 0x219   : > { %v2165_v51 = vrot.slane %v3171_v61, 4  ;;  %vm1637_vm14 = vcmp.lt.f32.partialorder %v4970_v26, 0.3  ;;  %vm6026_vm6 = vcmask 1040384   ;;  %v1618_v28 = vsel %vm1600_vm9, 1.0, %v1582_v25  ;;  %v6037_v61 = vld [vmem:[#allocation30_spill] sm:$0xff] }
 0x21a   : > { %v2704_v20 = vsel %vm6026_vm6, %v2505_v29, %v2559_v22  ;;  %v2453_v53 = vsel %vm6027_vm13, %v2362_v39, %v2416_v45  ;;  %v1498_v47 = vrot.slane %v1440_v32, 4  ;;  %v1654_v27 = vsel %vm1636_vm10, 0.0, %v1618_v28  ;;  %vm6034_vm3 = vmmov %vm6026_vm6 }
 0x21b   : > { %v2722_v54 = vsel %vm6021_vm12, %v2704_v20, %v2613_v46  ;;  %v1496_v38 = vrot.slane %v1495_v35, 1  ;;  %v2471_v1 = vsel %vm4767_vm5, %v2453_v53, 0.0  ;;  %vm6029_vm11 = vcmask 1042432   ;;  %vm6035_vm6 = vmmov %vm6021_vm12 }
 0x21c   : > { %v2741_v48 = vsel %vm6029_vm11, %v2722_v54, 0.0  ;;  %vm6031_vm8 = vcmp.gt.f32.partialorder %v6030_v60, 0.0  ;;  %v5322_v57 = vrot.slane %v2471_v1, 4  ;;  %v1499_v36 = vmax.f32 %v1440_v32, %v1498_v47  ;;  %vm6036_vm13 = vmmov %vm6029_vm11 }
 0x21d   : > { %v1672_v7 = vsel %vm6031_vm8, %v1654_v27, -1.0  ;;  %v2760_v17 = vsel %vm2754_vm4, %v2741_v48, %v5279_v3  ;;  %v1497_v11 = vmax.f32 %v1495_v35, %v1496_v38  ;;  %vm1602_vm5 = vcmp.ge.f32.partialorder %v6032_v43, 0.7  ;;  %vm6039_vm8 = vmmov %vm6035_vm6  ;;  %v292_v38 = vld [vmem:[#allocation2 + $0xd8] sm:$0xff] }
 0x21e   : > { %vm1690_vm9 = vcmp.eq.f32.partialorder %v1672_v7, 1.0  ;;  %vm1726_vm15 = vcmp.ge.f32.partialorder %v1672_v7, 0.0  ;;  %v2506_v2 = vrot.slane %v1672_v7, 5  ;;  %2778 = vst [vmem:[%s5213_s4 + $0x28] sm:$0xff] %v2760_v17  ;;  %v1500_v31 = vrot.slane %v1499_v36, 2  ;;  %v1976_v7 = vpop.f32.mrf.mxu1 }
 0x21f   : > { %v1708_v13 = vsel %vm1690_vm9, 1.0, %v5994_v6  ;;  %v2962_v0 = vsel %vm1726_vm15, 1.0, %v5994_v6  ;;  %v2201_v24 = vsub.f32 %v1956_v10, %v2165_v51  ;;  %v2237_v8 = vrot.slane %v291_v34, 6  ;;  %vm6042_vm15 = vmmov %vm6034_vm3 }
 0x220   : > { %v2560_v4 = vrot.slane %v1708_v13, 4  ;;  %v2614_v56 = vrot.slane %v2962_v0, 3  ;;  %vm1638_vm10 = vcmp.lt.f32.partialorder %v6032_v43, 0.3  ;;  %vm1565_vm7 = vcmp.gt.f32.partialorder %v1497_v11, 0.0  ;;  %v6041_v13 = vld [vmem:[#allocation44_spill] sm:$0xff] }
 0x221   : > { %v1501_v3 = vmax.f32 %v1499_v36, %v1500_v31  ;;  %v2291_v37 = vrot.slane %v291_v34, 2  ;;  %vm1423_vm0 = vcmp.eq.f32.partialorder %v6033_v16, %v5101_v41  ;;  %v1583_v29 = vsel %vm1565_vm7, 1.0, %v6001_v40  ;;  %vm6043_vm7 = vmmov %vm6035_vm6 }
 0x222   : > { %v2705_v63 = vsel %vm6034_vm3, %v2506_v2, %v2560_v4  ;;  %v2273_v15 = vmul.f32 %v2237_v8, %v2201_v24  ;;  %v1441_v50 = vsel %vm1423_vm0, 1.0, %v5994_v6  ;;  %v1619_v59 = vsel %vm1601_vm1, 1.0, %v1583_v29  ;;  %v3172_v2 = vld [vmem:[#allocation2 + $0x48] sm:$0xff]  ;;  %v6044_v24 = vld [vmem:[#allocation31_spill] sm:$0xff]  ;;  %vm6046_vm0 = vmmov %vm6036_vm13 }
 0x223   : > { %v2723_v14 = vsel %vm6035_vm6, %v2705_v63, %v2614_v56  ;;  %v1502_v39 = vrot.slane %v1501_v3, 1  ;;  %v2327_v22 = vsub.f32 %v1956_v10, %v2291_v37  ;;  %v1655_v45 = vsel %vm1637_vm14, 0.0, %v1619_v59  ;;  %v293_v29 = vld [vmem:[#allocation2 + $0xe0] sm:$0xff] }
 0x224   : > { %v2742_v46 = vsel %vm6036_vm13, %v2723_v14, 0.0  ;;  %v2363_v25 = vrot.slane %v2273_v15, 2  ;;  %v1504_v35 = vrot.slane %v1441_v50, 4  ;;  %vm6038_vm12 = vcmp.gt.f32.partialorder %v6037_v61, 0.0  ;;  %vm6048_vm13 = vmmov %vm6042_vm15 }
 0x225   : > { %v2761_v32 = vsel %vm2754_vm4, %v2742_v46, %v5299_v18  ;;  %v1673_v51 = vsel %vm6038_vm12, %v1655_v45, -1.0  ;;  %v1503_v20 = vmax.f32 %v1501_v3, %v1502_v39  ;;  %v2417_v28 = vrot.slane %v2327_v22, 6  ;;  %v1996_v45 = vpop.f32.mrf.mxu2  ;;  %vm6049_vm12 = vmmov %vm6043_vm7 }
 0x226   : > { %2779 = vst [vmem:[%s5213_s4 + $0x30] sm:$0xff] %v2761_v32  ;;  %vm1691_vm11 = vcmp.eq.f32.partialorder %v1673_v51, 1.0  ;;  %vm1727_vm1 = vcmp.ge.f32.partialorder %v1673_v51, 0.0  ;;  %v2507_v53 = vrot.slane %v1673_v51, 5  ;;  %v1505_v47 = vmax.f32 %v1441_v50, %v1504_v35  ;;  %v6047_v35 = vld [vmem:[#allocation27_spill] sm:$0xff]  ;;  %v3173_v32 = vld [vmem:[#allocation2 + $0x50] sm:$0xff] }
 0x227   : > { %v1709_v54 = vsel %vm1691_vm11, 1.0, %v5994_v6  ;;  %v2963_v26 = vsel %vm1727_vm1, 1.0, %v5994_v6  ;;  %vm1566_vm14 = vcmp.gt.f32.partialorder %v1503_v20, 0.0  ;;  %v2454_v27 = vsel %vm6039_vm8, %v2363_v25, %v2417_v28  ;;  %vm6050_vm1 = vmmov %vm6046_vm0 }
 0x228   : > { %v2561_v55 = vrot.slane %v1709_v54, 4  ;;  %v2615_v18 = vrot.slane %v2963_v26, 3  ;;  %v1584_v1 = vsel %vm1566_vm14, 1.0, %v6001_v40  ;;  %v2472_v60 = vsel %vm4771_vm2, %v2454_v27, 0.0  ;;  %vm6051_vm14 = vmmov %vm6043_vm7 }
 0x229   : > { %v1620_v36 = vsel %vm1602_vm5, 1.0, %v1584_v1  ;;  %v2670_v10 = vrot.slane %v2472_v60, 4  ;;  %v1506_v17 = vrot.slane %v1505_v47, 2  ;;  %v2166_v34 = vrot.slane %v3172_v2, 4  ;;  %v6052_v60 = vld [vmem:[#allocation16_spill] sm:$0xff] }
 0x22a   : > { %vm1603_vm9 = vcmp.ge.f32.partialorder %v6041_v13, 0.7  ;;  %v2706_v0 = vsel %vm6042_vm15, %v2507_v53, %v2561_v55  ;;  %v1656_v11 = vsel %vm1638_vm10, 0.0, %v1620_v36  ;;  %v2238_v31 = vrot.slane %v292_v38, 6 }
 0x22b   : > { %v2292_v4 = vrot.slane %v292_v38, 2  ;;  %vm1639_vm2 = vcmp.lt.f32.partialorder %v6041_v13, 0.3  ;;  %v2724_v56 = vsel %vm6043_vm7, %v2706_v0, %v2615_v18  ;;  %vm6045_vm5 = vcmp.gt.f32.partialorder %v6044_v24, 0.0 }
 0x22c   : > { %v1674_v8 = vsel %vm6045_vm5, %v1656_v11, -1.0  ;;  %v1507_v3 = vmax.f32 %v1505_v47, %v1506_v17  ;;  %v2202_v37 = vsub.f32 %v1976_v7, %v2166_v34  ;;  %v2743_v16 = vsel %vm6046_vm0, %v2724_v56, 0.0  ;;  %v6054_v11 = vld [vmem:[#allocation32_spill] sm:$0xff]  ;;  %v3174_v56 = vld [vmem:[#allocation2 + $0x58] sm:$0xff] }
 0x22d   : > { %vm1692_vm3 = vcmp.eq.f32.partialorder %v1674_v8, 1.0  ;;  %vm1728_vm6 = vcmp.ge.f32.partialorder %v1674_v8, 0.0  ;;  %v2508_v63 = vrot.slane %v1674_v8, 5  ;;  %v2762_v43 = vsel %vm2754_vm4, %v2743_v16, %v5322_v57  ;;  %v6056_v8 = vld [vmem:[#allocation43_spill] sm:$0xff] }
 0x22e   : > { %v1710_v15 = vsel %vm1692_vm3, 1.0, %v5994_v6  ;;  %v2964_v50 = vsel %vm1728_vm6, 1.0, %v5994_v6  ;;  %v1508_v14 = vrot.slane %v1507_v3, 1  ;;  %2780 = vst [vmem:[%s5213_s4 + $0x38] sm:$0xff] %v2762_v43  ;;  %v2274_v22 = vmul.f32 %v2238_v31, %v2202_v37  ;;  %v294_v37 = vld [vmem:[#allocation2 + $0xe8] sm:$0xff]  ;;  %vm6057_vm3 = vmmov %vm6049_vm12 }
 0x22f   : > { %v2562_v59 = vrot.slane %v1710_v15, 4  ;;  %v2616_v39 = vrot.slane %v2964_v50, 3  ;;  %v2328_v46 = vsub.f32 %v1976_v7, %v2292_v4  ;;  %vm1424_vm10 = vcmp.eq.f32.partialorder %v6047_v35, %v5101_v41  ;;  %vm6058_vm6 = vmmov %vm6048_vm13  ;;  %v6059_v35 = vld [vmem:[#allocation17_spill] sm:$0xff] }
 0x230   : > { %v1509_v25 = vmax.f32 %v1507_v3, %v1508_v14  ;;  %v2167_v61 = vrot.slane %v3173_v32, 4  ;;  %v2239_v51 = vrot.slane %v293_v29, 6  ;;  %v2364_v20 = vrot.slane %v2274_v22, 2 }
 0x231   : > { %v2707_v57 = vsel %vm6048_vm13, %v2508_v63, %v2562_v59  ;;  %v2418_v28 = vrot.slane %v2328_v46, 6  ;;  %v1442_v53 = vsel %vm1424_vm10, 1.0, %v5994_v6  ;;  %v2293_v18 = vrot.slane %v293_v29, 2 }
 0x232   : > { %v2725_v47 = vsel %vm6049_vm12, %v2707_v57, %v2616_v39  ;;  %vm1567_vm11 = vcmp.gt.f32.partialorder %v1509_v25, 0.0  ;;  %v1510_v54 = vrot.slane %v1442_v53, 4  ;;  %v2203_v26 = vsub.f32 %v1996_v45, %v2167_v61  ;;  %vm6061_vm12 = vmmov %vm6057_vm3 }
 0x233   : > { %v2744_v27 = vsel %vm6050_vm1, %v2725_v47, 0.0  ;;  %v1585_v38 = vsel %vm1567_vm11, 1.0, %v6001_v40  ;;  %v2455_v55 = vsel %vm6051_vm14, %v2364_v20, %v2418_v28  ;;  %vm6053_vm8 = vnez %v6052_v60  ;;  %vm6062_vm11 = vmmov %vm6050_vm1  ;;  %v3175_v60 = vld [vmem:[#allocation2 + $0x60] sm:$0xff] }
 0x234   : > { %v2763_v1 = vsel %vm2754_vm4, %v2744_v27, %v2670_v10  ;;  %v1621_v48 = vsel %vm1603_vm9, 1.0, %v1585_v38  ;;  %v2473_v7 = vsel %vm6053_vm8, %v2455_v55, 0.0  ;;  %v1511_v36 = vmax.f32 %v1442_v53, %v1510_v54  ;;  %v2016_v10 = vpop.f32.mrf.mxu3  ;;  %v295_v38 = vld [vmem:[#allocation2 + $0xf0] sm:$0xff] }
 0x235   : > { %2781 = vst [vmem:[%s5213_s4 + $0x40] sm:$0xff] %v2763_v1  ;;  %v1657_v17 = vsel %vm1639_vm2, 0.0, %v1621_v48  ;;  %v2671_v2 = vrot.slane %v2473_v7, 4  ;;  %v2275_v34 = vmul.f32 %v2239_v51, %v2203_v26  ;;  %v2329_v0 = vsub.f32 %v1996_v45, %v2293_v18 }
 0x236   : > { %vm6055_vm15 = vcmp.gt.f32.partialorder %v6054_v11, 0.0  ;;  %v1512_v4 = vrot.slane %v1511_v36, 2  ;;  %vm1425_vm7 = vcmp.eq.f32.partialorder %v4605_v21, %v5101_v41  ;;  %v2168_v24 = vrot.slane %v3174_v56, 4 }
 0x237   : > { %v1675_v31 = vsel %vm6055_vm15, %v1657_v17, -1.0  ;;  %vm1604_vm9 = vcmp.ge.f32.partialorder %v6056_v8, 0.7  ;;  %v2365_v13 = vrot.slane %v2275_v34, 2  ;;  %vm1640_vm2 = vcmp.lt.f32.partialorder %v6056_v8, 0.3  ;;  %vm6063_vm15 = vmmov %vm6057_vm3 }
 0x238   : > { %vm1693_vm5 = vcmp.eq.f32.partialorder %v1675_v31, 1.0  ;;  %vm1729_vm0 = vcmp.ge.f32.partialorder %v1675_v31, 0.0  ;;  %v2509_v3 = vrot.slane %v1675_v31, 5  ;;  %v1513_v29 = vmax.f32 %v1511_v36, %v1512_v4 }
 0x239   : > { %v1711_v16 = vsel %vm1693_vm5, 1.0, %v5994_v6  ;;  %v2965_v63 = vsel %vm1729_vm0, 1.0, %v5994_v6  ;;  %v2419_v43 = vrot.slane %v2329_v0, 6  ;;  %v1443_v14 = vsel %vm1425_vm7, 1.0, %v5994_v6 }
 0x23a   : > { %v2563_v15 = vrot.slane %v1711_v16, 4  ;;  %v2617_v50 = vrot.slane %v2965_v63, 3  ;;  %v2204_v59 = vsub.f32 %v2016_v10, %v2168_v24  ;;  %v1514_v39 = vrot.slane %v1513_v29, 1 }
 0x23b   : > { %v2456_v22 = vsel %vm6057_vm3, %v2365_v13, %v2419_v43  ;;  %v1516_v46 = vrot.slane %v1443_v14, 4  ;;  %v2240_v45 = vrot.slane %v294_v37, 6  ;;  %vm6060_vm10 = vnez %v6059_v35 }
 0x23c   : > { %v2708_v25 = vsel %vm6058_vm6, %v2509_v3, %v2563_v15  ;;  %v2474_v32 = vsel %vm6060_vm10, %v2456_v22, 0.0  ;;  %v2294_v61 = vrot.slane %v294_v37, 2  ;;  %vm1426_vm13 = vcmp.eq.f32.partialorder %v4609_v12, %v5101_v41  ;;  %v2036_v12 = vpop.f32.mrf.mxu0  ;;  %v6066_v3 = vld [vmem:[#allocation18_spill] sm:$0xff] }
 0x23d   : > { %v2726_v51 = vsel %vm6061_vm12, %v2708_v25, %v2617_v50  ;;  %v1515_v21 = vmax.f32 %v1513_v29, %v1514_v39  ;;  %v5404_v57 = vrot.slane %v2474_v32, 4  ;;  %v1517_v20 = vmax.f32 %v1443_v14, %v1516_v46  ;;  %v3176_v46 = vld [vmem:[#allocation2 + $0x68] sm:$0xff] }
 0x23e   : > { %v2745_v28 = vsel %vm6062_vm11, %v2726_v51, 0.0  ;;  %v2276_v53 = vmul.f32 %v2240_v45, %v2204_v59  ;;  %v2330_v47 = vsub.f32 %v2016_v10, %v2294_v61  ;;  %v1444_v54 = vsel %vm1426_vm13, 1.0, %v5994_v6  ;;  %v6064_v10 = vld [vmem:[#allocation33_spill] sm:$0xff] }
 0x23f   : > { %v2764_v26 = vsel %vm2754_vm4, %v2745_v28, %v2671_v2  ;;  %vm1568_vm1 = vcmp.gt.f32.partialorder %v1515_v21, 0.0  ;;  %v1518_v27 = vrot.slane %v1517_v20, 2  ;;  %v1522_v55 = vrot.slane %v1444_v54, 4 }
 0x240   : > { %vm1605_vm14 = vcmp.ge.f32.partialorder %v5013_v23, 0.7  ;;  %2782 = vst [vmem:[%s5213_s4 + $0x48] sm:$0xff] %v2764_v26  ;;  %v1586_v18 = vsel %vm1568_vm1, 1.0, %v6001_v40  ;;  %v2366_v1 = vrot.slane %v2276_v53, 2  ;;  %v2420_v48 = vrot.slane %v2330_v47, 6  ;;  %vm6069_vm1 = vmmov %vm6061_vm12 }
 0x241   : > { %v2169_v7 = vrot.slane %v3175_v60, 4  ;;  %vm1641_vm8 = vcmp.lt.f32.partialorder %v5013_v23, 0.3  ;;  %v1622_v36 = vsel %vm1604_vm9, 1.0, %v1586_v18  ;;  %v1519_v17 = vmax.f32 %v1517_v20, %v1518_v27  ;;  %v6070_v27 = vld [vmem:[#allocation34_spill] sm:$0xff] }
 0x242   : > { %v1523_v2 = vmax.f32 %v1444_v54, %v1522_v55  ;;  %v2241_v34 = vrot.slane %v295_v38, 6  ;;  %v1658_v0 = vsel %vm1640_vm2, 0.0, %v1622_v36  ;;  %v2457_v11 = vsel %vm6063_vm15, %v2366_v1, %v2420_v48  ;;  %v6072_v55 = vld [vmem:[#allocation19_spill] sm:$0xff]  ;;  %v2056_v48 = vpop.f32.mrf.mxu1 }
 0x243   : > { %v2205_v31 = vsub.f32 %v2036_v12, %v2169_v7  ;;  %v2295_v4 = vrot.slane %v295_v38, 2  ;;  %vm6065_vm7 = vcmp.gt.f32.partialorder %v6064_v10, 0.0  ;;  %v1520_v24 = vrot.slane %v1519_v17, 1  ;;  %v296_v1 = vld [vmem:[#allocation2 + $0xf8] sm:$0xff] }
 0x244   : > { %v1676_v56 = vsel %vm6065_vm7, %v1658_v0, -1.0  ;;  %vm6067_vm5 = vnez %v6066_v3  ;;  %v1524_v37 = vrot.slane %v1523_v2, 2  ;;  %vm1606_vm9 = vcmp.ge.f32.partialorder %v5032_v9, 0.7 }
 0x245   : > { %v2475_v13 = vsel %vm6067_vm5, %v2457_v11, 0.0  ;;  %vm1694_vm0 = vcmp.eq.f32.partialorder %v1676_v56, 1.0  ;;  %vm1730_vm3 = vcmp.ge.f32.partialorder %v1676_v56, 0.0  ;;  %v2510_v16 = vrot.slane %v1676_v56, 5  ;;  %v6074_v11 = vld [vmem:[#allocation35_spill] sm:$0xff] }
 0x246   : > { %v5423_v63 = vrot.slane %v2475_v13, 4  ;;  %vm1642_vm2 = vcmp.lt.f32.partialorder %v5032_v9, 0.3  ;;  %v1712_v8 = vsel %vm1694_vm0, 1.0, %v5994_v6  ;;  %v2966_v29 = vsel %vm1730_vm3, 1.0, %v5994_v6 }
 0x247   : > { %v1521_v43 = vmax.f32 %v1519_v17, %v1520_v24  ;;  %v1525_v15 = vmax.f32 %v1523_v2, %v1524_v37  ;;  %v2564_v50 = vrot.slane %v1712_v8, 4  ;;  %v2618_v14 = vrot.slane %v2966_v29, 3 }
 0x248   : > { %v2277_v59 = vmul.f32 %v2241_v34, %v2205_v31  ;;  %v2331_v39 = vsub.f32 %v2036_v12, %v2295_v4  ;;  %vm1427_vm10 = vcmp.eq.f32.partialorder %v4613_v49, %v5101_v41  ;;  %v2170_v45 = vrot.slane %v3176_v46, 4 }
 0x249   : > { %vm1569_vm6 = vcmp.gt.f32.partialorder %v1521_v43, 0.0  ;;  %v1526_v22 = vrot.slane %v1525_v15, 1  ;;  %vm6068_vm13 = vcmask 1040384   ;;  %v1445_v28 = vsel %vm1427_vm10, 1.0, %v5994_v6 }
 0x24a   : > { %v2709_v25 = vsel %vm6068_vm13, %v2510_v16, %v2564_v50  ;;  %v1587_v35 = vsel %vm1569_vm6, 1.0, %v6001_v40  ;;  %v2367_v32 = vrot.slane %v2277_v59, 2  ;;  %v2421_v61 = vrot.slane %v2331_v39, 6  ;;  %vm6076_vm3 = vmmov %vm6068_vm13  ;;  %v297_v39 = vld [vmem:[#allocation2 + $0x100] sm:$0xff] }
 0x24b   : > { %v2727_v51 = vsel %vm6061_vm12, %v2709_v25, %v2618_v14  ;;  %v1623_v21 = vsel %vm1605_vm14, 1.0, %v1587_v35  ;;  %v1527_v20 = vmax.f32 %v1525_v15, %v1526_v22  ;;  %v1528_v54 = vrot.slane %v1445_v28, 4  ;;  %vm6077_vm13 = vmmov %vm6069_vm1  ;;  %v2076_v22 = vpop.f32.mrf.mxu2  ;;  %v3177_v35 = vld [vmem:[#allocation2 + $0x70] sm:$0xff] }
 0x24c   : > { %v2746_v53 = vsel %vm6062_vm11, %v2727_v51, 0.0  ;;  %v1659_v49 = vsel %vm1641_vm8, 0.0, %v1623_v21  ;;  %v2458_v47 = vsel %vm6069_vm1, %v2367_v32, %v2421_v61  ;;  %vm6071_vm15 = vcmp.gt.f32.partialorder %v6070_v27, 0.0 }
 0x24d   : > { %v2765_v26 = vsel %vm2754_vm4, %v2746_v53, %v5404_v57  ;;  %v1677_v38 = vsel %vm6071_vm15, %v1659_v49, -1.0  ;;  %vm1570_vm7 = vcmp.gt.f32.partialorder %v1527_v20, 0.0  ;;  %vm6073_vm14 = vnez %v6072_v55  ;;  %v6082_v55 = vld [vmem:[#allocation20_spill] sm:$0xff] }
 0x24e   : > { %v2476_v12 = vsel %vm6073_vm14, %v2458_v47, 0.0  ;;  %2783 = vst [vmem:[%s5213_s4 + $0x50] sm:$0xff] %v2765_v26  ;;  %vm1695_vm5 = vcmp.eq.f32.partialorder %v1677_v38, 1.0  ;;  %vm1731_vm0 = vcmp.ge.f32.partialorder %v1677_v38, 0.0  ;;  %v2511_v18 = vrot.slane %v1677_v38, 5 }
 0x24f   : > { %v1588_v23 = vsel %vm1570_vm7, 1.0, %v6001_v40  ;;  %v1713_v60 = vsel %vm1695_vm5, 1.0, %v5994_v6  ;;  %v2967_v7 = vsel %vm1731_vm0, 1.0, %v5994_v6  ;;  %v2674_v36 = vrot.slane %v2476_v12, 4  ;;  %vm6081_vm7 = vmmov %vm6069_vm1 }
 0x250   : > { %v1624_v57 = vsel %vm1606_vm9, 1.0, %v1588_v23  ;;  %v2565_v17 = vrot.slane %v1713_v60, 4  ;;  %v2619_v2 = vrot.slane %v2967_v7, 3  ;;  %v1529_v0 = vmax.f32 %v1445_v28, %v1528_v54  ;;  %v298_v23 = vld [vmem:[#allocation2 + $0x108] sm:$0xff] }
 0x251   : > { %v1660_v34 = vsel %vm1642_vm2, 0.0, %v1624_v57  ;;  %vm6075_vm8 = vcmp.gt.f32.partialorder %v6074_v11, 0.0  ;;  %v2206_v4 = vsub.f32 %v2056_v48, %v2170_v45  ;;  %v2242_v10 = vrot.slane %v296_v1, 6  ;;  %vm6078_vm2 = vmmov %vm6062_vm11 }
 0x252   : > { %v1678_v31 = vsel %vm6075_vm8, %v1660_v34, -1.0  ;;  %v2296_v56 = vrot.slane %v296_v1, 2  ;;  %v2710_v24 = vsel %vm6076_vm3, %v2511_v18, %v2565_v17  ;;  %v1530_v16 = vrot.slane %v1529_v0, 2  ;;  %vm6079_vm11 = vmmov %vm6076_vm3 }
 0x253   : > { %vm1696_vm6 = vcmp.eq.f32.partialorder %v1678_v31, 1.0  ;;  %vm1732_vm10 = vcmp.ge.f32.partialorder %v1678_v31, 0.0  ;;  %v2512_v3 = vrot.slane %v1678_v31, 5  ;;  %v2728_v13 = vsel %vm6077_vm13, %v2710_v24, %v2619_v2  ;;  %vm6080_vm15 = vmmov %vm6078_vm2  ;;  %v3178_v2 = vld [vmem:[#allocation2 + $0x78] sm:$0xff] }
 0x254   : > { %v1714_v37 = vsel %vm1696_vm6, 1.0, %v5994_v6  ;;  %v2968_v9 = vsel %vm1732_vm10, 1.0, %v5994_v6  ;;  %vm1607_vm9 = vcmp.ge.f32.partialorder %v5049_v5, 0.7  ;;  %v2747_v8 = vsel %vm6078_vm2, %v2728_v13, 0.0 }
 0x255   : > { %v2566_v29 = vrot.slane %v1714_v37, 4  ;;  %v2620_v43 = vrot.slane %v2968_v9, 3  ;;  %v2278_v15 = vmul.f32 %v2242_v10, %v2206_v4  ;;  %v2766_v50 = vsel %vm2754_vm4, %v2747_v8, %v5423_v63  ;;  %v6084_v10 = vld [vmem:[#allocation36_spill] sm:$0xff] }
 0x256   : > { %v1531_v14 = vmax.f32 %v1529_v0, %v1530_v16  ;;  %v2332_v59 = vsub.f32 %v2056_v48, %v2296_v56  ;;  %vm1428_vm12 = vcmp.eq.f32.partialorder %v4617_v52, %v5101_v41  ;;  %2784 = vst [vmem:[%s5213_s4 + $0x58] sm:$0xff] %v2766_v50  ;;  %v2171_v32 = vrot.slane %v3177_v35, 4 }
 0x257   : > { %v2711_v46 = vsel %vm6079_vm11, %v2512_v3, %v2566_v29  ;;  %v2368_v45 = vrot.slane %v2278_v15, 2  ;;  %v1446_v25 = vsel %vm1428_vm12, 1.0, %v5994_v6  ;;  %v2243_v53 = vrot.slane %v297_v39, 6  ;;  %vm6086_vm12 = vmmov %vm6069_vm1 }
 0x258   : > { %v2729_v61 = vsel %vm6069_vm1, %v2711_v46, %v2620_v43  ;;  %v1532_v51 = vrot.slane %v1531_v14, 1  ;;  %v2422_v63 = vrot.slane %v2332_v59, 6  ;;  %v1534_v21 = vrot.slane %v1446_v25, 4  ;;  %v6087_v59 = vld [vmem:[#allocation21_spill] sm:$0xff] }
 0x259   : > { %v2748_v20 = vsel %vm6080_vm15, %v2729_v61, 0.0  ;;  %v2207_v28 = vsub.f32 %v2076_v22, %v2171_v32  ;;  %v2297_v52 = vrot.slane %v297_v39, 2  ;;  %vm1643_vm14 = vcmp.lt.f32.partialorder %v5049_v5, 0.3 }
 0x25a   : > { %v2767_v49 = vsel %vm2754_vm4, %v2748_v20, %v2674_v36  ;;  %v1533_v47 = vmax.f32 %v1531_v14, %v1532_v51  ;;  %v2459_v54 = vsel %vm6081_vm7, %v2368_v45, %v2422_v63  ;;  %v1535_v26 = vmax.f32 %v1446_v25, %v1534_v21  ;;  %v2096_v36 = vpop.f32.mrf.mxu3 }
 0x25b   : > { %2785 = vst [vmem:[%s5213_s4 + $0x60] sm:$0xff] %v2767_v49  ;;  %v2279_v27 = vmul.f32 %v2243_v53, %v2207_v28  ;;  %v2333_v38 = vsub.f32 %v2076_v22, %v2297_v52  ;;  %vm1429_vm5 = vcmp.eq.f32.partialorder %v4621_v19, %v5101_v41  ;;  %vm6083_vm8 = vnez %v6082_v55  ;;  %v3179_v28 = vld [vmem:[#allocation2 + $0x80] sm:$0xff]  ;;  %v6092_v49 = vld [vmem:[#allocation37_spill] sm:$0xff] }
 0x25c   : > { %vm1571_vm0 = vcmp.gt.f32.partialorder %v1533_v47, 0.0  ;;  %v2477_v12 = vsel %vm6083_vm8, %v2459_v54, 0.0  ;;  %v1536_v18 = vrot.slane %v1535_v26, 2  ;;  %v1447_v1 = vsel %vm1429_vm5, 1.0, %v5994_v6  ;;  %vm6090_vm5 = vmmov %vm6086_vm12 }
 0x25d   : > { %vm1608_vm3 = vcmp.ge.f32.partialorder %v5045_v44, 0.7  ;;  %v1589_v48 = vsel %vm1571_vm0, 1.0, %v6001_v40  ;;  %v2369_v60 = vrot.slane %v2279_v27, 2  ;;  %v2423_v7 = vrot.slane %v2333_v38, 6  ;;  %v2116_v27 = vpop.f32.mrf.mxu0 }
 0x25e   : > { %v1540_v57 = vrot.slane %v1447_v1, 4  ;;  %vm1644_vm6 = vcmp.lt.f32.partialorder %v5045_v44, 0.3  ;;  %v1625_v19 = vsel %vm1607_vm9, 1.0, %v1589_v48  ;;  %v1537_v17 = vmax.f32 %v1535_v26, %v1536_v18  ;;  %v299_v18 = vld [vmem:[#allocation2 + $0x110] sm:$0xff] }
 0x25f   : > { %v2172_v34 = vrot.slane %v3178_v2, 4  ;;  %v1661_v0 = vsel %vm1643_vm14, 0.0, %v1625_v19  ;;  %v2244_v31 = vrot.slane %v298_v23, 6  ;;  %v2298_v4 = vrot.slane %v298_v23, 2 }
 0x260   : > { %v1541_v11 = vmax.f32 %v1447_v1, %v1540_v57  ;;  %vm6085_vm10 = vcmp.gt.f32.partialorder %v6084_v10, 0.0  ;;  %v2675_v24 = vrot.slane %v2477_v12, 4  ;;  %v1538_v3 = vrot.slane %v1537_v17, 1 }
 0x261   : > { %v1679_v56 = vsel %vm6085_vm10, %v1661_v0, -1.0  ;;  %v2208_v13 = vsub.f32 %v2096_v36, %v2172_v34  ;;  %v2460_v9 = vsel %vm6086_vm12, %v2369_v60, %v2423_v7  ;;  %vm1609_vm9 = vcmp.ge.f32.partialorder %v5060_v33, 0.7 }
 0x262   : > { %vm1697_vm13 = vcmp.eq.f32.partialorder %v1679_v56, 1.0  ;;  %vm1733_vm2 = vcmp.ge.f32.partialorder %v1679_v56, 0.0  ;;  %v2513_v37 = vrot.slane %v1679_v56, 5  ;;  %v1539_v5 = vmax.f32 %v1537_v17, %v1538_v3 }
 0x263   : > { %v1715_v16 = vsel %vm1697_vm13, 1.0, %v5994_v6  ;;  %v2969_v8 = vsel %vm1733_vm2, 1.0, %v5994_v6  ;;  %v1542_v29 = vrot.slane %v1541_v11, 2  ;;  %v2280_v50 = vmul.f32 %v2244_v31, %v2208_v13  ;;  %vm6094_vm13 = vmmov %vm6090_vm5  ;;  %v3180_v13 = vld [vmem:[#allocation2 + $0x88] sm:$0xff] }
 0x264   : > { %v2567_v43 = vrot.slane %v1715_v16, 4  ;;  %v2621_v15 = vrot.slane %v2969_v8, 3  ;;  %v2334_v14 = vsub.f32 %v2096_v36, %v2298_v4  ;;  %vm1645_vm11 = vcmp.lt.f32.partialorder %v5060_v33, 0.3  ;;  %v6095_v36 = vld [vmem:[#allocation22_spill] sm:$0xff] }
 0x265   : > { %vm1572_vm1 = vcmp.gt.f32.partialorder %v1539_v5, 0.0  ;;  %vm6088_vm15 = vnez %v6087_v59  ;;  %v1543_v22 = vmax.f32 %v1541_v11, %v1542_v29  ;;  %vm1430_vm7 = vcmp.eq.f32.partialorder %v4625_v62, %v5101_v41  ;;  %v6099_v4 = vld [vmem:[#allocation38_spill] sm:$0xff]  ;;  %v2136_v5 = vpop.f32.mrf.mxu1 }
 0x266   : > { %v2478_v39 = vsel %vm6088_vm15, %v2460_v9, 0.0  ;;  %vm6089_vm14 = vcmask 1040384   ;;  %v1590_v45 = vsel %vm1572_vm1, 1.0, %v6001_v40  ;;  %v2370_v25 = vrot.slane %v2280_v50, 2  ;;  %vm6098_vm15 = vmmov %vm6090_vm5 }
 0x267   : > { %v2712_v46 = vsel %vm6089_vm14, %v2513_v37, %v2567_v43  ;;  %v2424_v35 = vrot.slane %v2334_v14, 6  ;;  %v1626_v61 = vsel %vm1608_vm3, 1.0, %v1590_v45  ;;  %v1544_v51 = vrot.slane %v1543_v22, 1  ;;  %vm6097_vm12 = vmmov %vm6089_vm14  ;;  %v300_v45 = vld [vmem:[#allocation2 + $0x118] sm:$0xff] }
 0x268   : > { %v2730_v32 = vsel %vm6090_vm5, %v2712_v46, %v2621_v15  ;;  %v1448_v63 = vsel %vm1430_vm7, 1.0, %v5994_v6  ;;  %vm6091_vm0 = vcmask 1042432   ;;  %v1662_v62 = vsel %vm1644_vm6, 0.0, %v1626_v61 }
 0x269   : > { %v2749_v21 = vsel %vm6091_vm0, %v2730_v32, 0.0  ;;  %v1546_v20 = vrot.slane %v1448_v63, 4  ;;  %v2173_v53 = vrot.slane %v3179_v28, 4  ;;  %vm6093_vm8 = vcmp.gt.f32.partialorder %v6092_v49, 0.0  ;;  %v6106_v49 = vld [vmem:[#allocation39_spill] sm:$0xff] }
 0x26a   : > { %v2768_v52 = vsel %vm2754_vm4, %v2749_v21, %v2675_v24  ;;  %v1680_v47 = vsel %vm6093_vm8, %v1662_v62, -1.0  ;;  %v2676_v54 = vrot.slane %v2478_v39, 4  ;;  %v1545_v26 = vmax.f32 %v1543_v22, %v1544_v51  ;;  %vm6103_vm8 = vmmov %vm6094_vm13 }
 0x26b   : > { %2786 = vst [vmem:[%s5213_s4 + $0x68] sm:$0xff] %v2768_v52  ;;  %vm1698_vm3 = vcmp.eq.f32.partialorder %v1680_v47, 1.0  ;;  %vm1734_vm10 = vcmp.ge.f32.partialorder %v1680_v47, 0.0  ;;  %v2514_v38 = vrot.slane %v1680_v47, 5  ;;  %v2461_v55 = vsel %vm6094_vm13, %v2370_v25, %v2424_v35 }
 0x26c   : > { %v1716_v44 = vsel %vm1698_vm3, 1.0, %v5994_v6  ;;  %v2970_v12 = vsel %vm1734_vm10, 1.0, %v5994_v6  ;;  %vm1573_vm6 = vcmp.gt.f32.partialorder %v1545_v26, 0.0  ;;  %v1547_v23 = vmax.f32 %v1448_v63, %v1546_v20 }
 0x26d   : > { %v2568_v1 = vrot.slane %v1716_v44, 4  ;;  %v2622_v48 = vrot.slane %v2970_v12, 3  ;;  %v1591_v60 = vsel %vm1573_vm6, 1.0, %v6001_v40  ;;  %v2209_v7 = vsub.f32 %v2116_v27, %v2173_v53  ;;  %vm6105_vm6 = vmmov %vm6103_vm8 }
 0x26e   : > { %v1627_v57 = vsel %vm1609_vm9, 1.0, %v1591_v60  ;;  %vm6096_vm2 = vnez %v6095_v36  ;;  %v1548_v17 = vrot.slane %v1547_v23, 2  ;;  %v2245_v2 = vrot.slane %v299_v18, 6  ;;  %vm6101_vm9 = vmmov %vm6091_vm0 }
 0x26f   : > { %v2479_v19 = vsel %vm6096_vm2, %v2461_v55, 0.0  ;;  %v2713_v34 = vsel %vm6097_vm12, %v2514_v38, %v2568_v1  ;;  %v1663_v0 = vsel %vm1645_vm11, 0.0, %v1627_v57  ;;  %v2299_v11 = vrot.slane %v299_v18, 2  ;;  %vm6102_vm0 = vmmov %vm6097_vm12 }
 0x270   : > { %vm1431_vm1 = vcmp.eq.f32.partialorder %v4647_v42, %v5101_v41  ;;  %v2731_v31 = vsel %vm6098_vm15, %v2713_v34, %v2622_v48  ;;  %vm6100_vm7 = vcmp.gt.f32.partialorder %v6099_v4, 0.0  ;;  %v1549_v56 = vmax.f32 %v1547_v23, %v1548_v17  ;;  %vm6104_vm13 = vmmov %vm6101_vm9  ;;  %v6114_v4 = vld [vmem:[#allocation40_spill] sm:$0xff] }
 0x271   : > { %v1681_v10 = vsel %vm6100_vm7, %v1663_v0, -1.0  ;;  %v2281_v24 = vmul.f32 %v2245_v2, %v2209_v7  ;;  %v2750_v3 = vsel %vm6101_vm9, %v2731_v31, 0.0  ;;  %v2174_v37 = vrot.slane %v3180_v13, 4  ;;  %vm6110_vm7 = vmmov %vm6102_vm0 }
 0x272   : > { %vm1699_vm14 = vcmp.eq.f32.partialorder %v1681_v10, 1.0  ;;  %vm1735_vm5 = vcmp.ge.f32.partialorder %v1681_v10, 0.0  ;;  %v2769_v33 = vsel %vm2754_vm4, %v2750_v3, %v2676_v54  ;;  %v1550_v8 = vrot.slane %v1549_v56, 1  ;;  %vm6111_vm9 = vmmov %vm6105_vm6 }
 0x273   : > { %v1717_v9 = vsel %vm1699_vm14, 1.0, %v5994_v6  ;;  %v2971_v16 = vsel %vm1735_vm5, 1.0, %v5994_v6  ;;  %2787 = vst [vmem:[%s5213_s4 + $0x70] sm:$0xff] %v2769_v33  ;;  %v2515_v29 = vrot.slane %v1681_v10, 5  ;;  %v2335_v50 = vsub.f32 %v2116_v27, %v2299_v11  ;;  %vm6112_vm14 = vmmov %vm6104_vm13 }
 0x274   : > { %v2569_v43 = vrot.slane %v1717_v9, 4  ;;  %v2623_v15 = vrot.slane %v2971_v16, 3  ;;  %v2677_v14 = vrot.slane %v2479_v19, 4  ;;  %v1551_v59 = vmax.f32 %v1549_v56, %v1550_v8  ;;  %v6116_v56 = vld [vmem:[#allocation24_spill] sm:$0xff] }
 0x275   : > { %v2371_v39 = vrot.slane %v2281_v24, 2  ;;  %v1449_v22 = vsel %vm1431_vm1, 1.0, %v5994_v6  ;;  %vm1610_vm11 = vcmp.ge.f32.partialorder %v5067_v58, 0.7  ;;  %v2210_v35 = vsub.f32 %v2136_v5, %v2174_v37 }
 0x276   : > { %v2714_v46 = vsel %vm6102_vm0, %v2515_v29, %v2569_v43  ;;  %v1552_v25 = vrot.slane %v1449_v22, 4  ;;  %vm1574_vm3 = vcmp.gt.f32.partialorder %v1551_v59, 0.0  ;;  %v2425_v61 = vrot.slane %v2335_v50, 6 }
 0x277   : > { %v2732_v32 = vsel %vm6103_vm8, %v2714_v46, %v2623_v15  ;;  %v2246_v51 = vrot.slane %v300_v45, 6  ;;  %vm1646_vm10 = vcmp.lt.f32.partialorder %v5067_v58, 0.3  ;;  %v1592_v42 = vsel %vm1574_vm3, 1.0, %v6001_v40  ;;  %v6108_v58 = vld [vmem:[#allocation23_spill] sm:$0xff]  ;;  %vm6113_vm8 = vmmov %vm6105_vm6 }
 0x278   : > { %v2751_v63 = vsel %vm6104_vm13, %v2732_v32, 0.0  ;;  %v1553_v41 = vmax.f32 %v1449_v22, %v1552_v25  ;;  %v1628_v62 = vsel %vm1610_vm11, 1.0, %v1592_v42  ;;  %v2462_v20 = vsel %vm6105_vm6, %v2371_v39, %v2425_v61 }
 0x279   : > { %v2770_v21 = vsel %vm2754_vm4, %v2751_v63, %v2677_v14  ;;  %v2300_v28 = vrot.slane %v300_v45, 2  ;;  %v1664_v53 = vsel %vm1646_vm10, 0.0, %v1628_v62  ;;  %vm6107_vm2 = vcmp.gt.f32.partialorder %v6106_v49, 0.0 }
 0x27a   : > { %2788 = vst [vmem:[%s5213_s4 + $0x78] sm:$0xff] %v2770_v21  ;;  %v1554_v52 = vrot.slane %v1553_v41, 2  ;;  %v1682_v47 = vsel %vm6107_vm2, %v1664_v53, -1.0  ;;  %v2282_v54 = vmul.f32 %v2246_v51, %v2210_v35  ;;  %vm6109_vm15 = vnez %v6108_v58  ;;  %vm6118_vm2 = vmmov %vm6110_vm7 }
 0x27b   : > { %vm1700_vm12 = vcmp.eq.f32.partialorder %v1682_v47, 1.0  ;;  %vm1736_vm1 = vcmp.ge.f32.partialorder %v1682_v47, 0.0  ;;  %v2480_v26 = vsel %vm6109_vm15, %v2462_v20, 0.0  ;;  %v2336_v44 = vsub.f32 %v2136_v5, %v2300_v28 }
 0x27c   : > { %v1555_v27 = vmax.f32 %v1553_v41, %v1554_v52  ;;  %v1718_v38 = vsel %vm1700_vm12, 1.0, %v5994_v6  ;;  %v2972_v55 = vsel %vm1736_vm1, 1.0, %v5994_v6  ;;  %v2516_v12 = vrot.slane %v1682_v47, 5  ;;  %vm6119_vm12 = vmmov %vm6113_vm8 }
 0x27d   : > { %v2570_v18 = vrot.slane %v1718_v38, 4  ;;  %v2624_v23 = vrot.slane %v2972_v55, 3  ;;  %v2678_v48 = vrot.slane %v2480_v26, 4  ;;  %v2372_v57 = vrot.slane %v2282_v54, 2  ;;  %vm6120_vm1 = vmmov %vm6112_vm14 }
 0x27e   : > { %v1556_v1 = vrot.slane %v1555_v27, 1  ;;  %v2426_v17 = vrot.slane %v2336_v44, 6  ;;  %vm1611_vm11 = vcmp.ge.f32.partialorder %v5069_v30, 0.7  ;;  %vm1647_vm0 = vcmp.lt.f32.partialorder %v5069_v30, 0.3 }
 0x27f   : > { %v2715_v60 = vsel %vm6110_vm7, %v2516_v12, %v2570_v18  ;;  %vm6115_vm3 = vcmp.gt.f32.partialorder %v6114_v4, 0.0  ;;  %vm6117_vm6 = vnez %v6116_v56 }
 0x280   : > { %v1557_v7 = vmax.f32 %v1555_v27, %v1556_v1  ;;  %v2733_v36 = vsel %vm6111_vm9, %v2715_v60, %v2624_v23  ;;  %v2463_v11 = vsel %vm6113_vm8, %v2372_v57, %v2426_v17 }
 0x281   : > { %v2752_v19 = vsel %vm6112_vm14, %v2733_v36, 0.0  ;;  %v2481_v24 = vsel %vm6117_vm6, %v2463_v11, 0.0 }
 0x282   : > { %vm1575_vm5 = vcmp.gt.f32.partialorder %v1557_v7, 0.0  ;;  %v2771_v2 = vsel %vm2754_vm4, %v2752_v19, %v2678_v48  ;;  %v2679_v33 = vrot.slane %v2481_v24, 4 }
 0x283   : > { %v1593_v34 = vsel %vm1575_vm5, 1.0, %v6001_v40  ;;  %2789 = vst [vmem:[%s5213_s4 + $0x80] sm:$0xff] %v2771_v2 }
 0x284   : > { %v1629_v0 = vsel %vm1611_vm11, 1.0, %v1593_v34 }
 0x285   : > { %v1665_v31 = vsel %vm1647_vm0, 0.0, %v1629_v0 }
 0x286   : > { %v1683_v10 = vsel %vm6115_vm3, %v1665_v31, -1.0 }
 0x287   : > { %vm1701_vm10 = vcmp.eq.f32.partialorder %v1683_v10, 1.0  ;;  %vm1737_vm13 = vcmp.ge.f32.partialorder %v1683_v10, 0.0  ;;  %v2517_v3 = vrot.slane %v1683_v10, 5 }
 0x288   : > { %v1719_v30 = vsel %vm1701_vm10, 1.0, %v5994_v6  ;;  %v2973_v40 = vsel %vm1737_vm13, 1.0, %v5994_v6 }
 0x289   : > { %v2571_v13 = vrot.slane %v1719_v30, 4  ;;  %v2625_v37 = vrot.slane %v2973_v40, 3 }
 0x28b   : > { %v2716_v9 = vsel %vm6118_vm2, %v2517_v3, %v2571_v13 }
 0x28c   : > { %v2734_v16 = vsel %vm6119_vm12, %v2716_v9, %v2625_v37 }
 0x28d   : > { %v2753_v8 = vsel %vm6120_vm1, %v2734_v16, 0.0 }
 0x28e   : > { %v2772_v5 = vsel %vm2754_vm4, %v2753_v8, %v2679_v33 }
 0x28f   : > { %2790 = vst [vmem:[%s5213_s4 + $0x88] sm:$0xff] %v2772_v5 }
 0x290   : > { %3298 = shalt.err (!%p3295_p1)
}
 0x291   : > { %3023 = dma.vmem_to_hbm [thread:$0]  (%p3441_p8), %s2808_s30, 2304, %s2810_s7, %s2792_s8  }
 0x292 PF: > { %s2821_s21 = sand.u32 1, %s3337_s12   ;;  %p3037_p2 = pnand %p2929_p10, %p3448_p9 }
 0x293   : > { %s2822_s18 = scalar_lea.sflag [#allocation4], %s2821_s21 }
 0x294   : > { %p3038_p4 = pneg %p3037_p2 }
 0x296   : > { %3332 = dma.done.wait (%p3038_p4), %s2822_s18, 2304  }
 0x297   : > { %3334 = vsyncadd (%p3038_p4), %s2822_s18, 4294964992  ;;  %s20_s17 = sadd.s32 1, %s3357_s17   ;;  %s6121_s12 = smov %s3341_s13 }
 0x298   : > { %p17_p5 = scmp.ge.s32.totalorder %s20_s17, 4   ;;  %s6122_s13 = smov %s3345_s14 }
 0x299   : > { %s6123_s14 = smov %s3453_s26  ;;  %s6124_s15 = smov %s3353_s16 }
 0x29a   : > { %s6125_s16 = smov %s6127_s20  ;;  %19 = sbr.rel (!%p17_p5) target bundleno = 7 (0x7), region = 94 }
 0x29f   :  { %2828 = vsyncpa [#allocation3], 1 }
 0x2a0   :  { %2830 = vsyncpa [#allocation3 + $0x1], 1 }
 0x2a1   :  { %2831 = vsyncpa [#allocation6], 1 }
 0x2a2   :  { %2833 = vsyncpa [#allocation6 + $0x1], 1 }
 0x2a3   :  { %2834 = vsyncpa [#allocation4], 1 }
 0x2a4   :  { %2836 = vsyncpa [#allocation4 + $0x1], 1 }

</bundles_post_ra>
